<compile_context>
chip_gen: v6e
topology: v6e:2x2x1
jax: 0.10.0
libtpu: 0.0.40
codegen_flags: <defaults>
</compile_context>

<pallas_src>
from functools import partial

import jax
import jax.numpy as jnp
from jax import lax
from jax.experimental import pallas as pl
from jax.experimental.pallas import tpu as pltpu

IN_DIM = 28 * 28   # 784
IN_PAD = 896       # 7 * 128 — lane-aligned K for the first matmul
HID = 1024
OUT_DIM = 50
OUT_PAD = 128      # lane-dense (unmasked) output stores
BN_EPS = 1e-5
NEG_SLOPE = 0.2
VMEM_LIMIT = 24 * 1024 * 1024


def _leaky_relu(x, slope=NEG_SLOPE):
    return jnp.where(x > 0, x, slope * x)


# -------- pass 1: Linear -> LeakyReLU -> Linear (+ per-tile BN partial stats) --------
def _pass1_kernel(x_ref, w1_ref, b1_ref, w2_ref, h2_ref, sum_ref, sq_ref):
    # x_ref, w1_ref, w2_ref are bf16; all matmuls accumulate in f32 on the MXU.
    h1 = jnp.dot(x_ref[...], w1_ref[...], preferred_element_type=jnp.float32)
    h1 = _leaky_relu(h1 + b1_ref[...])                               # (TB, 1024) f32

    # NOTE: b2 intentionally omitted — cancelled by the BatchNorm mean subtraction.
    h2 = jnp.dot(h1.astype(jnp.bfloat16), w2_ref[...],
                 preferred_element_type=jnp.float32)                 # (TB, 1024) f32

    h2_ref[...] = h2.astype(jnp.bfloat16)                            # bf16 HBM round trip
    sum_ref[...] = jnp.sum(h2, axis=0, keepdims=True).reshape(1, 1, HID)
    sq_ref[...] = jnp.sum(h2 * h2, axis=0, keepdims=True).reshape(1, 1, HID)


# -------- pass 2: BatchNorm(affine) -> LeakyReLU -> Linear(1024 -> 128 padded) --------
def _pass2_kernel(h2_ref, scale_ref, shift_ref, w3_ref, b3_ref, out_ref):
    h2 = h2_ref[...].astype(jnp.float32)                             # bf16 -> f32 (small)
    h2n = _leaky_relu(h2 * scale_ref[...] + shift_ref[...])          # fused BN
    out_ref[...] = jnp.dot(h2n.astype(jnp.bfloat16), w3_ref[...],
                           preferred_element_type=jnp.float32) + b3_ref[...]


def _pick_block_b(batch):
    # Prefer large MXU-friendly tiles, but keep >= 2 tiles when the batch allows so
    # the "parallel" grid axis can shard across v7x's two TensorCores.
    for tb in (512, 256, 128, 64, 32, 16, 8):
        if batch % tb == 0 and batch // tb >= 2:
            return tb
    return batch  # tiny batch: single full-batch tile


def prepare_params(params):
    """One-time parameter prep (bf16 casts, lane padding) — hoisted out of the forward."""
    (w1, b1, w2, b2, gamma, beta, w3, b3) = params
    del b2  # cancelled by train-mode BatchNorm mean subtraction (exact in real arithmetic)
    w1p = jnp.pad(w1, ((0, IN_PAD - IN_DIM), (0, 0))).astype(jnp.bfloat16)   # (896, 1024)
    w2b = w2.astype(jnp.bfloat16)                                            # (1024, 1024)
    w3p = jnp.pad(w3, ((0, 0), (0, OUT_PAD - OUT_DIM))).astype(jnp.bfloat16) # (1024, 128)
    b3p = jnp.pad(b3, ((0, 0), (0, OUT_PAD - OUT_DIM)))                      # (1, 128) f32
    return (w1p, b1, w2b, gamma, beta, w3p, b3p)


@partial(jax.jit, static_argnames=("block_b",))
def encoder_forward(x, prepared, block_b=None):
    (w1p, b1, w2b, gamma, beta, w3p, b3p) = prepared
    B = x.shape[0]
    tb = block_b if block_b is not None else _pick_block_b(B)
    assert B % tb == 0, (B, tb)
    nt = B // tb

    # Per-call input prep: lane-align K (784 -> 896) and halve x's DMA traffic.
    xb = jnp.pad(x, ((0, 0), (0, IN_PAD - IN_DIM))).astype(jnp.bfloat16)

    cparams = pltpu.CompilerParams(
        dimension_semantics=("parallel",),
        vmem_limit_bytes=VMEM_LIMIT,
    )

    def const_spec(shape):
        # Constant index_map -> VMEM-resident; single-buffered (no re-DMA, no 2x footprint).
        return pl.BlockSpec(shape, lambda i: (0,) * len(shape),
                            pipeline_mode=pl.Buffered(1))

    # ---- pass 1 ----
    h2, tile_sum, tile_sq = pl.pallas_call(
        _pass1_kernel,
        grid=(nt,),
        out_shape=(
            jax.ShapeDtypeStruct((B, HID), jnp.bfloat16),
            jax.ShapeDtypeStruct((nt, 1, HID), jnp.float32),
            jax.ShapeDtypeStruct((nt, 1, HID), jnp.float32),
        ),
        in_specs=[
            pl.BlockSpec((tb, IN_PAD), lambda i: (i, 0)),     # x tile (bf16)
            const_spec((IN_PAD, HID)),                        # w1 (bf16, resident)
            const_spec((1, HID)),                             # b1 (f32)
            const_spec((HID, HID)),                           # w2 (bf16, resident)
        ],
        out_specs=[
            pl.BlockSpec((tb, HID), lambda i: (i, 0)),        # h2 tile (bf16)
            pl.BlockSpec((1, 1, HID), lambda i: (i, 0, 0)),   # per-tile sum
            pl.BlockSpec((1, 1, HID), lambda i: (i, 0, 0)),   # per-tile sum of squares
        ],
        compiler_params=cparams,
    )(xb, w1p, b1, w2b)

    # ---- global training-mode BatchNorm statistics (tiny cross-tile reduce) ----
    mean = jnp.sum(tile_sum, axis=0) / B                                # (1, HID)
    var = jnp.maximum(jnp.sum(tile_sq, axis=0) / B - mean * mean, 0.0)  # biased var
    inv = lax.rsqrt(var + BN_EPS)
    scale = gamma * inv                                                 # (1, HID)
    shift = beta - mean * scale                                         # (1, HID)

    # ---- pass 2 ----
    out = pl.pallas_call(
        _pass2_kernel,
        grid=(nt,),
        out_shape=jax.ShapeDtypeStruct((B, OUT_PAD), jnp.float32),
        in_specs=[
            pl.BlockSpec((tb, HID), lambda i: (i, 0)),        # h2 tile (bf16)
            const_spec((1, HID)),                             # scale (f32)
            const_spec((1, HID)),                             # shift (f32)
            const_spec((HID, OUT_PAD)),                       # w3 (bf16, padded, resident)
            const_spec((1, OUT_PAD)),                         # b3 (f32, padded)
        ],
        out_specs=pl.BlockSpec((tb, OUT_PAD), lambda i: (i, 0)),
        compiler_params=cparams,
    )(h2, scale, shift, w3p, b3p)

    return out[:, :OUT_DIM]


def init_params(key):
    """Deterministic synthetic init matching the PyTorch module's parameter shapes."""
    ks = jax.random.split(key, 8)

    def linear(kw, kb, fan_in, fan_out):
        bound = 1.0 / jnp.sqrt(fan_in)
        w = jax.random.uniform(kw, (fan_in, fan_out), jnp.float32, -bound, bound)
        b = jax.random.uniform(kb, (1, fan_out), jnp.float32, -bound, bound)
        return w, b

    w1, b1 = linear(ks[0], ks[1], IN_DIM, HID)
    w2, b2 = linear(ks[2], ks[3], HID, HID)
    gamma = jnp.ones((1, HID), jnp.float32)    # BatchNorm1d weight init
    beta = jnp.zeros((1, HID), jnp.float32)    # BatchNorm1d bias init
    w3, b3 = linear(ks[4], ks[5], HID, OUT_DIM)
    return (w1, b1, w2, b2, gamma, beta, w3, b3)


def encoder_reference(x, params):
    """Plain-JAX f32 reference of the full PyTorch module (train-mode BatchNorm)."""
    (w1, b1, w2, b2, gamma, beta, w3, b3) = params
    h1 = _leaky_relu(x @ w1 + b1)
    h2 = h1 @ w2 + b2
    mean = jnp.mean(h2, axis=0, keepdims=True)
    var = jnp.mean((h2 - mean) ** 2, axis=0, keepdims=True)
    h2n = (h2 - mean) / jnp.sqrt(var + BN_EPS) * gamma + beta
    h2n = _leaky_relu(h2n)
    return h2n @ w3 + b3


if __name__ == "__main__":
    key = jax.random.PRNGKey(0)
    k_x, k_p = jax.random.split(key)

    B = 32  # small batch; block_b=16 exercises the tiled grid (nt=2) + global BN stats
    x = jax.random.normal(k_x, (B, IN_DIM), dtype=jnp.float32)
    params = init_params(k_p)
    prepared = prepare_params(params)   # one-time bf16/padding prep

    out = encoder_forward(x, prepared, block_b=16)
    out = jax.block_until_ready(out)

    ref = encoder_reference(x, params)
    assert out.shape == (B, OUT_DIM), out.shape
    max_err = float(jnp.max(jnp.abs(out - ref)))
    # bf16 weights *and* bf16 activation operands loosen numerics vs the f32 reference
    assert jnp.allclose(out, ref, atol=5e-2, rtol=5e-2), max_err

    print("KERNEL_OK")
</pallas_src>

<mosaic_0001>
module attributes {stable_mosaic.version = 11 : i64} {
  func.func @_pass1_kernel(%arg0: i32, %arg1: memref<16x896xbf16, #tpu.memory_space<vmem>>, %arg2: memref<896x1024xbf16, #tpu.memory_space<vmem>>, %arg3: memref<1x1024xf32, #tpu.memory_space<vmem>>, %arg4: memref<1024x1024xbf16, #tpu.memory_space<vmem>>, %arg5: memref<16x1024xbf16, #tpu.memory_space<vmem>>, %arg6: memref<1x1x1024xf32, #tpu.memory_space<vmem>>, %arg7: memref<1x1x1024xf32, #tpu.memory_space<vmem>>) attributes {dimension_semantics = [#tpu.dimension_semantics<parallel>], iteration_bounds = array<i64: 2>, scalar_prefetch = 0 : i64, scratch_operands = 0 : i64, tpu.core_type = #tpu.core_type<tc>, window_params = [{transform_indices = @transform_0, window_bounds = array<i64: 16, 896>}, {pipeline_mode = #tpu.pipeline_mode<synchronous>, transform_indices = @transform_1, window_bounds = array<i64: 896, 1024>}, {pipeline_mode = #tpu.pipeline_mode<synchronous>, transform_indices = @transform_2, window_bounds = array<i64: 1, 1024>}, {pipeline_mode = #tpu.pipeline_mode<synchronous>, transform_indices = @transform_3, window_bounds = array<i64: 1024, 1024>}, {transform_indices = @transform_4, window_bounds = array<i64: 16, 1024>}, {transform_indices = @transform_5, window_bounds = array<i64: 1, 1, 1024>}, {transform_indices = @transform_6, window_bounds = array<i64: 1, 1, 1024>}]} {
    %c0 = arith.constant 0 : index
    %c0_0 = arith.constant 0 : index
    %0 = vector.load %arg1[%c0, %c0_0] : memref<16x896xbf16, #tpu.memory_space<vmem>>, vector<16x896xbf16>
    %c0_1 = arith.constant 0 : index
    %c0_2 = arith.constant 0 : index
    %1 = vector.load %arg2[%c0_1, %c0_2] : memref<896x1024xbf16, #tpu.memory_space<vmem>>, vector<896x1024xbf16>
    %cst = arith.constant dense<0.000000e+00> : vector<16x1024xf32>
    %2 = tpu.matmul %0, %1, %cst {dimension_numbers = #tpu.dot_dimension_numbers<[1], [0], [0], [1], [0, 0, 1, 1], [], []>} : vector<16x896xbf16>, vector<896x1024xbf16>, vector<16x1024xf32> -> vector<16x1024xf32>
    %c0_3 = arith.constant 0 : index
    %c0_4 = arith.constant 0 : index
    %3 = vector.load %arg3[%c0_3, %c0_4] : memref<1x1024xf32, #tpu.memory_space<vmem>>, vector<1x1024xf32>
    %4 = vector.broadcast %3 : vector<1x1024xf32> to vector<16x1024xf32>
    %5 = arith.addf %2, %4 : vector<16x1024xf32>
    %cst_5 = arith.constant 0.000000e+00 : f32
    %6 = vector.broadcast %cst_5 : f32 to vector<16x1024xf32>
    %7 = arith.cmpf ogt, %5, %6 : vector<16x1024xf32>
    %cst_6 = arith.constant 2.000000e-01 : f32
    %8 = vector.broadcast %cst_6 : f32 to vector<16x1024xf32>
    %9 = arith.mulf %8, %5 : vector<16x1024xf32>
    %10 = arith.select %7, %5, %9 : vector<16x1024xi1>, vector<16x1024xf32>
    %11 = arith.truncf %10 : vector<16x1024xf32> to vector<16x1024xbf16>
    %c0_7 = arith.constant 0 : index
    %c0_8 = arith.constant 0 : index
    %12 = vector.load %arg4[%c0_7, %c0_8] : memref<1024x1024xbf16, #tpu.memory_space<vmem>>, vector<1024x1024xbf16>
    %cst_9 = arith.constant dense<0.000000e+00> : vector<16x1024xf32>
    %13 = tpu.matmul %11, %12, %cst_9 {dimension_numbers = #tpu.dot_dimension_numbers<[1], [0], [0], [1], [0, 0, 1, 1], [], []>} : vector<16x1024xbf16>, vector<1024x1024xbf16>, vector<16x1024xf32> -> vector<16x1024xf32>
    %14 = arith.truncf %13 : vector<16x1024xf32> to vector<16x1024xbf16>
    %c0_10 = arith.constant 0 : index
    %c0_11 = arith.constant 0 : index
    %15 = vector.load %arg5[%c0_10, %c0_11] : memref<16x1024xbf16, #tpu.memory_space<vmem>>, vector<16x1024xbf16>
    tpu.vector_store %arg5[%c0_10, %c0_11], %14 {strides = array<i32>} : memref<16x1024xbf16, #tpu.memory_space<vmem>>, vector<16x1024xbf16>,
    %cst_12 = arith.constant dense<0.000000e+00> : vector<1024xf32>
    %16 = vector.multi_reduction <add>, %13, %cst_12 [0] : vector<16x1024xf32> to vector<1024xf32>
    %17 = vector.shape_cast %16 : vector<1024xf32> to vector<1x1024xf32>
    %18 = vector.shape_cast %17 : vector<1x1024xf32> to vector<1x1x1024xf32>
    %c0_13 = arith.constant 0 : index
    %c0_14 = arith.constant 0 : index
    %c0_15 = arith.constant 0 : index
    %19 = vector.load %arg6[%c0_13, %c0_14, %c0_15] : memref<1x1x1024xf32, #tpu.memory_space<vmem>>, vector<1x1x1024xf32>
    tpu.vector_store %arg6[%c0_13, %c0_14, %c0_15], %18 {strides = array<i32>} : memref<1x1x1024xf32, #tpu.memory_space<vmem>>, vector<1x1x1024xf32>,
    %20 = arith.mulf %13, %13 : vector<16x1024xf32>
    %cst_16 = arith.constant dense<0.000000e+00> : vector<1024xf32>
    %21 = vector.multi_reduction <add>, %20, %cst_16 [0] : vector<16x1024xf32> to vector<1024xf32>
    %22 = vector.shape_cast %21 : vector<1024xf32> to vector<1x1024xf32>
    %23 = vector.shape_cast %22 : vector<1x1024xf32> to vector<1x1x1024xf32>
    %c0_17 = arith.constant 0 : index
    %c0_18 = arith.constant 0 : index
    %c0_19 = arith.constant 0 : index
    %24 = vector.load %arg7[%c0_17, %c0_18, %c0_19] : memref<1x1x1024xf32, #tpu.memory_space<vmem>>, vector<1x1x1024xf32>
    tpu.vector_store %arg7[%c0_17, %c0_18, %c0_19], %23 {strides = array<i32>} : memref<1x1x1024xf32, #tpu.memory_space<vmem>>, vector<1x1x1024xf32>,
    return
  }
  func.func @transform_0(%arg0: i32) -> (i32, i32) {
    %c0_i32 = arith.constant 0 : i32
    %c0_i32_0 = arith.constant 0 : i32
    return %arg0, %c0_i32 : i32, i32
  }
  func.func @transform_1(%arg0: i32) -> (i32, i32) {
    %c0_i32 = arith.constant 0 : i32
    %c0_i32_0 = arith.constant 0 : i32
    %c0_i32_1 = arith.constant 0 : i32
    return %c0_i32, %c0_i32_0 : i32, i32
  }
  func.func @transform_2(%arg0: i32) -> (i32, i32) {
    %c0_i32 = arith.constant 0 : i32
    %c0_i32_0 = arith.constant 0 : i32
    %c0_i32_1 = arith.constant 0 : i32
    return %c0_i32, %c0_i32_0 : i32, i32
  }
  func.func @transform_3(%arg0: i32) -> (i32, i32) {
    %c0_i32 = arith.constant 0 : i32
    %c0_i32_0 = arith.constant 0 : i32
    %c0_i32_1 = arith.constant 0 : i32
    return %c0_i32, %c0_i32_0 : i32, i32
  }
  func.func @transform_4(%arg0: i32) -> (i32, i32) {
    %c0_i32 = arith.constant 0 : i32
    %c0_i32_0 = arith.constant 0 : i32
    return %arg0, %c0_i32 : i32, i32
  }
  func.func @transform_5(%arg0: i32) -> (i32, i32, i32) {
    %c0_i32 = arith.constant 0 : i32
    %c0_i32_0 = arith.constant 0 : i32
    %c0_i32_1 = arith.constant 0 : i32
    return %arg0, %c0_i32, %c0_i32_0 : i32, i32, i32
  }
  func.func @transform_6(%arg0: i32) -> (i32, i32, i32) {
    %c0_i32 = arith.constant 0 : i32
    %c0_i32_0 = arith.constant 0 : i32
    %c0_i32_1 = arith.constant 0 : i32
    return %arg0, %c0_i32, %c0_i32_0 : i32, i32, i32
  }
}

module attributes {stable_mosaic.version = 11 : i64} {
  func.func @_pass2_kernel(%arg0: i32, %arg1: memref<16x1024xbf16, #tpu.memory_space<vmem>>, %arg2: memref<1x1024xf32, #tpu.memory_space<vmem>>, %arg3: memref<1x1024xf32, #tpu.memory_space<vmem>>, %arg4: memref<1024x128xbf16, #tpu.memory_space<vmem>>, %arg5: memref<1x128xf32, #tpu.memory_space<vmem>>, %arg6: memref<16x128xf32, #tpu.memory_space<vmem>>) attributes {dimension_semantics = [#tpu.dimension_semantics<parallel>], iteration_bounds = array<i64: 2>, scalar_prefetch = 0 : i64, scratch_operands = 0 : i64, tpu.core_type = #tpu.core_type<tc>, window_params = [{transform_indices = @transform_0, window_bounds = array<i64: 16, 1024>}, {pipeline_mode = #tpu.pipeline_mode<synchronous>, transform_indices = @transform_1, window_bounds = array<i64: 1, 1024>}, {pipeline_mode = #tpu.pipeline_mode<synchronous>, transform_indices = @transform_2, window_bounds = array<i64: 1, 1024>}, {pipeline_mode = #tpu.pipeline_mode<synchronous>, transform_indices = @transform_3, window_bounds = array<i64: 1024, 128>}, {pipeline_mode = #tpu.pipeline_mode<synchronous>, transform_indices = @transform_4, window_bounds = array<i64: 1, 128>}, {transform_indices = @transform_5, window_bounds = array<i64: 16, 128>}]} {
    %c0 = arith.constant 0 : index
    %c0_0 = arith.constant 0 : index
    %0 = vector.load %arg1[%c0, %c0_0] : memref<16x1024xbf16, #tpu.memory_space<vmem>>, vector<16x1024xbf16>
    %1 = arith.extf %0 : vector<16x1024xbf16> to vector<16x1024xf32>
    %c0_1 = arith.constant 0 : index
    %c0_2 = arith.constant 0 : index
    %2 = vector.load %arg2[%c0_1, %c0_2] : memref<1x1024xf32, #tpu.memory_space<vmem>>, vector<1x1024xf32>
    %3 = vector.broadcast %2 : vector<1x1024xf32> to vector<16x1024xf32>
    %4 = arith.mulf %1, %3 : vector<16x1024xf32>
    %c0_3 = arith.constant 0 : index
    %c0_4 = arith.constant 0 : index
    %5 = vector.load %arg3[%c0_3, %c0_4] : memref<1x1024xf32, #tpu.memory_space<vmem>>, vector<1x1024xf32>
    %6 = vector.broadcast %5 : vector<1x1024xf32> to vector<16x1024xf32>
    %7 = arith.addf %4, %6 : vector<16x1024xf32>
    %cst = arith.constant 0.000000e+00 : f32
    %8 = vector.broadcast %cst : f32 to vector<16x1024xf32>
    %9 = arith.cmpf ogt, %7, %8 : vector<16x1024xf32>
    %cst_5 = arith.constant 2.000000e-01 : f32
    %10 = vector.broadcast %cst_5 : f32 to vector<16x1024xf32>
    %11 = arith.mulf %10, %7 : vector<16x1024xf32>
    %12 = arith.select %9, %7, %11 : vector<16x1024xi1>, vector<16x1024xf32>
    %13 = arith.truncf %12 : vector<16x1024xf32> to vector<16x1024xbf16>
    %c0_6 = arith.constant 0 : index
    %c0_7 = arith.constant 0 : index
    %14 = vector.load %arg4[%c0_6, %c0_7] : memref<1024x128xbf16, #tpu.memory_space<vmem>>, vector<1024x128xbf16>
    %cst_8 = arith.constant dense<0.000000e+00> : vector<16x128xf32>
    %15 = tpu.matmul %13, %14, %cst_8 {dimension_numbers = #tpu.dot_dimension_numbers<[1], [0], [0], [1], [0, 0, 1, 1], [], []>} : vector<16x1024xbf16>, vector<1024x128xbf16>, vector<16x128xf32> -> vector<16x128xf32>
    %c0_9 = arith.constant 0 : index
    %c0_10 = arith.constant 0 : index
    %16 = vector.load %arg5[%c0_9, %c0_10] : memref<1x128xf32, #tpu.memory_space<vmem>>, vector<1x128xf32>
    %17 = vector.broadcast %16 : vector<1x128xf32> to vector<16x128xf32>
    %18 = arith.addf %15, %17 : vector<16x128xf32>
    %c0_11 = arith.constant 0 : index
    %c0_12 = arith.constant 0 : index
    %19 = vector.load %arg6[%c0_11, %c0_12] : memref<16x128xf32, #tpu.memory_space<vmem>>, vector<16x128xf32>
    tpu.vector_store %arg6[%c0_11, %c0_12], %18 {strides = array<i32>} : memref<16x128xf32, #tpu.memory_space<vmem>>, vector<16x128xf32>,
    return
  }
  func.func @transform_0(%arg0: i32) -> (i32, i32) {
    %c0_i32 = arith.constant 0 : i32
    %c0_i32_0 = arith.constant 0 : i32
    return %arg0, %c0_i32 : i32, i32
  }
  func.func @transform_1(%arg0: i32) -> (i32, i32) {
    %c0_i32 = arith.constant 0 : i32
    %c0_i32_0 = arith.constant 0 : i32
    %c0_i32_1 = arith.constant 0 : i32
    return %c0_i32, %c0_i32_0 : i32, i32
  }
  func.func @transform_2(%arg0: i32) -> (i32, i32) {
    %c0_i32 = arith.constant 0 : i32
    %c0_i32_0 = arith.constant 0 : i32
    %c0_i32_1 = arith.constant 0 : i32
    return %c0_i32, %c0_i32_0 : i32, i32
  }
  func.func @transform_3(%arg0: i32) -> (i32, i32) {
    %c0_i32 = arith.constant 0 : i32
    %c0_i32_0 = arith.constant 0 : i32
    %c0_i32_1 = arith.constant 0 : i32
    return %c0_i32, %c0_i32_0 : i32, i32
  }
  func.func @transform_4(%arg0: i32) -> (i32, i32) {
    %c0_i32 = arith.constant 0 : i32
    %c0_i32_0 = arith.constant 0 : i32
    %c0_i32_1 = arith.constant 0 : i32
    return %c0_i32, %c0_i32_0 : i32, i32
  }
  func.func @transform_5(%arg0: i32) -> (i32, i32) {
    %c0_i32 = arith.constant 0 : i32
    %c0_i32_0 = arith.constant 0 : i32
    return %arg0, %c0_i32 : i32, i32
  }
}

</mosaic_0001>

<bundles_post_ra>
// kernel: encoder_forward.3
= control target key start
LH: loop header
LB: loop body
LE: loop exit
PB: predicated region body
PF: predicated region fallthrough
CT: control target
= control target key end

     0   :  { %10 = vsyncpa [#allocation3], 0  ;;  %s1898_s0 = inlined_call_operand.vmem [shape: bf16[32,1024], index: 0, kind: input, shape index: {}]   ;;  %s1899_s1 = inlined_call_operand.vmem [shape: f32[1,1024], index: 1, kind: input, shape index: {}]   ;;  %s1900_s2 = inlined_call_operand.vmem [shape: f32[1,1024], index: 2, kind: input, shape index: {}]   ;;  %s1901_s3 = inlined_call_operand.vmem [shape: bf16[1024,128], index: 3, kind: input, shape index: {}]   ;;  %s1902_s4 = inlined_call_operand.vmem [shape: f32[1,128], index: 4, kind: input, shape index: {}]   ;;  %s1903_s5 = inlined_call_operand.hbm [shape: f32[32,128], index: 5, kind: output, shape index: {}]  }
   0x1   :  { %12 = vsyncpa [#allocation3 + $0x1], 0  ;;  %s1555_s18 = smov 0   ;;  %s1557_s19 = smov 0  }
   0x2   :  { %s1559_s20 = smov 0   ;;  %s1561_s21 = smov 0  }
   0x3 LB: > { %s1576_s22 = sadd.s32 4294967295, %s1520_s21   ;;  %s1187_s23 = sadd.s32 4294967294, %s1520_s21   ;;  %s1520_s21 = sphi %s1561_s21, %s1909_s21   ;;  %s1516_s20 = sphi %s1559_s20, %s1908_s20   ;;  %s1512_s19 = sphi %s1557_s19, %s1907_s19   ;;  %s1508_s18 = sphi %s1555_s18, %s1906_s18  }
   0x4   : > { %s1580_s24 = sadd.s32 1, %s1520_s21   ;;  %s135_s25 = sadd.s32 1, %s1516_s20 }
   0x5   : > { %s132_s26 = ssub.s32 %s1520_s21, %s1580_s24  ;;  %p145_p0 = scmp.ne.s32.totalorder %s1516_s20, %s1512_s19 }
   0x6   : > { %p133_p1 = scmp.eq.s32.totalorder %s132_s26, 0  ;;  %p146_p2 = scmp.eq.s32.totalorder %s1576_s22, 1 }
   0x7   : > { %p151_p3 = scmp.ne.s32.totalorder %s1512_s19, %s1508_s18  ;;  %p152_p4 = scmp.eq.s32.totalorder %s1187_s23, 1 }
   0x8   : > { %s1591_s27 = scalar_select %p133_p1, %s1516_s20, %s135_s25  }
   0x9   : > { %p1593_p5 = por %p146_p2, %p145_p0  ;;  %p1597_p6 = por %p152_p4, %p151_p3 }
   0xa   : > { %p1190_p7 = scmp.ge.s32.totalorder %s1520_s21, 1  ;;  %p192_p8 = scmp.lt.s32.totalorder %s1520_s21, 3 }
   0xc   : > { %p193_p9 = pnand %p1190_p7, %p192_p8 }
   0xd   : > { %s1192_s30 = sshll.u32 (!%p193_p9), %s1576_s22, 1  ;;  %s218_s26 = sand.u32 (!%p193_p9), 1, %s1512_s19  }
   0xe   : > { %196 = sbr.rel (%p193_p9) target bundleno = 304 (0x130), region = 40  ;;  %p222_p10 = scmp.lt.s32.totalorder (!%p193_p9), %s1192_s30, 3 }
   0xf   : > { %s1191_s6 = sshll.u32 (!%p193_p9), %s218_s26, 4  ;;  %s1266_s9 = sshll.u32 (!%p193_p9), %s1576_s22, 8 }
  0x10   : > { %s1856_s11 = scalar_lea.hbm (!%p193_p9), %s1903_s5, %s1266_s9  ;;  %s1858_s12 = scalar_lea.sflag (!%p193_p9), [#allocation3], %s218_s26 }
  0x11   : > { %s1522_s22 = smov (!%p193_p9), [#allocation2]  }
  0x12   : > { %s1464_s14 = sshll.u32 (!%p193_p9), %s1522_s22, 4  ;;  %s1465_s14 = int_to_ptr.vmem [resolvable:$false] %s1464_s14 }
  0x13   : > { %v1396_v0 = vld [vmem:[%s1901_s3 + $0x78] sm:$0xff]   ;;  %v1400_v4 = vld [vmem:[%s1901_s3 + $0x70] sm:$0xff]   ;;  %v1404_v8 = vld [vmem:[%s1901_s3 + $0x68] sm:$0xff]   ;;  %v256_v22 = vlaneseq  ;;  %s1911_s30 = smov (!%p222_p10, %s1192_s30), 3  ;;  %s1466_s15 = scalar_lea.vmem %s1465_s14, 512 }
  0x14   : > { %v1397_v1 = vld [vmem:[%s1901_s3 + $0xf8] sm:$0xff]   ;;  %1267 = vmatprep.subr.bf16.mxu0 %v1396_v0  ;;  %v1401_v5 = vld [vmem:[%s1901_s3 + $0xf0] sm:$0xff]   ;;  %v1405_v9 = vld [vmem:[%s1901_s3 + $0xe8] sm:$0xff]   ;;  %s1265_s13 = sshll.u32 %s1911_s30, 5  ;;  %s220_s30 = scalar_lea.vmem [#allocation2], %s1191_s6 }
  0x15   : > { %v1398_v2 = vld [vmem:[%s1901_s3 + $0x38] sm:$0xff]   ;;  %1289 = vmatprep.subr.bf16.mxu1 %v1397_v1  ;;  %v1402_v6 = vld [vmem:[%s1901_s3 + $0x30] sm:$0xff]   ;;  %v1406_v10 = vld [vmem:[%s1901_s3 + $0x28] sm:$0xff]   ;;  %v1682_v27 = vshrl.u32 %v256_v22, 7  ;;  %s1699_s7 = scalar_lea.vmem %s1898_s0, %s1265_s13  ;;  %s1125_s8 = sshll.u32 %s220_s30, 4  ;;  %s1851_s8 = int_to_ptr.vmem [resolvable:$true] %s1125_s8 }
  0x16   : > { %v1399_v3 = vld [vmem:[%s1901_s3 + $0xb8] sm:$0xff]   ;;  %1268 = vmatpush3.bf16.msra.mxu0 %v1398_v2  ;;  %v1403_v7 = vld [vmem:[%s1901_s3 + $0xb0] sm:$0xff]   ;;  %v1407_v11 = vld [vmem:[%s1901_s3 + $0xa8] sm:$0xff]   ;;  %s1460_s13 = scalar_lea.vmem %s1851_s8, 256  ;;  %p1467_p0 = scmp.lt.s32.totalorder %s1851_s8, %s1465_s14 }
  0x17   : > { %1290 = vmatpush3.bf16.msra.mxu1 %v1399_v3  ;;  %1269 = vmatprep.subr.bf16.mxu0 %v1400_v4  ;;  %v1408_v12 = vld [vmem:[%s1901_s3 + $0x60] sm:$0xff]   ;;  %v1412_v16 = vld [vmem:[%s1901_s3 + $0x58] sm:$0xff]   ;;  %v1416_v20 = vld [vmem:[%s1901_s3 + $0x50] sm:$0xff]   ;;  %v262_v33 = vsub.s32 1, %v1682_v27  ;;  %v270_v35 = vsub.s32 3, %v1682_v27  ;;  %v258_v39 = vsub.s32 0, %v1682_v27  ;;  %p1461_p11 = scmp.ne.s32.totalorder %s1851_s8, %s1460_s13  ;;  %p1468_p1 = scmp.lt.s32.totalorder %s1466_s15, %s1460_s13 }
  0x18   : > { %1291 = vmatprep.subr.bf16.mxu1 %v1401_v5  ;;  %v1409_v13 = vld [vmem:[%s1901_s3 + $0xe0] sm:$0xff]   ;;  %v1413_v17 = vld [vmem:[%s1901_s3 + $0xd8] sm:$0xff]   ;;  %v1417_v21 = vld [vmem:[%s1901_s3 + $0xd0] sm:$0xff]   ;;  %v266_v40 = vsub.s32 2, %v1682_v27 }
  0x19   : > { %v1410_v14 = vld [vmem:[%s1901_s3 + $0x20] sm:$0xff]   ;;  %v1414_v18 = vld [vmem:[%s1901_s3 + $0x18] sm:$0xff]   ;;  %v1418_v23 = vld [vmem:[%s1901_s3 + $0x10] sm:$0xff]   ;;  %p1462_p12 = pnand %p1461_p11, %p1593_p5  ;;  %p1469_p2 = por %p1468_p1, %p1467_p0 }
  0x1a   : > { %1270 = vmatpush3.bf16.msra.mxu0 %v1402_v6  ;;  %v1411_v15 = vld [vmem:[%s1901_s3 + $0xa0] sm:$0xff]   ;;  %v1415_v19 = vld [vmem:[%s1901_s3 + $0x98] sm:$0xff]   ;;  %v1419_v24 = vld [vmem:[%s1901_s3 + $0x90] sm:$0xff]  }
  0x1b   : > { %1292 = vmatpush3.bf16.msra.mxu1 %v1403_v7  ;;  %1271 = vmatprep.subr.bf16.mxu0 %v1404_v8  ;;  %v1420_v25 = vld [vmem:[%s1901_s3 + $0x48] sm:$0xff]   ;;  %v1424_v30 = vld [vmem:[%s1901_s3 + $0x40] sm:$0xff]   ;;  %v1428_v52 = vld [vmem:[%s1901_s3 + $0x178] sm:$0xff]   ;;  %p1463_p13 = pneg %p1462_p12 }
  0x1c   : > { %1293 = vmatprep.subr.bf16.mxu1 %v1405_v9  ;;  %v1421_v26 = vld [vmem:[%s1901_s3 + $0xc8] sm:$0xff]   ;;  %v1425_v31 = vld [vmem:[%s1901_s3 + $0xc0] sm:$0xff]   ;;  %v1429_v57 = vld [vmem:[%s1901_s3 + $0x1f8] sm:$0xff]  }
  0x1d   : > { %v1422_v28 = vld [vmem:[%s1901_s3 + $0x8] sm:$0xff]   ;;  %v1426_v32 = vld [vmem:[%s1901_s3] sm:$0xff]   ;;  %p1470_p3 = pnand %p1469_p2, %p1463_p13 }
  0x1e   : > { %1272 = vmatpush3.bf16.msra.mxu0 %v1406_v10  ;;  %v1423_v29 = vld [vmem:[%s1901_s3 + $0x88] sm:$0xff]   ;;  %v1427_v34 = vld [vmem:[%s1901_s3 + $0x80] sm:$0xff]  }
  0x1f   : > { %1294 = vmatpush3.bf16.msra.mxu1 %v1407_v11  ;;  %1273 = vmatprep.subr.bf16.mxu0 %v1408_v12  ;;  %v230_v36 = vld [vmem:[%s1699_s7] sm:$0xff]  ;;  %v231_v46 = vld [vmem:[%s1699_s7 + $0x8] sm:$0xff] }
  0x20   : > { %1295 = vmatprep.subr.bf16.mxu1 %v1409_v13  ;;  %v234_v37 = vld [vmem:[%s1699_s7 + $0x20] sm:$0xff]  ;;  %v238_v41 = vunpack.c.l.bf16 %v230_v36  ;;  %v239_v42 = vunpack.c.h.bf16 %v230_v36  ;;  %v235_v47 = vld [vmem:[%s1699_s7 + $0x28] sm:$0xff]  ;;  %v240_v50 = vunpack.c.l.bf16 %v231_v46  ;;  %v241_v51 = vunpack.c.h.bf16 %v231_v46 }
  0x21   : > { %v1714_v38 = vld [vmem:[%s1899_s1] sm:$0xff]  ;;  %v246_v43 = vunpack.c.l.bf16 %v234_v37  ;;  %v247_v44 = vunpack.c.h.bf16 %v234_v37  ;;  %v248_v53 = vunpack.c.l.bf16 %v235_v47  ;;  %v249_v54 = vunpack.c.h.bf16 %v235_v47  ;;  %v1433_v37 = vld [vmem:[%s1901_s3 + $0x1f0] sm:$0xff]   ;;  %v1439_v46 = vld [vmem:[%s1901_s3 + $0x1a8] sm:$0xff]  }
  0x22   : > { %1274 = vmatpush3.bf16.msra.mxu0 %v1410_v14  ;;  %v1721_v45 = vld [vmem:[%s1900_s2] sm:$0xff]  ;;  %v263_v48 = vrot.slane %v1714_v38, %v262_v33  ;;  %v271_v55 = vrot.slane %v1714_v38, %v270_v35  ;;  %v259_v60 = vrot.slane %v1714_v38, %v258_v39  ;;  %v267_v0 = vrot.slane %v1714_v38, %v266_v40 }
  0x23   : > { %1296 = vmatpush3.bf16.msra.mxu1 %v1411_v15  ;;  %1275 = vmatprep.subr.bf16.mxu0 %v1412_v16  ;;  %v321_v49 = vrot.slane %v1721_v45, %v262_v33  ;;  %v329_v56 = vrot.slane %v1721_v45, %v270_v35  ;;  %v317_v61 = vrot.slane %v1721_v45, %v258_v39  ;;  %v1431_v33 = vld [vmem:[%s1901_s3 + $0x1b8] sm:$0xff]   ;;  %v1432_v35 = vld [vmem:[%s1901_s3 + $0x170] sm:$0xff]   ;;  %v1440_v47 = vld [vmem:[%s1901_s3 + $0x160] sm:$0xff]  }
  0x24   : > { %1297 = vmatprep.subr.bf16.mxu1 %v1413_v17  ;;  %v297_v58 = vmul.f32 %v263_v48, %v239_v42  ;;  %v305_v59 = vmul.f32 %v263_v48, %v247_v44  ;;  %v299_v62 = vmul.f32 %v271_v55, %v241_v51  ;;  %v307_v63 = vmul.f32 %v271_v55, %v249_v54  ;;  %v1436_v42 = vld [vmem:[%s1901_s3 + $0x168] sm:$0xff]   ;;  %v1441_v48 = vld [vmem:[%s1901_s3 + $0x1e0] sm:$0xff]   ;;  %v1444_v51 = vld [vmem:[%s1901_s3 + $0x158] sm:$0xff]  }
  0x25   : > { %v325_v1 = vrot.slane %v1721_v45, %v266_v40  ;;  %v296_v4 = vmul.f32 %v259_v60, %v238_v41  ;;  %v304_v5 = vmul.f32 %v259_v60, %v246_v43  ;;  %v298_v8 = vmul.f32 %v267_v0, %v240_v50  ;;  %v1434_v40 = vld [vmem:[%s1901_s3 + $0x130] sm:$0xff]   ;;  %v1437_v43 = vld [vmem:[%s1901_s3 + $0x1e8] sm:$0xff]   ;;  %v1443_v50 = vld [vmem:[%s1901_s3 + $0x1a0] sm:$0xff]  }
  0x26   : > { %1276 = vmatpush3.bf16.msra.mxu0 %v1414_v18  ;;  %v355_v2 = vadd.f32 %v321_v49, %v297_v58  ;;  %v363_v3 = vadd.f32 %v321_v49, %v305_v59  ;;  %v357_v6 = vadd.f32 %v329_v56, %v299_v62  ;;  %v365_v7 = vadd.f32 %v329_v56, %v307_v63  ;;  %v1435_v41 = vld [vmem:[%s1901_s3 + $0x1b0] sm:$0xff]   ;;  %v1438_v44 = vld [vmem:[%s1901_s3 + $0x128] sm:$0xff]   ;;  %v1442_v49 = vld [vmem:[%s1901_s3 + $0x120] sm:$0xff]  }
  0x27   : > { %1298 = vmatpush3.bf16.msra.mxu1 %v1415_v19  ;;  %1277 = vmatprep.subr.bf16.mxu0 %v1416_v20  ;;  %v306_v9 = vmul.f32 %v267_v0, %v248_v53  ;;  %v354_v16 = vadd.f32 %v317_v61, %v296_v4  ;;  %v362_v17 = vadd.f32 %v317_v61, %v304_v5  ;;  %v1446_v53 = vld [vmem:[%s1901_s3 + $0x118] sm:$0xff]   ;;  %v278_v54 = vsub.s32 5, %v1682_v27  ;;  %v1449_v59 = vld [vmem:[%s1901_s3 + $0x1d0] sm:$0xff]   ;;  %v1452_v63 = vld [vmem:[%s1901_s3 + $0x148] sm:$0xff]  }
  0x28   : > { %1299 = vmatprep.subr.bf16.mxu1 %v1417_v21  ;;  %vm371_vm0 = vcmp.gt.f32.partialorder %v355_v2, 0.0  ;;  %vm379_vm1 = vcmp.gt.f32.partialorder %v363_v3, 0.0  ;;  %v387_v10 = vmul.f32 0.2, %v355_v2  ;;  %v395_v11 = vmul.f32 0.2, %v363_v3 }
  0x29   : > { %vm373_vm2 = vcmp.gt.f32.partialorder %v357_v6, 0.0  ;;  %vm381_vm3 = vcmp.gt.f32.partialorder %v365_v7, 0.0  ;;  %v389_v12 = vmul.f32 0.2, %v357_v6  ;;  %v397_v13 = vmul.f32 0.2, %v365_v7 }
  0x2a   : > { %1278 = vmatpush3.bf16.msra.mxu0 %v1418_v23  ;;  %v403_v14 = vsel %vm371_vm0, %v355_v2, %v387_v10  ;;  %v411_v15 = vsel %vm379_vm1, %v363_v3, %v395_v11  ;;  %v356_v21 = vadd.f32 %v325_v1, %v298_v8  ;;  %vm370_vm4 = vcmp.gt.f32.partialorder %v354_v16, 0.0  ;;  %v1447_v55 = vld [vmem:[%s1901_s3 + $0x198] sm:$0xff]   ;;  %v1450_v61 = vld [vmem:[%s1901_s3 + $0x110] sm:$0xff]  }
  0x2b   : > { %1300 = vmatpush3.bf16.msra.mxu1 %v1419_v24  ;;  %1279 = vmatprep.subr.bf16.mxu0 %v1420_v25  ;;  %v419_v18 = vpack.c.bf16 %v411_v15, %v403_v14  ;;  %v405_v19 = vsel %vm373_vm2, %v357_v6, %v389_v12  ;;  %v413_v20 = vsel %vm381_vm3, %v365_v7, %v397_v13  ;;  %vm378_vm5 = vcmp.gt.f32.partialorder %v362_v17, 0.0  ;;  %v1451_v62 = vld [vmem:[%s1901_s3 + $0x190] sm:$0xff]   ;;  %v233_v10 = vld [vmem:[%s1699_s7 + $0x18] sm:$0xff]  ;;  %v1454_v14 = vld [vmem:[%s1901_s3 + $0x108] sm:$0xff]  }
  0x2c   : > { %1301 = vmatprep.subr.bf16.mxu1 %v1421_v26  ;;  %v421_v22 = vpack.c.bf16 %v413_v20, %v405_v19  ;;  %v386_v23 = vmul.f32 0.2, %v354_v16  ;;  %v394_v24 = vmul.f32 0.2, %v362_v17  ;;  %v364_v25 = vadd.f32 %v325_v1, %v306_v9  ;;  %v1453_v1 = vld [vmem:[%s1901_s3 + $0x1c8] sm:$0xff]   ;;  %v232_v2 = vld [vmem:[%s1699_s7 + $0x10] sm:$0xff] }
  0x2d   : > { %977 = vmatprep.mubr.bf16.mxu0 %v419_v18  ;;  %vm372_vm6 = vcmp.gt.f32.partialorder %v356_v21, 0.0  ;;  %v388_v26 = vmul.f32 0.2, %v356_v21  ;;  %v286_v56 = vsub.s32 7, %v1682_v27  ;;  %v274_v58 = vsub.s32 4, %v1682_v27  ;;  %v236_v7 = vld [vmem:[%s1699_s7 + $0x30] sm:$0xff] }
  0x2e   : > { %1280 = vmatpush3.bf16.msra.mxu0 %v1422_v28  ;;  %v1430_v28 = vld [vmem:[%s1901_s3 + $0x138] sm:$0xff]   ;;  %1018 = vmatprep.mubr.bf16.mxu1 %v421_v22  ;;  %vm380_vm7 = vcmp.gt.f32.partialorder %v364_v25, 0.0  ;;  %v282_v60 = vsub.s32 6, %v1682_v27  ;;  %v279_v27 = vrot.slane %v1714_v38, %v278_v54  ;;  %v337_v3 = vrot.slane %v1721_v45, %v278_v54 }
  0x2f   : > { %1302 = vmatpush3.bf16.msra.mxu1 %v1423_v29  ;;  %1281 = vmatprep.subr.bf16.mxu0 %v1424_v30  ;;  %v402_v29 = vsel %vm370_vm4, %v354_v16, %v386_v23  ;;  %v410_v30 = vsel %vm378_vm5, %v362_v17, %v394_v24  ;;  %v275_v0 = vrot.slane %v1714_v38, %v274_v58  ;;  %v242_v8 = vunpack.c.l.bf16 %v232_v2  ;;  %v237_v11 = vld [vmem:[%s1699_s7 + $0x38] sm:$0xff] }
  0x30   : > { %1303 = vmatprep.subr.bf16.mxu1 %v1425_v31  ;;  %v396_v31 = vmul.f32 0.2, %v364_v25  ;;  %v287_v4 = vrot.slane %v1714_v38, %v286_v56  ;;  %v345_v5 = vrot.slane %v1721_v45, %v286_v56  ;;  %v283_v6 = vrot.slane %v1714_v38, %v282_v60  ;;  %v1456_v38 = vld [vmem:[%s1901_s3 + $0x140] sm:$0xff]  }
  0x31   : > { %v243_v9 = vunpack.c.h.bf16 %v232_v2  ;;  %v333_v12 = vrot.slane %v1721_v45, %v274_v58  ;;  %v341_v13 = vrot.slane %v1721_v45, %v282_v60  ;;  %v250_v15 = vunpack.c.l.bf16 %v236_v7  ;;  %v1455_v45 = vld [vmem:[%s1901_s3 + $0x188] sm:$0xff]  }
  0x32   : > { %1282 = vmatpush3.bf16.msra.mxu0 %v1426_v32  ;;  %v404_v32 = vsel %vm372_vm6, %v356_v21, %v388_v26  ;;  %v412_v36 = vsel %vm380_vm7, %v364_v25, %v396_v31  ;;  %v251_v16 = vunpack.c.h.bf16 %v236_v7  ;;  %v244_v17 = vunpack.c.l.bf16 %v233_v10 }
  0x33   : > { %1304 = vmatpush3.bf16.msra.mxu1 %v1427_v34  ;;  %1311 = vmatprep.subr.bf16.mxu0 %v1428_v52  ;;  %v418_v34 = vpack.c.bf16 %v410_v30, %v402_v29  ;;  %v420_v39 = vpack.c.bf16 %v412_v36, %v404_v32  ;;  %v1445_v52 = vld [vmem:[%s1901_s3 + $0x1d8] sm:$0xff]   ;;  %v245_v18 = vunpack.c.h.bf16 %v233_v10  ;;  %v301_v19 = vmul.f32 %v279_v27, %v243_v9 }
  0x34   : > { %1333 = vmatprep.subr.bf16.mxu1 %v1429_v57  ;;  %v1448_v57 = vld [vmem:[%s1901_s3 + $0x150] sm:$0xff]   ;;  %v252_v20 = vunpack.c.l.bf16 %v237_v11  ;;  %v253_v21 = vunpack.c.h.bf16 %v237_v11  ;;  %v300_v22 = vmul.f32 %v275_v0, %v242_v8  ;;  %v309_v23 = vmul.f32 %v279_v27, %v251_v16 }
  0x35   : > { %978 = vmatmul.mubr.bf16.vlgmr.msra.gmra.mxu0 %v418_v34  ;;  %v303_v24 = vmul.f32 %v287_v4, %v245_v18  ;;  %v308_v25 = vmul.f32 %v275_v0, %v250_v15  ;;  %v302_v26 = vmul.f32 %v283_v6, %v244_v17  ;;  %v359_v29 = vadd.f32 %v337_v3, %v301_v19 }
  0x36   : > { %1312 = vmatpush3.bf16.msra.mxu0 %v1430_v28  ;;  %1019 = vmatmul.mubr.bf16.vlgmr.msra.gmra.mxu1 %v420_v39  ;;  %v1457_v28 = vld [vmem:[%s1901_s3 + $0x1c0] sm:$0xff]   ;;  %v311_v30 = vmul.f32 %v287_v4, %v253_v21  ;;  %v358_v31 = vadd.f32 %v333_v12, %v300_v22  ;;  %v310_v32 = vmul.f32 %v283_v6, %v252_v20 }
  0x37   : > { %1313 = vmatprep.subr.bf16.mxu0 %v1432_v35  ;;  %1334 = vmatpush3.bf16.msra.mxu1 %v1431_v33  ;;  %v1458_v33 = vld [vmem:[%s1901_s3 + $0x100] sm:$0xff]   ;;  %v367_v34 = vadd.f32 %v337_v3, %v309_v23  ;;  %v361_v35 = vadd.f32 %v345_v5, %v303_v24  ;;  %v366_v36 = vadd.f32 %v333_v12, %v308_v25  ;;  %vm375_vm8 = vcmp.gt.f32.partialorder %v359_v29, 0.0 }
  0x38   : > { %1335 = vmatprep.subr.bf16.mxu1 %v1433_v37  ;;  %v360_v37 = vadd.f32 %v341_v13, %v302_v26  ;;  %v1459_v39 = vld [vmem:[%s1901_s3 + $0x180] sm:$0xff]   ;;  %vm374_vm9 = vcmp.gt.f32.partialorder %v358_v31, 0.0 }
  0x39   : > { %vm383_vm10 = vcmp.gt.f32.partialorder %v367_v34, 0.0  ;;  %vm377_vm11 = vcmp.gt.f32.partialorder %v361_v35, 0.0  ;;  %vm382_vm13 = vcmp.gt.f32.partialorder %v366_v36, 0.0  ;;  %v1195_v4 = vld [vmem:[%s1902_s4] ss:$0 sm:$0xff] }
  0x3a   : > { %1314 = vmatpush3.bf16.msra.mxu0 %v1434_v40  ;;  %v391_v40 = vmul.f32 0.2, %v359_v29  ;;  %vm376_vm14 = vcmp.gt.f32.partialorder %v360_v37, 0.0 }
  0x3b   : > { %1315 = vmatprep.subr.bf16.mxu0 %v1436_v42  ;;  %1336 = vmatpush3.bf16.msra.mxu1 %v1435_v41  ;;  %v369_v41 = vadd.f32 %v345_v5, %v311_v30  ;;  %v399_v42 = vmul.f32 0.2, %v367_v34 }
  0x3c   : > { %1337 = vmatprep.subr.bf16.mxu1 %v1437_v43  ;;  %v393_v43 = vmul.f32 0.2, %v361_v35 }
  0x3d   : > { %vm385_vm12 = vcmp.gt.f32.partialorder %v369_v41, 0.0 }
  0x3e   : > { %1316 = vmatpush3.bf16.msra.mxu0 %v1438_v44  ;;  %v407_v44 = vsel %vm375_vm8, %v359_v29, %v391_v40 }
  0x3f   : > { %1317 = vmatprep.subr.bf16.mxu0 %v1440_v47  ;;  %1338 = vmatpush3.bf16.msra.mxu1 %v1439_v46  ;;  %v401_v46 = vmul.f32 0.2, %v369_v41  ;;  %v415_v47 = vsel %vm383_vm10, %v367_v34, %v399_v42 }
  0x40   : > { %1339 = vmatprep.subr.bf16.mxu1 %v1441_v48  ;;  %v409_v48 = vsel %vm377_vm11, %v361_v35, %v393_v43 }
  0x42   : > { %1318 = vmatpush3.bf16.msra.mxu0 %v1442_v49  ;;  %v390_v49 = vmul.f32 0.2, %v358_v31 }
  0x43   : > { %1319 = vmatprep.subr.bf16.mxu0 %v1444_v51  ;;  %1340 = vmatpush3.bf16.msra.mxu1 %v1443_v50  ;;  %v398_v50 = vmul.f32 0.2, %v366_v36  ;;  %v423_v51 = vpack.c.bf16 %v415_v47, %v407_v44 }
  0x44   : > { %1341 = vmatprep.subr.bf16.mxu1 %v1445_v52  ;;  %v417_v52 = vsel %vm385_vm12, %v369_v41, %v401_v46 }
  0x45   : > { %v425_v54 = vpack.c.bf16 %v417_v52, %v409_v48  ;;  %v414_v56 = vsel %vm382_vm13, %v366_v36, %v398_v50  ;;  %1059 = vmatprep.mubr.bf16.mxu0 %v423_v51 }
  0x46   : > { %1320 = vmatpush3.bf16.msra.mxu0 %v1446_v53  ;;  %v368_v53 = vadd.f32 %v341_v13, %v310_v32 }
  0x47   : > { %1321 = vmatprep.subr.bf16.mxu0 %v1448_v57  ;;  %1342 = vmatpush3.bf16.msra.mxu1 %v1447_v55  ;;  %v406_v55 = vsel %vm374_vm9, %v358_v31, %v390_v49  ;;  %v392_v57 = vmul.f32 0.2, %v360_v37 }
  0x48   : > { %1343 = vmatprep.subr.bf16.mxu1 %v1449_v59  ;;  %v422_v58 = vpack.c.bf16 %v414_v56, %v406_v55  ;;  %vm384_vm15 = vcmp.gt.f32.partialorder %v368_v53, 0.0  ;;  %v400_v59 = vmul.f32 0.2, %v368_v53  ;;  %1100 = vmatprep.mubr.bf16.mxu1 %v425_v54 }
  0x49   : > { %v408_v60 = vsel %vm376_vm14, %v360_v37, %v392_v57 }
  0x4a   : > { %1322 = vmatpush3.bf16.msra.mxu0 %v1450_v61  ;;  %v416_v61 = vsel %vm384_vm15, %v368_v53, %v400_v59 }
  0x4b   : > { %1323 = vmatprep.subr.bf16.mxu0 %v1452_v63  ;;  %1344 = vmatpush3.bf16.msra.mxu1 %v1451_v62  ;;  %v424_v62 = vpack.c.bf16 %v416_v61, %v408_v60 }
  0x4c   : > { %1345 = vmatprep.subr.bf16.mxu1 %v1453_v1 }
  0x4e   : > { %1324 = vmatpush3.bf16.msra.mxu0 %v1454_v14 }
  0x4f   : > { %1325 = vmatprep.subr.bf16.mxu0 %v1456_v38  ;;  %1346 = vmatpush3.bf16.msra.mxu1 %v1455_v45 }
  0x50   : > { %1347 = vmatprep.subr.bf16.mxu1 %v1457_v28 }
  0x52   : > { %1326 = vmatpush3.bf16.msra.mxu0 %v1458_v33 }
  0x53   : > { %1348 = vmatpush3.bf16.msra.mxu1 %v1459_v39 }
  0x55   : > { %1060 = vmatmul.mubr.bf16.vlgmr.msra.gmra.mxu0 %v422_v58 }
  0x56   : > { %1101 = vmatmul.mubr.bf16.vlgmr.msra.gmra.mxu1 %v424_v62 }
  0xf5   : > { %v1283_v63 = vpop.f32.mrf.mxu0 }
  0xf6   : > { %v1305_v0 = vpop.f32.mrf.mxu1 }
  0xf7   : > { %v1284_v27 = vpop.f32.mrf.mxu0 }
  0xf8   : > { %v1306_v2 = vpop.f32.mrf.mxu1  ;;  %v1285_v3 = vadd.f32 %v1284_v27, %v1283_v63 }
  0xf9   : > { %v1286_v1 = vpop.f32.mrf.mxu0  ;;  %v1307_v8 = vadd.f32 %v1306_v2, %v1305_v0 }
  0xfa   : > { %v1308_v6 = vpop.f32.mrf.mxu1  ;;  %v980_v7 = vadd.f32 %v1285_v3, %v1195_v4 }
  0xfb   : > { %v1287_v5 = vpop.f32.mrf.mxu0 }
  0xfc   : > { %v1288_v9 = vadd.f32 %v1287_v5, %v1286_v1  ;;  %v1309_v11 = vpop.f32.mrf.mxu1  ;;  %v1021_v13 = vadd.f32 %v1307_v8, %v980_v7 }
  0xfd   : > { %v1310_v18 = vadd.f32 %v1309_v11, %v1308_v6 }
  0xfe   : > { %v983_v14 = vadd.f32 %v1288_v9, %v1195_v4 }
 0x100   : > { %v1024_v22 = vadd.f32 %v1310_v18, %v983_v14 }
 0x115   : > { %v1327_v10 = vpop.f32.mrf.mxu0 }
 0x116   : > { %v1349_v15 = vpop.f32.mrf.mxu1 }
 0x117   : > { %v1328_v12 = vpop.f32.mrf.mxu0 }
 0x118   : > { %v1329_v16 = vadd.f32 %v1328_v12, %v1327_v10  ;;  %v1350_v19 = vpop.f32.mrf.mxu1 }
 0x119   : > { %v1330_v17 = vpop.f32.mrf.mxu0  ;;  %v1351_v20 = vadd.f32 %v1350_v19, %v1349_v15 }
 0x11a   : > { %v1062_v38 = vadd.f32 %v1329_v16, %v1021_v13  ;;  %v1352_v45 = vpop.f32.mrf.mxu1 }
 0x11b   : > { %v1331_v21 = vpop.f32.mrf.mxu0 }
 0x11c   : > { %v1332_v23 = vadd.f32 %v1331_v21, %v1330_v17  ;;  %v1103_v24 = vadd.f32 %v1351_v20, %v1062_v38  ;;  %v1353_v26 = vpop.f32.mrf.mxu1 }
 0x11d   : > { %v1354_v28 = vadd.f32 %v1353_v26, %v1352_v45 }
 0x11e   : > { %v1065_v25 = vadd.f32 %v1332_v23, %v1024_v22  ;;  %1109 = vst [vmem:[%s220_s30] sm:$0xff] %v1103_v24 }
 0x120   : > { %v1106_v29 = vadd.f32 %v1354_v28, %v1065_v25 }
 0x122   : > { %1110 = vst [vmem:[%s220_s30 + $0x8] sm:$0xff] %v1106_v29 }
 0x123   : > { %1473 = shalt.err (!%p1470_p3)
}
 0x124   : > { %s1474_s16 = scalar_lea.hbm %s1856_s11, 256  ;;  %s1478_s25 = scalar_lea.hbm %s1903_s5, 512 }
 0x125   : > { %p1475_p4 = scmp.ne.s32.totalorder %s1856_s11, %s1474_s16  ;;  %p1479_p9 = scmp.lt.s32.totalorder %s1856_s11, %s1903_s5 }
 0x126   : > { %p1480_p10 = scmp.lt.s32.totalorder %s1478_s25, %s1474_s16 }
 0x127   : > { %p1476_p7 = pnand %p1475_p4, %p1593_p5 }
 0x128   : > { %p1481_p11 = por %p1480_p10, %p1479_p9 }
 0x129   : > { %p1477_p8 = pneg %p1476_p7 }
 0x12b   : > { %p1482_p12 = pnand %p1481_p11, %p1477_p8 }
 0x12d   : > { %1485 = shalt.err (!%p1482_p12)
}
 0x12e   : > { %s1523_s30 = smov 128   ;;  %s1524_s9 = smov 8  }
 0x12f   : > { %1355 = dma.vmem_to_hbm [thread:$0]  (%p1593_p5), %s1851_s8, 256, %s1856_s11, %s1858_s12, %s1523_s30, %s1523_s30, %s1524_s9  }
 0x130 PF: > { %p1361_p13 = scmp.ge.s32.totalorder %s1520_s21, 2  ;;  %s1140_s10 = sand.u32 1, %s1508_s18  }
 0x131   : > { %s1141_s7 = scalar_lea.sflag [#allocation3], %s1140_s10 }
 0x132   : > { %p1358_p0 = pnand %p1361_p13, %p1597_p6 }
 0x134   : > { %p1359_p1 = pneg %p1358_p0 }
 0x136   : > { %1503 = dma.done.wait (%p1359_p1), %s1141_s7, 256  }
 0x137   : > { %1505 = vsyncadd (%p1359_p1), %s1141_s7, 4294967040  ;;  %p15_p2 = scmp.ge.s32.totalorder %s1580_s24, 4   ;;  %s1906_s18 = smov %s1512_s19 }
 0x138   : > { %s1907_s19 = smov %s1516_s20  ;;  %s1908_s20 = smov %s1591_s27 }
 0x139   : > { %s1909_s21 = smov %s1580_s24  ;;  %17 = sbr.rel (!%p15_p2) target bundleno = 3 (0x3), region = 75 }
 0x13e   :  { %1146 = vsyncpa [#allocation3], 1 }
 0x13f   :  { %1148 = vsyncpa [#allocation3 + $0x1], 1 }

// kernel: encoder_forward.2
= control target key start
LH: loop header
LB: loop body
LE: loop exit
PB: predicated region body
PF: predicated region fallthrough
CT: control target
= control target key end

     0   :  { %12 = vsyncpa [#allocation3], 0  ;;  %s9661_s0 = inlined_call_operand.vmem [shape: bf16[32,896], index: 0, kind: input, shape index: {}]   ;;  %s9662_s1 = inlined_call_operand.hbm [shape: bf16[896,1024], index: 1, kind: input, shape index: {}]   ;;  %s9663_s2 = inlined_call_operand.hbm [shape: f32[1,1024], index: 2, kind: input, shape index: {}]   ;;  %s9664_s3 = inlined_call_operand.hbm [shape: bf16[1024,1024], index: 3, kind: input, shape index: {}]   ;;  %s9665_s4 = inlined_call_operand.vmem [shape: bf16[32,1024], index: 4, kind: output, shape index: {0}]   ;;  %s9666_s5 = inlined_call_operand.vmem [shape: f32[2,1,1024], index: 5, kind: output, shape index: {1}]   ;;  %s9667_s6 = inlined_call_operand.vmem [shape: f32[2,1,1024], index: 6, kind: output, shape index: {2}]  }
   0x1   :  { %13 = vsyncpa [#allocation5], 0  ;;  %s9258_s21 = smov 0  }
   0x2 LB: > { %s9216_s22 = smov [#allocation4]   ;;  %s9264_s24 = sadd.s32 4294967295, %s9214_s21   ;;  %s9214_s21 = sphi %s9258_s21, %s19_s21  }
   0x3   : > { %s217_s23 = sshll.u32 %s9216_s22, 4  ;;  %p8057_p0 = scmp.ge.s32.totalorder %s9214_s21, 1  ;;  %s218_s23 = int_to_ptr.vmem [resolvable:$true] %s217_s23 }
   0x4   : > { %p191_p1 = scmp.lt.s32.totalorder %s9214_s21, 3  ;;  %p9668_p2 = scmp.eq.s32.totalorder %s9264_s24, 0 }
   0x5   : > { %s9217_s26 = smov [#allocation2]   ;;  %s9218_s29 = smov [#allocation6]  }
   0x6   : > { %p9269_p3 = pnand %p8057_p0, %p191_p1  ;;  %s203_s27 = sshll.u32 %s9217_s26, 4  ;;  %s204_s27 = int_to_ptr.vmem [resolvable:$true] %s203_s27 }
   0x7   : > { %s227_s30 = sshll.u32 %s9218_s29, 4  ;;  %s9133_s7 = scalar_lea.vmem %s218_s23, 128  ;;  %s9281_s30 = int_to_ptr.vmem [resolvable:$true] %s227_s30 }
   0x8   : > { %s9670_s25 = scalar_select %p9269_p3, 1, 0 }
   0x9   : > { %p9072_p4 = pneg %p9269_p3  ;;  %p9134_p7 = scmp.ne.s32.totalorder %s218_s23, %s9133_s7 }
   0xa   : > { %p9141_p10 = scmp.lt.s32.totalorder %s218_s23, %s218_s23  ;;  %p9142_p11 = scmp.lt.s32.totalorder %s9133_s7, %s9133_s7 }
   0xb   : > { %p9277_p5 = pnand %p9668_p2, %p9072_p4 }
   0xc   : > { %p9143_p12 = por %p9142_p11, %p9141_p10 }
   0xd   : > { %p9124_p6 = pneg %p9277_p5 }
   0xf   : > { %p9136_p8 = pnand %p9134_p7, %p9124_p6 }
  0x11   : > { %p9137_p9 = pneg %p9136_p8 }
  0x13   : > { %p9144_p13 = pnand %p9143_p12, %p9137_p9 }
  0x15   : > { %9147 = shalt.err (!%p9144_p13)
}
  0x16   : > { %9078 = dma.hbm_to_vmem [thread:$0]  (!%p9277_p5), %s9663_s2, 128, %s218_s23, [#allocation5]  }
  0x17   : > { %s9159_s10 = scalar_lea.vmem %s204_s27, 57344  ;;  %p9167_p7 = scmp.lt.s32.totalorder %s204_s27, %s204_s27 }
  0x18   : > { %p9160_p0 = scmp.ne.s32.totalorder %s204_s27, %s9159_s10  ;;  %p9168_p8 = scmp.lt.s32.totalorder %s9159_s10, %s9159_s10 }
  0x1a   : > { %p9162_p1 = pnand %p9160_p0, %p9124_p6  ;;  %p9169_p2 = por %p9168_p8, %p9167_p7 }
  0x1c   : > { %p9163_p4 = pneg %p9162_p1 }
  0x1e   : > { %p9170_p3 = pnand %p9169_p2, %p9163_p4 }
  0x20   : > { %9173 = shalt.err (!%p9170_p3)
}
  0x21   : > { %s9219_s11 = smov 512   ;;  %s9220_s12 = smov 32  }
  0x22   : > { %9075 = dma.hbm_to_vmem [thread:$0]  (!%p9277_p5), %s9662_s1, 57344, %s204_s27, [#allocation3], %s9219_s11, %s9219_s11, %s9220_s12  }
  0x23   : > { %s9185_s15 = scalar_lea.vmem %s9281_s30, 65536  ;;  %p9193_p2 = scmp.lt.s32.totalorder %s9281_s30, %s9281_s30 }
  0x24   : > { %p9186_p9 = scmp.ne.s32.totalorder %s9281_s30, %s9185_s15  ;;  %p9194_p3 = scmp.lt.s32.totalorder %s9185_s15, %s9185_s15 }
  0x26   : > { %p9188_p10 = pnand %p9186_p9, %p9124_p6  ;;  %p9195_p12 = por %p9194_p3, %p9193_p2 }
  0x28   : > { %p9189_p11 = pneg %p9188_p10 }
  0x2a   : > { %p9196_p13 = pnand %p9195_p12, %p9189_p11 }
  0x2c   : > { %9199 = shalt.err (!%p9196_p13)
}
  0x2d   : > { %9081 = dma.hbm_to_vmem [thread:$0]  (!%p9277_p5), %s9664_s3, 65536, %s9281_s30, [#allocation5], %s9219_s11, %s9219_s11, %s9220_s12  }
  0x2e   : > { %p9672_p0 = scmp.ne.s32.totalorder %s9670_s25, 0 }
  0x2f   : > { %p9673_p1 = scmp.eq.s32.totalorder (!%p9672_p0), %s9264_s24, 0 }
  0x30   : > { %253 = sbr.rel (%p9672_p0) target bundleno = 1336 (0x538), region = 36 }
  0x35   : > { %9205 = dma.done.wait (%p9673_p1), [#allocation3], 57344   ;;  %p9674_p6 = pmov %p9673_p1 }
  0x36   : > { %p9675_p4 = pmov %p9673_p1 }
  0x37   : > { %9207 = vsyncadd (%p9674_p6), [#allocation3], 4294909952 }
  0x38   : > { %9209 = dma.done.wait (%p9675_p4), [#allocation5], 65664   ;;  %p9676_p7 = pmov %p9673_p1 }
  0x39   : > { %v388_v0 = vld [vmem:[#allocation2 + $0x1c0] sm:$0xff]  ;;  %s8066_s18 = sshll.u32 %s9264_s24, 1  ;;  %p315_p8 = scmp.lt.s32.totalorder %s9264_s24, 1 }
  0x3a   : > { %9211 = vsyncadd (%p9676_p7), [#allocation5], 4294901632  ;;  %v392_v1 = vld [vmem:[#allocation2 + $0x1e0] sm:$0xff]  ;;  %p302_p5 = scmp.lt.s32.totalorder %s8066_s18, 3 }
  0x3b   : > { %v516_v2 = vld [vmem:[#allocation2 + $0x5c0] sm:$0xff]  ;;  %v8137_v3 = vcombine.high %v388_v0, %v392_v1  ;;  %v8136_v5 = vcombine.low %v388_v0, %v392_v1  ;;  %s9680_s24 = smov (!%p315_p8, %s9264_s24), 1 }
  0x3c   : > { %v520_v4 = vld [vmem:[#allocation2 + $0x5e0] sm:$0xff]  ;;  %s9678_s18 = smov (!%p302_p5, %s8066_s18), 3  ;;  %s8071_s29 = sshll.u32 %s9680_s24, 3 }
  0x3d   : > { %v380_v6 = vld [vmem:[#allocation2 + $0x180] sm:$0xff]  ;;  %v8265_v8 = vcombine.high %v516_v2, %v520_v4  ;;  %v8264_v9 = vcombine.low %v516_v2, %v520_v4  ;;  %3098 = vmatprep.subr.bf16.mxu0 %v8137_v3  ;;  %s9059_s19 = smul.u32 28, %s9678_s18  ;;  %s9050_s25 = sshll.u32 %s9678_s18, 5 }
  0x3e   : > { %v384_v7 = vld [vmem:[#allocation2 + $0x1a0] sm:$0xff]  ;;  %3099 = vmatpush1.bf16.msra.mxu0 %v8136_v5  ;;  %s9563_s28 = scalar_lea.vmem %s9665_s4, %s9050_s25  ;;  %s318_s8 = scalar_lea.vmem %s9666_s5, %s8071_s29 }
  0x3f   : > { %v8129_v10 = vcombine.high %v380_v6, %v384_v7  ;;  %v508_v11 = vld [vmem:[#allocation2 + $0x580] sm:$0xff]  ;;  %3141 = vmatprep.subr.bf16.mxu1 %v8265_v8  ;;  %v8128_v18 = vcombine.low %v380_v6, %v384_v7  ;;  %s9331_s23 = scalar_lea.vmem %s9661_s0, %s9059_s19  ;;  %s322_s10 = scalar_lea.vmem %s9667_s6, %s8071_s29 }
  0x40   : > { %v512_v12 = vld [vmem:[#allocation2 + $0x5a0] sm:$0xff]  ;;  %3142 = vmatpush1.bf16.msra.mxu1 %v8264_v9  ;;  %v9337_v59 = vld [vmem:[%s9331_s23 + $0xc] ss:$28 sps:$4 sm:$0xff]  }
  0x41   : > { %v372_v13 = vld [vmem:[#allocation2 + $0x140] sm:$0xff]  ;;  %v8257_v14 = vcombine.high %v508_v11, %v512_v12  ;;  %3100 = vmatprep.subr.bf16.mxu0 %v8129_v10  ;;  %v8256_v19 = vcombine.low %v508_v11, %v512_v12  ;;  %3173 = vmatprep.mubr.bf16.mxu1 %v9337_v59 }
  0x42   : > { %v376_v15 = vld [vmem:[#allocation2 + $0x160] sm:$0xff]  ;;  %3101 = vmatpush1.bf16.msra.mxu0 %v8128_v18 }
  0x43   : > { %v500_v16 = vld [vmem:[#allocation2 + $0x540] sm:$0xff]  ;;  %v8121_v20 = vcombine.high %v372_v13, %v376_v15  ;;  %3143 = vmatprep.subr.bf16.mxu1 %v8257_v14  ;;  %v8120_v26 = vcombine.low %v372_v13, %v376_v15 }
  0x44   : > { %v504_v17 = vld [vmem:[#allocation2 + $0x560] sm:$0xff]  ;;  %3144 = vmatpush1.bf16.msra.mxu1 %v8256_v19 }
  0x45   : > { %v8249_v21 = vcombine.high %v500_v16, %v504_v17  ;;  %v364_v22 = vld [vmem:[#allocation2 + $0x100] sm:$0xff]  ;;  %3102 = vmatprep.subr.bf16.mxu0 %v8121_v20  ;;  %v8248_v27 = vcombine.low %v500_v16, %v504_v17 }
  0x46   : > { %v368_v23 = vld [vmem:[#allocation2 + $0x120] sm:$0xff]  ;;  %3103 = vmatpush1.bf16.msra.mxu0 %v8120_v26 }
  0x47   : > { %v492_v24 = vld [vmem:[#allocation2 + $0x500] sm:$0xff]  ;;  %v8113_v28 = vcombine.high %v364_v22, %v368_v23  ;;  %3145 = vmatprep.subr.bf16.mxu1 %v8249_v21  ;;  %v8112_v34 = vcombine.low %v364_v22, %v368_v23 }
  0x48   : > { %v496_v25 = vld [vmem:[#allocation2 + $0x520] sm:$0xff]  ;;  %3146 = vmatpush1.bf16.msra.mxu1 %v8248_v27 }
  0x49   : > { %v8241_v29 = vcombine.high %v492_v24, %v496_v25  ;;  %v356_v30 = vld [vmem:[#allocation2 + $0xc0] sm:$0xff]  ;;  %3104 = vmatprep.subr.bf16.mxu0 %v8113_v28  ;;  %v8240_v35 = vcombine.low %v492_v24, %v496_v25 }
  0x4a   : > { %v360_v31 = vld [vmem:[#allocation2 + $0xe0] sm:$0xff]  ;;  %3105 = vmatpush1.bf16.msra.mxu0 %v8112_v34 }
  0x4b   : > { %v484_v32 = vld [vmem:[#allocation2 + $0x4c0] sm:$0xff]  ;;  %v8105_v36 = vcombine.high %v356_v30, %v360_v31  ;;  %3147 = vmatprep.subr.bf16.mxu1 %v8241_v29  ;;  %v8104_v42 = vcombine.low %v356_v30, %v360_v31 }
  0x4c   : > { %v488_v33 = vld [vmem:[#allocation2 + $0x4e0] sm:$0xff]  ;;  %3148 = vmatpush1.bf16.msra.mxu1 %v8240_v35 }
  0x4d   : > { %v8233_v37 = vcombine.high %v484_v32, %v488_v33  ;;  %v348_v38 = vld [vmem:[#allocation2 + $0x80] sm:$0xff]  ;;  %3106 = vmatprep.subr.bf16.mxu0 %v8105_v36  ;;  %v8232_v43 = vcombine.low %v484_v32, %v488_v33 }
  0x4e   : > { %v352_v39 = vld [vmem:[#allocation2 + $0xa0] sm:$0xff]  ;;  %3107 = vmatpush1.bf16.msra.mxu0 %v8104_v42 }
  0x4f   : > { %v476_v40 = vld [vmem:[#allocation2 + $0x480] sm:$0xff]  ;;  %v8097_v44 = vcombine.high %v348_v38, %v352_v39  ;;  %3149 = vmatprep.subr.bf16.mxu1 %v8233_v37  ;;  %v8096_v50 = vcombine.low %v348_v38, %v352_v39 }
  0x50   : > { %v480_v41 = vld [vmem:[#allocation2 + $0x4a0] sm:$0xff]  ;;  %3150 = vmatpush1.bf16.msra.mxu1 %v8232_v43 }
  0x51   : > { %v8225_v45 = vcombine.high %v476_v40, %v480_v41  ;;  %v340_v46 = vld [vmem:[#allocation2 + $0x40] sm:$0xff]  ;;  %3108 = vmatprep.subr.bf16.mxu0 %v8097_v44  ;;  %v8224_v52 = vcombine.low %v476_v40, %v480_v41 }
  0x52   : > { %v344_v47 = vld [vmem:[#allocation2 + $0x60] sm:$0xff]  ;;  %3109 = vmatpush1.bf16.msra.mxu0 %v8096_v50 }
  0x53   : > { %v468_v48 = vld [vmem:[#allocation2 + $0x440] sm:$0xff]  ;;  %v8089_v53 = vcombine.high %v340_v46, %v344_v47  ;;  %3151 = vmatprep.subr.bf16.mxu1 %v8225_v45  ;;  %v8088_v60 = vcombine.low %v340_v46, %v344_v47 }
  0x54   : > { %v472_v49 = vld [vmem:[#allocation2 + $0x460] sm:$0xff]  ;;  %3152 = vmatpush1.bf16.msra.mxu1 %v8224_v52 }
  0x55   : > { %v332_v51 = vld [vmem:[#allocation2] sm:$0xff]  ;;  %v8217_v55 = vcombine.high %v468_v48, %v472_v49  ;;  %3110 = vmatprep.subr.bf16.mxu0 %v8089_v53  ;;  %v8216_v61 = vcombine.low %v468_v48, %v472_v49 }
  0x56   : > { %v336_v54 = vld [vmem:[#allocation2 + $0x20] sm:$0xff]  ;;  %3111 = vmatpush1.bf16.msra.mxu0 %v8088_v60 }
  0x57   : > { %v9334_v56 = vld [vmem:[%s9331_s23 + $0x4] ss:$28 sps:$4 sm:$0xff]   ;;  %v8081_v62 = vcombine.high %v332_v51, %v336_v54  ;;  %3153 = vmatprep.subr.bf16.mxu1 %v8217_v55  ;;  %v8080_v4 = vcombine.low %v332_v51, %v336_v54 }
  0x58   : > { %v460_v57 = vld [vmem:[#allocation2 + $0x400] sm:$0xff]  ;;  %3130 = vmatprep.mubr.bf16.mxu0 %v9334_v56  ;;  %3154 = vmatpush1.bf16.msra.mxu1 %v8216_v61 }
  0x59   : > { %v464_v58 = vld [vmem:[#allocation2 + $0x420] sm:$0xff]  ;;  %3112 = vmatprep.subr.bf16.mxu0 %v8081_v62 }
  0x5a   : > { %v8209_v63 = vcombine.high %v460_v57, %v464_v58  ;;  %v452_v0 = vld [vmem:[#allocation2 + $0x3c0] sm:$0xff]  ;;  %v8208_v5 = vcombine.low %v460_v57, %v464_v58  ;;  %3113 = vmatpush1.bf16.msra.mxu0 %v8080_v4 }
  0x5b   : > { %v456_v1 = vld [vmem:[#allocation2 + $0x3e0] sm:$0xff] }
  0x5c   : > { %v580_v2 = vld [vmem:[#allocation2 + $0x7c0] sm:$0xff]  ;;  %v8201_v6 = vcombine.high %v452_v0, %v456_v1  ;;  %3155 = vmatprep.subr.bf16.mxu1 %v8209_v63  ;;  %v8200_v12 = vcombine.low %v452_v0, %v456_v1 }
  0x5d   : > { %v584_v3 = vld [vmem:[#allocation2 + $0x7e0] sm:$0xff]  ;;  %3156 = vmatpush1.bf16.msra.mxu1 %v8208_v5 }
  0x5e   : > { %v8329_v7 = vcombine.high %v580_v2, %v584_v3  ;;  %v444_v8 = vld [vmem:[#allocation2 + $0x380] sm:$0xff]  ;;  %3114 = vmatprep.subr.bf16.mxu0 %v8201_v6  ;;  %v8328_v13 = vcombine.low %v580_v2, %v584_v3 }
  0x5f   : > { %v448_v9 = vld [vmem:[#allocation2 + $0x3a0] sm:$0xff]  ;;  %3115 = vmatpush2.bf16.msra.mxu0 %v8200_v12 }
  0x60   : > { %v572_v10 = vld [vmem:[#allocation2 + $0x780] sm:$0xff]  ;;  %v8193_v14 = vcombine.high %v444_v8, %v448_v9  ;;  %3157 = vmatprep.subr.bf16.mxu1 %v8329_v7  ;;  %v8192_v20 = vcombine.low %v444_v8, %v448_v9 }
  0x61   : > { %v576_v11 = vld [vmem:[#allocation2 + $0x7a0] sm:$0xff]  ;;  %3158 = vmatpush2.bf16.msra.mxu1 %v8328_v13 }
  0x62   : > { %v8321_v15 = vcombine.high %v572_v10, %v576_v11  ;;  %v436_v16 = vld [vmem:[#allocation2 + $0x340] sm:$0xff]  ;;  %3116 = vmatprep.subr.bf16.mxu0 %v8193_v14  ;;  %v8320_v21 = vcombine.low %v572_v10, %v576_v11 }
  0x63   : > { %v440_v17 = vld [vmem:[#allocation2 + $0x360] sm:$0xff]  ;;  %3117 = vmatpush2.bf16.msra.mxu0 %v8192_v20 }
  0x64   : > { %v564_v18 = vld [vmem:[#allocation2 + $0x740] sm:$0xff]  ;;  %v8185_v22 = vcombine.high %v436_v16, %v440_v17  ;;  %3159 = vmatprep.subr.bf16.mxu1 %v8321_v15  ;;  %v8184_v28 = vcombine.low %v436_v16, %v440_v17 }
  0x65   : > { %v568_v19 = vld [vmem:[#allocation2 + $0x760] sm:$0xff]  ;;  %3160 = vmatpush2.bf16.msra.mxu1 %v8320_v21 }
  0x66   : > { %v8313_v23 = vcombine.high %v564_v18, %v568_v19  ;;  %v428_v24 = vld [vmem:[#allocation2 + $0x300] sm:$0xff]  ;;  %3118 = vmatprep.subr.bf16.mxu0 %v8185_v22  ;;  %v8312_v29 = vcombine.low %v564_v18, %v568_v19 }
  0x67   : > { %v432_v25 = vld [vmem:[#allocation2 + $0x320] sm:$0xff]  ;;  %3119 = vmatpush2.bf16.msra.mxu0 %v8184_v28 }
  0x68   : > { %v556_v26 = vld [vmem:[#allocation2 + $0x700] sm:$0xff]  ;;  %v8177_v30 = vcombine.high %v428_v24, %v432_v25  ;;  %3161 = vmatprep.subr.bf16.mxu1 %v8313_v23  ;;  %v8176_v36 = vcombine.low %v428_v24, %v432_v25  ;;  %v9349_v24 = vld [vmem:[%s9331_s23 + $0x14] ss:$28 sps:$4 sm:$0xff]  }
  0x69   : > { %v560_v27 = vld [vmem:[#allocation2 + $0x720] sm:$0xff]  ;;  %3162 = vmatpush2.bf16.msra.mxu1 %v8312_v29 }
  0x6a   : > { %v8305_v31 = vcombine.high %v556_v26, %v560_v27  ;;  %v420_v32 = vld [vmem:[#allocation2 + $0x2c0] sm:$0xff]  ;;  %3120 = vmatprep.subr.bf16.mxu0 %v8177_v30  ;;  %v8304_v37 = vcombine.low %v556_v26, %v560_v27 }
  0x6b   : > { %v424_v33 = vld [vmem:[#allocation2 + $0x2e0] sm:$0xff]  ;;  %3121 = vmatpush2.bf16.msra.mxu0 %v8176_v36 }
  0x6c   : > { %v548_v34 = vld [vmem:[#allocation2 + $0x6c0] sm:$0xff]  ;;  %v8169_v38 = vcombine.high %v420_v32, %v424_v33  ;;  %3163 = vmatprep.subr.bf16.mxu1 %v8305_v31  ;;  %v8168_v44 = vcombine.low %v420_v32, %v424_v33  ;;  %v9221_v31 = vmov 0  }
  0x6d   : > { %v552_v35 = vld [vmem:[#allocation2 + $0x6e0] sm:$0xff]  ;;  %3164 = vmatpush2.bf16.msra.mxu1 %v8304_v37 }
  0x6e   : > { %v412_v39 = vld [vmem:[#allocation2 + $0x280] sm:$0xff]  ;;  %v8297_v40 = vcombine.high %v548_v34, %v552_v35  ;;  %3122 = vmatprep.subr.bf16.mxu0 %v8169_v38  ;;  %v8296_v45 = vcombine.low %v548_v34, %v552_v35 }
  0x6f   : > { %v416_v41 = vld [vmem:[#allocation2 + $0x2a0] sm:$0xff]  ;;  %3123 = vmatpush2.bf16.msra.mxu0 %v8168_v44 }
  0x70   : > { %v540_v42 = vld [vmem:[#allocation2 + $0x680] sm:$0xff]  ;;  %v8161_v46 = vcombine.high %v412_v39, %v416_v41  ;;  %3165 = vmatprep.subr.bf16.mxu1 %v8297_v40  ;;  %v8160_v52 = vcombine.low %v412_v39, %v416_v41 }
  0x71   : > { %v544_v43 = vld [vmem:[#allocation2 + $0x6a0] sm:$0xff]  ;;  %3166 = vmatpush2.bf16.msra.mxu1 %v8296_v45 }
  0x72   : > { %v8289_v47 = vcombine.high %v540_v42, %v544_v43  ;;  %v404_v48 = vld [vmem:[#allocation2 + $0x240] sm:$0xff]  ;;  %3124 = vmatprep.subr.bf16.mxu0 %v8161_v46  ;;  %v8288_v53 = vcombine.low %v540_v42, %v544_v43 }
  0x73   : > { %v408_v49 = vld [vmem:[#allocation2 + $0x260] sm:$0xff]  ;;  %3125 = vmatpush2.bf16.msra.mxu0 %v8160_v52 }
  0x74   : > { %v532_v50 = vld [vmem:[#allocation2 + $0x640] sm:$0xff]  ;;  %v8153_v54 = vcombine.high %v404_v48, %v408_v49  ;;  %3167 = vmatprep.subr.bf16.mxu1 %v8289_v47  ;;  %v8152_v62 = vcombine.low %v404_v48, %v408_v49 }
  0x75   : > { %v536_v51 = vld [vmem:[#allocation2 + $0x660] sm:$0xff]  ;;  %3168 = vmatpush2.bf16.msra.mxu1 %v8288_v53 }
  0x76   : > { %v8281_v55 = vcombine.high %v532_v50, %v536_v51  ;;  %v396_v57 = vld [vmem:[#allocation2 + $0x200] sm:$0xff]  ;;  %3126 = vmatprep.subr.bf16.mxu0 %v8153_v54  ;;  %v8280_v63 = vcombine.low %v532_v50, %v536_v51 }
  0x77   : > { %v400_v58 = vld [vmem:[#allocation2 + $0x220] sm:$0xff]  ;;  %3127 = vmatpush2.bf16.msra.mxu0 %v8152_v62 }
  0x78   : > { %v524_v60 = vld [vmem:[#allocation2 + $0x600] sm:$0xff]  ;;  %v8145_v0 = vcombine.high %v396_v57, %v400_v58  ;;  %3169 = vmatprep.subr.bf16.mxu1 %v8281_v55  ;;  %v8144_v6 = vcombine.low %v396_v57, %v400_v58 }
  0x79   : > { %v528_v61 = vld [vmem:[#allocation2 + $0x620] sm:$0xff]  ;;  %3170 = vmatpush2.bf16.msra.mxu1 %v8280_v63 }
  0x7a   : > { %v8273_v1 = vcombine.high %v524_v60, %v528_v61  ;;  %v644_v2 = vld [vmem:[#allocation2 + $0x9c0] sm:$0xff]  ;;  %3128 = vmatprep.subr.bf16.mxu0 %v8145_v0  ;;  %v8272_v7 = vcombine.low %v524_v60, %v528_v61 }
  0x7b   : > { %v648_v3 = vld [vmem:[#allocation2 + $0x9e0] sm:$0xff]  ;;  %3129 = vmatpush2.bf16.msra.mxu0 %v8144_v6 }
  0x7c   : > { %v772_v4 = vld [vmem:[#allocation2 + $0xdc0] sm:$0xff]  ;;  %v8393_v8 = vcombine.high %v644_v2, %v648_v3  ;;  %3171 = vmatprep.subr.bf16.mxu1 %v8273_v1  ;;  %v8392_v16 = vcombine.low %v644_v2, %v648_v3 }
  0x7d   : > { %v776_v5 = vld [vmem:[#allocation2 + $0xde0] sm:$0xff]  ;;  %3172 = vmatpush2.bf16.msra.mxu1 %v8272_v7 }
  0x7e   : > { %v8521_v9 = vcombine.high %v772_v4, %v776_v5  ;;  %v636_v10 = vld [vmem:[#allocation2 + $0x980] sm:$0xff]  ;;  %3184 = vmatprep.subr.bf16.mxu0 %v8393_v8  ;;  %v8520_v17 = vcombine.low %v772_v4, %v776_v5 }
  0x7f   : > { %v640_v11 = vld [vmem:[#allocation2 + $0x9a0] sm:$0xff] }
  0x80   : > { %v9342_v12 = vld [vmem:[%s9331_s23] ss:$28 sps:$4 sm:$0xff]   ;;  %v9345_v15 = vld [vmem:[%s9331_s23 + $0x8] ss:$28 sps:$4 sm:$0xff]   ;;  %v8385_v18 = vcombine.high %v636_v10, %v640_v11  ;;  %3227 = vmatprep.subr.bf16.mxu1 %v8521_v9  ;;  %v8384_v25 = vcombine.low %v636_v10, %v640_v11 }
  0x81   : > { %v764_v13 = vld [vmem:[#allocation2 + $0xd80] sm:$0xff]  ;;  %3131 = vmatmul.mubr.bf16.vlgmr.msra.gmra.mxu0 %v9342_v12  ;;  %3174 = vmatmul.mubr.bf16.vlgmr.msra.gmra.mxu1 %v9345_v15  ;;  %v389_v10 = vld [vmem:[#allocation2 + $0x1c8] sm:$0xff] }
  0x82   : > { %v768_v14 = vld [vmem:[#allocation2 + $0xda0] sm:$0xff]  ;;  %3185 = vmatpush1.bf16.msra.mxu0 %v8392_v16  ;;  %3228 = vmatpush1.bf16.msra.mxu1 %v8520_v17  ;;  %v393_v11 = vld [vmem:[#allocation2 + $0x1e8] sm:$0xff] }
  0x83   : > { %v8513_v19 = vcombine.high %v764_v13, %v768_v14  ;;  %v628_v20 = vld [vmem:[#allocation2 + $0x940] sm:$0xff]  ;;  %3186 = vmatprep.subr.bf16.mxu0 %v8385_v18  ;;  %v8512_v26 = vcombine.low %v764_v13, %v768_v14  ;;  %3259 = vmatprep.mubr.bf16.mxu1 %v9221_v31  ;;  %v8139_v17 = vcombine.high %v389_v10, %v393_v11 }
  0x84   : > { %v632_v21 = vld [vmem:[#allocation2 + $0x960] sm:$0xff]  ;;  %3216 = vmatprep.mubr.bf16.mxu0 %v9349_v24 }
  0x85   : > { %v756_v22 = vld [vmem:[#allocation2 + $0xd40] sm:$0xff]  ;;  %v8377_v27 = vcombine.high %v628_v20, %v632_v21  ;;  %3229 = vmatprep.subr.bf16.mxu1 %v8513_v19  ;;  %v8376_v34 = vcombine.low %v628_v20, %v632_v21  ;;  %v381_v20 = vld [vmem:[#allocation2 + $0x188] sm:$0xff] }
  0x86   : > { %v760_v23 = vld [vmem:[#allocation2 + $0xd60] sm:$0xff]  ;;  %3187 = vmatpush1.bf16.msra.mxu0 %v8384_v25  ;;  %3230 = vmatpush1.bf16.msra.mxu1 %v8512_v26  ;;  %v385_v21 = vld [vmem:[#allocation2 + $0x1a8] sm:$0xff]  ;;  %v8138_v25 = vcombine.low %v389_v10, %v393_v11 }
  0x87   : > { %v8505_v28 = vcombine.high %v756_v22, %v760_v23  ;;  %v620_v29 = vld [vmem:[#allocation2 + $0x900] sm:$0xff]  ;;  %3188 = vmatprep.subr.bf16.mxu0 %v8377_v27  ;;  %v8504_v35 = vcombine.low %v756_v22, %v760_v23  ;;  %v9355_v23 = vld [vmem:[%s9331_s23 + $0x18] ss:$28 sps:$4 sm:$0xff]   ;;  %v8131_v27 = vcombine.high %v381_v20, %v385_v21 }
  0x88   : > { %v624_v30 = vld [vmem:[#allocation2 + $0x920] sm:$0xff] }
  0x89   : > { %v748_v32 = vld [vmem:[#allocation2 + $0xd00] sm:$0xff]  ;;  %v8369_v36 = vcombine.high %v620_v29, %v624_v30  ;;  %3231 = vmatprep.subr.bf16.mxu1 %v8505_v28  ;;  %v8368_v42 = vcombine.low %v620_v29, %v624_v30  ;;  %v373_v30 = vld [vmem:[#allocation2 + $0x148] sm:$0xff] }
  0x8a   : > { %v752_v33 = vld [vmem:[#allocation2 + $0xd20] sm:$0xff]  ;;  %3189 = vmatpush1.bf16.msra.mxu0 %v8376_v34  ;;  %3232 = vmatpush1.bf16.msra.mxu1 %v8504_v35  ;;  %v8130_v34 = vcombine.low %v381_v20, %v385_v21 }
  0x8b   : > { %v8497_v37 = vcombine.high %v748_v32, %v752_v33  ;;  %v612_v38 = vld [vmem:[#allocation2 + $0x8c0] sm:$0xff]  ;;  %3190 = vmatprep.subr.bf16.mxu0 %v8369_v36  ;;  %v8496_v43 = vcombine.low %v748_v32, %v752_v33  ;;  %v377_v32 = vld [vmem:[#allocation2 + $0x168] sm:$0xff] }
  0x8c   : > { %v616_v39 = vld [vmem:[#allocation2 + $0x8e0] sm:$0xff]  ;;  %v8123_v36 = vcombine.high %v373_v30, %v377_v32 }
  0x8d   : > { %v740_v40 = vld [vmem:[#allocation2 + $0xcc0] sm:$0xff]  ;;  %v8361_v44 = vcombine.high %v612_v38, %v616_v39  ;;  %3233 = vmatprep.subr.bf16.mxu1 %v8497_v37  ;;  %v8360_v50 = vcombine.low %v612_v38, %v616_v39  ;;  %v365_v39 = vld [vmem:[#allocation2 + $0x108] sm:$0xff] }
  0x8e   : > { %v744_v41 = vld [vmem:[#allocation2 + $0xce0] sm:$0xff]  ;;  %3191 = vmatpush1.bf16.msra.mxu0 %v8368_v42  ;;  %3234 = vmatpush1.bf16.msra.mxu1 %v8496_v43  ;;  %v8122_v42 = vcombine.low %v373_v30, %v377_v32  ;;  %v449_v30 = vld [vmem:[#allocation2 + $0x3a8] sm:$0xff] }
  0x8f   : > { %v8489_v45 = vcombine.high %v740_v40, %v744_v41  ;;  %v604_v46 = vld [vmem:[#allocation2 + $0x880] sm:$0xff]  ;;  %3192 = vmatprep.subr.bf16.mxu0 %v8361_v44  ;;  %v8488_v51 = vcombine.low %v740_v40, %v744_v41  ;;  %v369_v40 = vld [vmem:[#allocation2 + $0x128] sm:$0xff] }
  0x90   : > { %v608_v47 = vld [vmem:[#allocation2 + $0x8a0] sm:$0xff]  ;;  %v8115_v44 = vcombine.high %v365_v39, %v369_v40 }
  0x91   : > { %v732_v48 = vld [vmem:[#allocation2 + $0xc80] sm:$0xff]  ;;  %v8353_v52 = vcombine.high %v604_v46, %v608_v47  ;;  %3235 = vmatprep.subr.bf16.mxu1 %v8489_v45  ;;  %v8352_v60 = vcombine.low %v604_v46, %v608_v47  ;;  %v357_v47 = vld [vmem:[#allocation2 + $0xc8] sm:$0xff] }
  0x92   : > { %v736_v49 = vld [vmem:[#allocation2 + $0xca0] sm:$0xff]  ;;  %3193 = vmatpush1.bf16.msra.mxu0 %v8360_v50  ;;  %3236 = vmatpush1.bf16.msra.mxu1 %v8488_v51  ;;  %v8114_v50 = vcombine.low %v365_v39, %v369_v40  ;;  %v441_v39 = vld [vmem:[#allocation2 + $0x368] sm:$0xff] }
  0x93   : > { %v8481_v53 = vcombine.high %v732_v48, %v736_v49  ;;  %v596_v54 = vld [vmem:[#allocation2 + $0x840] sm:$0xff]  ;;  %3194 = vmatprep.subr.bf16.mxu0 %v8353_v52  ;;  %v8480_v61 = vcombine.low %v732_v48, %v736_v49  ;;  %v361_v48 = vld [vmem:[#allocation2 + $0xe8] sm:$0xff] }
  0x94   : > { %v600_v55 = vld [vmem:[#allocation2 + $0x860] sm:$0xff]  ;;  %v8107_v51 = vcombine.high %v357_v47, %v361_v48 }
  0x95   : > { %v724_v57 = vld [vmem:[#allocation2 + $0xc40] sm:$0xff]  ;;  %v8345_v62 = vcombine.high %v596_v54, %v600_v55  ;;  %3237 = vmatprep.subr.bf16.mxu1 %v8481_v53  ;;  %v8344_v4 = vcombine.low %v596_v54, %v600_v55  ;;  %v349_v54 = vld [vmem:[#allocation2 + $0x88] sm:$0xff] }
  0x96   : > { %v728_v58 = vld [vmem:[#allocation2 + $0xc60] sm:$0xff]  ;;  %3195 = vmatpush1.bf16.msra.mxu0 %v8352_v60  ;;  %3238 = vmatpush1.bf16.msra.mxu1 %v8480_v61  ;;  %v353_v55 = vld [vmem:[#allocation2 + $0xa8] sm:$0xff] }
  0x97   : > { %v8473_v63 = vcombine.high %v724_v57, %v728_v58  ;;  %v588_v0 = vld [vmem:[#allocation2 + $0x800] sm:$0xff]  ;;  %3196 = vmatprep.subr.bf16.mxu0 %v8345_v62  ;;  %v8472_v5 = vcombine.low %v724_v57, %v728_v58  ;;  %v8106_v58 = vcombine.low %v357_v47, %v361_v48  ;;  %v8099_v61 = vcombine.high %v349_v54, %v353_v55  ;;  %v433_v47 = vld [vmem:[#allocation2 + $0x328] sm:$0xff] }
  0x98   : > { %v592_v1 = vld [vmem:[#allocation2 + $0x820] sm:$0xff] }
  0x99   : > { %v716_v2 = vld [vmem:[#allocation2 + $0xc00] sm:$0xff]  ;;  %v8337_v6 = vcombine.high %v588_v0, %v592_v1  ;;  %3239 = vmatprep.subr.bf16.mxu1 %v8473_v63  ;;  %v8336_v13 = vcombine.low %v588_v0, %v592_v1  ;;  %v341_v0 = vld [vmem:[#allocation2 + $0x48] sm:$0xff] }
  0x9a   : > { %v720_v3 = vld [vmem:[#allocation2 + $0xc20] sm:$0xff]  ;;  %3197 = vmatpush1.bf16.msra.mxu0 %v8344_v4  ;;  %3240 = vmatpush1.bf16.msra.mxu1 %v8472_v5  ;;  %v345_v1 = vld [vmem:[#allocation2 + $0x68] sm:$0xff] }
  0x9b   : > { %v8465_v7 = vcombine.high %v716_v2, %v720_v3  ;;  %v708_v8 = vld [vmem:[#allocation2 + $0xbc0] sm:$0xff]  ;;  %3198 = vmatprep.subr.bf16.mxu0 %v8337_v6  ;;  %v8464_v14 = vcombine.low %v716_v2, %v720_v3  ;;  %v8098_v3 = vcombine.low %v349_v54, %v353_v55  ;;  %v8091_v5 = vcombine.high %v341_v0, %v345_v1 }
  0x9c   : > { %v712_v9 = vld [vmem:[#allocation2 + $0xbe0] sm:$0xff]  ;;  %v8090_v11 = vcombine.low %v341_v0, %v345_v1 }
  0x9d   : > { %v8457_v16 = vcombine.high %v708_v8, %v712_v9  ;;  %3241 = vmatprep.subr.bf16.mxu1 %v8465_v7  ;;  %v700_v18 = vld [vmem:[#allocation2 + $0xb80] sm:$0xff]  ;;  %v8456_v22 = vcombine.low %v708_v8, %v712_v9  ;;  %v333_v8 = vld [vmem:[#allocation2 + $0x8] sm:$0xff] }
  0x9e   : > { %v704_v19 = vld [vmem:[#allocation2 + $0xba0] sm:$0xff]  ;;  %3199 = vmatpush1.bf16.msra.mxu0 %v8336_v13  ;;  %3242 = vmatpush1.bf16.msra.mxu1 %v8464_v14  ;;  %v337_v9 = vld [vmem:[#allocation2 + $0x28] sm:$0xff] }
  0x9f   : > { %3200 = vmatprep.subr.bf16.mxu0 %v8457_v16  ;;  %v8449_v26 = vcombine.high %v700_v18, %v704_v19  ;;  %3270 = vmatprep.subr.bf16.mxu1 %v8139_v17  ;;  %v692_v28 = vld [vmem:[#allocation2 + $0xb40] sm:$0xff]  ;;  %v8448_v33 = vcombine.low %v700_v18, %v704_v19  ;;  %v8083_v14 = vcombine.high %v333_v8, %v337_v9  ;;  %v517_v16 = vld [vmem:[#allocation2 + $0x5c8] sm:$0xff] }
  0xa0   : > { %v696_v29 = vld [vmem:[#allocation2 + $0xb60] sm:$0xff]  ;;  %v521_v17 = vld [vmem:[#allocation2 + $0x5e8] sm:$0xff]  ;;  %v8082_v21 = vcombine.low %v333_v8, %v337_v9 }
  0xa1   : > { %3260 = vmatmul.mubr.bf16.vlgmr.msra.gmra.mxu1 %v9355_v23  ;;  %v8441_v35 = vcombine.high %v692_v28, %v696_v29  ;;  %v684_v37 = vld [vmem:[#allocation2 + $0xb00] sm:$0xff]  ;;  %v8440_v41 = vcombine.low %v692_v28, %v696_v29  ;;  %v453_v18 = vld [vmem:[#allocation2 + $0x3c8] sm:$0xff]  ;;  %v8266_v32 = vcombine.low %v517_v16, %v521_v17 }
  0xa2   : > { %3201 = vmatpush2.bf16.msra.mxu0 %v8456_v22  ;;  %3271 = vmatpush1.bf16.msra.mxu1 %v8138_v25  ;;  %v688_v38 = vld [vmem:[#allocation2 + $0xb20] sm:$0xff]  ;;  %v457_v19 = vld [vmem:[#allocation2 + $0x3e8] sm:$0xff]  ;;  %v8267_v22 = vcombine.high %v517_v16, %v521_v17 }
  0xa3   : > { %3202 = vmatprep.subr.bf16.mxu0 %v8449_v26  ;;  %3272 = vmatprep.subr.bf16.mxu1 %v8131_v27  ;;  %v8433_v43 = vcombine.high %v684_v37, %v688_v38  ;;  %v676_v45 = vld [vmem:[#allocation2 + $0xac0] sm:$0xff]  ;;  %v8432_v49 = vcombine.low %v684_v37, %v688_v38  ;;  %v8203_v25 = vcombine.high %v453_v18, %v457_v19  ;;  %v509_v26 = vld [vmem:[#allocation2 + $0x588] sm:$0xff] }
  0xa4   : > { %3302 = vmatprep.mubr.bf16.mxu1 %v9334_v56  ;;  %v680_v46 = vld [vmem:[#allocation2 + $0xae0] sm:$0xff]  ;;  %v513_v27 = vld [vmem:[#allocation2 + $0x5a8] sm:$0xff] }
  0xa5   : > { %v8425_v56 = vcombine.high %v676_v45, %v680_v46  ;;  %v668_v52 = vld [vmem:[#allocation2 + $0xa80] sm:$0xff]  ;;  %v8424_v57 = vcombine.low %v676_v45, %v680_v46  ;;  %v9360_v28 = vld [vmem:[%s9331_s23 + $0x10] ss:$28 sps:$4 sm:$0xff]   ;;  %v8258_v40 = vcombine.low %v509_v26, %v513_v27 }
  0xa6   : > { %3203 = vmatpush2.bf16.msra.mxu0 %v8448_v33  ;;  %3273 = vmatpush1.bf16.msra.mxu1 %v8130_v34  ;;  %v672_v53 = vld [vmem:[#allocation2 + $0xaa0] sm:$0xff]  ;;  %v445_v29 = vld [vmem:[#allocation2 + $0x388] sm:$0xff]  ;;  %v8202_v33 = vcombine.low %v453_v18, %v457_v19  ;;  %v8259_v34 = vcombine.high %v509_v26, %v513_v27 }
  0xa7   : > { %3204 = vmatprep.subr.bf16.mxu0 %v8441_v35  ;;  %3274 = vmatprep.subr.bf16.mxu1 %v8123_v36  ;;  %v8417_v60 = vcombine.high %v668_v52, %v672_v53  ;;  %v660_v62 = vld [vmem:[#allocation2 + $0xa40] sm:$0xff]  ;;  %v8416_v2 = vcombine.low %v668_v52, %v672_v53  ;;  %v8195_v35 = vcombine.high %v445_v29, %v449_v30  ;;  %v501_v36 = vld [vmem:[#allocation2 + $0x548] sm:$0xff] }
  0xa8   : > { %v664_v63 = vld [vmem:[#allocation2 + $0xa60] sm:$0xff]  ;;  %v505_v37 = vld [vmem:[#allocation2 + $0x568] sm:$0xff] }
  0xa9   : > { %v8409_v4 = vcombine.high %v660_v62, %v664_v63  ;;  %v652_v6 = vld [vmem:[#allocation2 + $0xa00] sm:$0xff]  ;;  %v8408_v10 = vcombine.low %v660_v62, %v664_v63  ;;  %v437_v38 = vld [vmem:[#allocation2 + $0x348] sm:$0xff]  ;;  %v8250_v48 = vcombine.low %v501_v36, %v505_v37 }
  0xaa   : > { %3205 = vmatpush2.bf16.msra.mxu0 %v8440_v41  ;;  %3275 = vmatpush1.bf16.msra.mxu1 %v8122_v42  ;;  %v656_v7 = vld [vmem:[#allocation2 + $0xa20] sm:$0xff]  ;;  %v8194_v41 = vcombine.low %v445_v29, %v449_v30  ;;  %v8251_v42 = vcombine.high %v501_v36, %v505_v37  ;;  %v497_v45 = vld [vmem:[#allocation2 + $0x528] sm:$0xff] }
  0xab   : > { %3206 = vmatprep.subr.bf16.mxu0 %v8433_v43  ;;  %3276 = vmatprep.subr.bf16.mxu1 %v8115_v44  ;;  %v8401_v13 = vcombine.high %v652_v6, %v656_v7  ;;  %v8400_v20 = vcombine.low %v652_v6, %v656_v7  ;;  %v8187_v43 = vcombine.high %v437_v38, %v441_v39  ;;  %v493_v44 = vld [vmem:[#allocation2 + $0x508] sm:$0xff] }
  0xac   : > { %v429_v46 = vld [vmem:[#allocation2 + $0x308] sm:$0xff]  ;;  %v8242_v54 = vcombine.low %v493_v44, %v497_v45 }
  0xad   : > { %v421_v52 = vld [vmem:[#allocation2 + $0x2c8] sm:$0xff]  ;;  %v8178_v55 = vcombine.low %v429_v46, %v433_v47 }
  0xae   : > { %3207 = vmatpush2.bf16.msra.mxu0 %v8432_v49  ;;  %3277 = vmatpush1.bf16.msra.mxu1 %v8114_v50  ;;  %v8186_v49 = vcombine.low %v437_v38, %v441_v39  ;;  %v8243_v50 = vcombine.high %v493_v44, %v497_v45  ;;  %v425_v53 = vld [vmem:[#allocation2 + $0x2e8] sm:$0xff] }
  0xaf   : > { %3208 = vmatprep.subr.bf16.mxu0 %v8425_v56  ;;  %3278 = vmatprep.subr.bf16.mxu1 %v8107_v51  ;;  %v8179_v56 = vcombine.high %v429_v46, %v433_v47  ;;  %v485_v51 = vld [vmem:[#allocation2 + $0x4c8] sm:$0xff]  ;;  %v8170_v1 = vcombine.low %v421_v52, %v425_v53 }
  0xb0   : > { %v413_v62 = vld [vmem:[#allocation2 + $0x288] sm:$0xff] }
  0xb1   : > { %v417_v63 = vld [vmem:[#allocation2 + $0x2a8] sm:$0xff] }
  0xb2   : > { %3209 = vmatpush2.bf16.msra.mxu0 %v8424_v57  ;;  %3279 = vmatpush1.bf16.msra.mxu1 %v8106_v58  ;;  %v8171_v58 = vcombine.high %v421_v52, %v425_v53  ;;  %v405_v6 = vld [vmem:[#allocation2 + $0x248] sm:$0xff]  ;;  %v8162_v9 = vcombine.low %v413_v62, %v417_v63 }
  0xb3   : > { %3210 = vmatprep.subr.bf16.mxu0 %v8417_v60  ;;  %3280 = vmatprep.subr.bf16.mxu1 %v8099_v61  ;;  %v477_v60 = vld [vmem:[#allocation2 + $0x488] sm:$0xff] }
  0xb4   : > { %v481_v61 = vld [vmem:[#allocation2 + $0x4a8] sm:$0xff] }
  0xb5   : > { %v409_v7 = vld [vmem:[#allocation2 + $0x268] sm:$0xff]  ;;  %v8226_v8 = vcombine.low %v477_v60, %v481_v61 }
  0xb6   : > { %3211 = vmatpush2.bf16.msra.mxu0 %v8416_v2  ;;  %3281 = vmatpush1.bf16.msra.mxu1 %v8098_v3  ;;  %v8227_v2 = vcombine.high %v477_v60, %v481_v61  ;;  %v8163_v3 = vcombine.high %v413_v62, %v417_v63  ;;  %v397_v16 = vld [vmem:[#allocation2 + $0x208] sm:$0xff]  ;;  %v8154_v19 = vcombine.low %v405_v6, %v409_v7 }
  0xb7   : > { %3212 = vmatprep.subr.bf16.mxu0 %v8409_v4  ;;  %3282 = vmatprep.subr.bf16.mxu1 %v8091_v5  ;;  %v469_v4 = vld [vmem:[#allocation2 + $0x448] sm:$0xff] }
  0xb8   : > { %v473_v5 = vld [vmem:[#allocation2 + $0x468] sm:$0xff] }
  0xb9   : > { %v401_v17 = vld [vmem:[#allocation2 + $0x228] sm:$0xff]  ;;  %v8218_v18 = vcombine.low %v469_v4, %v473_v5 }
  0xba   : > { %3213 = vmatpush2.bf16.msra.mxu0 %v8408_v10  ;;  %3283 = vmatpush1.bf16.msra.mxu1 %v8090_v11  ;;  %v8219_v10 = vcombine.high %v469_v4, %v473_v5  ;;  %v8155_v11 = vcombine.high %v405_v6, %v409_v7  ;;  %v645_v26 = vld [vmem:[#allocation2 + $0x9c8] sm:$0xff]  ;;  %v8146_v30 = vcombine.low %v397_v16, %v401_v17 }
  0xbb   : > { %3214 = vmatprep.subr.bf16.mxu0 %v8401_v13  ;;  %3284 = vmatprep.subr.bf16.mxu1 %v8083_v14  ;;  %v461_v13 = vld [vmem:[#allocation2 + $0x408] sm:$0xff] }
  0xbc   : > { %v465_v14 = vld [vmem:[#allocation2 + $0x428] sm:$0xff] }
  0xbd   : > { %v649_v27 = vld [vmem:[#allocation2 + $0x9e8] sm:$0xff]  ;;  %v8210_v29 = vcombine.low %v461_v13, %v465_v14 }
  0xbe   : > { %3215 = vmatpush2.bf16.msra.mxu0 %v8400_v20  ;;  %3285 = vmatpush1.bf16.msra.mxu1 %v8082_v21  ;;  %v8211_v20 = vcombine.high %v461_v13, %v465_v14  ;;  %v8147_v21 = vcombine.high %v397_v16, %v401_v17  ;;  %v637_v36 = vld [vmem:[#allocation2 + $0x988] sm:$0xff]  ;;  %v8394_v39 = vcombine.low %v645_v26, %v649_v27 }
  0xbf   : > { %3313 = vmatprep.subr.bf16.mxu0 %v8267_v22  ;;  %3286 = vmatprep.subr.bf16.mxu1 %v8203_v25  ;;  %v581_v22 = vld [vmem:[#allocation2 + $0x7c8] sm:$0xff] }
  0xc0   : > { %v585_v25 = vld [vmem:[#allocation2 + $0x7e8] sm:$0xff] }
  0xc1   : > { %3217 = vmatmul.mubr.bf16.vlgmr.msra.gmra.mxu0 %v9360_v28  ;;  %v641_v37 = vld [vmem:[#allocation2 + $0x9a8] sm:$0xff]  ;;  %v8330_v38 = vcombine.low %v581_v22, %v585_v25 }
  0xc2   : > { %3314 = vmatpush1.bf16.msra.mxu0 %v8266_v32  ;;  %3345 = vmatprep.mubr.bf16.mxu0 %v9337_v59  ;;  %v489_v59 = vld [vmem:[#allocation2 + $0x4e8] sm:$0xff]  ;;  %v8331_v32 = vcombine.high %v581_v22, %v585_v25  ;;  %v8386_v47 = vcombine.low %v637_v36, %v641_v37 }
  0xc3   : > { %3287 = vmatpush2.bf16.msra.mxu1 %v8202_v33  ;;  %3315 = vmatprep.subr.bf16.mxu0 %v8259_v34  ;;  %v8235_v57 = vcombine.high %v485_v51, %v489_v59  ;;  %v8234_v0 = vcombine.low %v485_v51, %v489_v59  ;;  %v8395_v33 = vcombine.high %v645_v26, %v649_v27  ;;  %v573_v34 = vld [vmem:[#allocation2 + $0x788] sm:$0xff] }
  0xc4   : > { %3288 = vmatprep.subr.bf16.mxu1 %v8195_v35  ;;  %v577_v35 = vld [vmem:[#allocation2 + $0x7a8] sm:$0xff] }
  0xc5   : > { %v629_v44 = vld [vmem:[#allocation2 + $0x948] sm:$0xff]  ;;  %v8322_v46 = vcombine.low %v573_v34, %v577_v35 }
  0xc6   : > { %3316 = vmatpush1.bf16.msra.mxu0 %v8258_v40  ;;  %v8323_v40 = vcombine.high %v573_v34, %v577_v35  ;;  %v633_v45 = vld [vmem:[#allocation2 + $0x968] sm:$0xff] }
  0xc7   : > { %3289 = vmatpush2.bf16.msra.mxu1 %v8194_v41  ;;  %3317 = vmatprep.subr.bf16.mxu0 %v8251_v42  ;;  %v8387_v41 = vcombine.high %v637_v36, %v641_v37  ;;  %v565_v42 = vld [vmem:[#allocation2 + $0x748] sm:$0xff]  ;;  %v8378_v53 = vcombine.low %v629_v44, %v633_v45 }
  0xc8   : > { %3290 = vmatprep.subr.bf16.mxu1 %v8187_v43  ;;  %v569_v43 = vld [vmem:[#allocation2 + $0x768] sm:$0xff] }
  0xc9   : > { %v621_v51 = vld [vmem:[#allocation2 + $0x908] sm:$0xff]  ;;  %v8314_v52 = vcombine.low %v565_v42, %v569_v43 }
  0xca   : > { %3318 = vmatpush1.bf16.msra.mxu0 %v8250_v48  ;;  %v8315_v48 = vcombine.high %v565_v42, %v569_v43  ;;  %v625_v59 = vld [vmem:[#allocation2 + $0x928] sm:$0xff] }
  0xcb   : > { %3291 = vmatpush2.bf16.msra.mxu1 %v8186_v49  ;;  %3319 = vmatprep.subr.bf16.mxu0 %v8243_v50  ;;  %v8379_v49 = vcombine.high %v629_v44, %v633_v45  ;;  %v557_v50 = vld [vmem:[#allocation2 + $0x708] sm:$0xff]  ;;  %v8370_v62 = vcombine.low %v621_v51, %v625_v59 }
  0xcc   : > { %3292 = vmatprep.subr.bf16.mxu1 %v8179_v56  ;;  %v561_v56 = vld [vmem:[#allocation2 + $0x728] sm:$0xff] }
  0xcd   : > { %v617_v60 = vld [vmem:[#allocation2 + $0x8e8] sm:$0xff]  ;;  %v8306_v61 = vcombine.low %v557_v50, %v561_v56 }
  0xce   : > { %3320 = vmatpush1.bf16.msra.mxu0 %v8242_v54  ;;  %v8371_v54 = vcombine.high %v621_v51, %v625_v59 }
  0xcf   : > { %3293 = vmatpush2.bf16.msra.mxu1 %v8178_v55  ;;  %3321 = vmatprep.subr.bf16.mxu0 %v8235_v57  ;;  %v549_v55 = vld [vmem:[#allocation2 + $0x6c8] sm:$0xff] }
  0xd0   : > { %3294 = vmatprep.subr.bf16.mxu1 %v8171_v58  ;;  %v553_v57 = vld [vmem:[#allocation2 + $0x6e8] sm:$0xff] }
  0xd1   : > { %v613_v58 = vld [vmem:[#allocation2 + $0x8c8] sm:$0xff]  ;;  %v8298_v4 = vcombine.low %v549_v55, %v553_v57 }
  0xd2   : > { %3322 = vmatpush1.bf16.msra.mxu0 %v8234_v0  ;;  %v8363_v63 = vcombine.high %v613_v58, %v617_v60  ;;  %v541_v0 = vld [vmem:[#allocation2 + $0x688] sm:$0xff]  ;;  %v8362_v5 = vcombine.low %v613_v58, %v617_v60 }
  0xd3   : > { %3295 = vmatpush2.bf16.msra.mxu1 %v8170_v1  ;;  %3323 = vmatprep.subr.bf16.mxu0 %v8227_v2  ;;  %v545_v1 = vld [vmem:[#allocation2 + $0x6a8] sm:$0xff] }
  0xd4   : > { %3296 = vmatprep.subr.bf16.mxu1 %v8163_v3  ;;  %v605_v2 = vld [vmem:[#allocation2 + $0x888] sm:$0xff]  ;;  %v8291_v6 = vcombine.high %v541_v0, %v545_v1  ;;  %v8290_v13 = vcombine.low %v541_v0, %v545_v1 }
  0xd5   : > { %v609_v3 = vld [vmem:[#allocation2 + $0x8a8] sm:$0xff] }
  0xd6   : > { %3324 = vmatpush1.bf16.msra.mxu0 %v8226_v8  ;;  %v8355_v7 = vcombine.high %v605_v2, %v609_v3  ;;  %v533_v8 = vld [vmem:[#allocation2 + $0x648] sm:$0xff]  ;;  %v8354_v14 = vcombine.low %v605_v2, %v609_v3 }
  0xd7   : > { %3297 = vmatpush2.bf16.msra.mxu1 %v8162_v9  ;;  %3325 = vmatprep.subr.bf16.mxu0 %v8219_v10  ;;  %v537_v9 = vld [vmem:[#allocation2 + $0x668] sm:$0xff] }
  0xd8   : > { %3298 = vmatprep.subr.bf16.mxu1 %v8155_v11  ;;  %v597_v10 = vld [vmem:[#allocation2 + $0x848] sm:$0xff]  ;;  %v8283_v16 = vcombine.high %v533_v8, %v537_v9  ;;  %v8282_v22 = vcombine.low %v533_v8, %v537_v9 }
  0xd9   : > { %v601_v11 = vld [vmem:[#allocation2 + $0x868] sm:$0xff] }
  0xda   : > { %3326 = vmatpush1.bf16.msra.mxu0 %v8218_v18  ;;  %v8347_v17 = vcombine.high %v597_v10, %v601_v11  ;;  %v525_v18 = vld [vmem:[#allocation2 + $0x608] sm:$0xff]  ;;  %v8346_v25 = vcombine.low %v597_v10, %v601_v11 }
  0xdb   : > { %3299 = vmatpush2.bf16.msra.mxu1 %v8154_v19  ;;  %3327 = vmatprep.subr.bf16.mxu0 %v8211_v20  ;;  %v529_v19 = vld [vmem:[#allocation2 + $0x628] sm:$0xff] }
  0xdc   : > { %3300 = vmatprep.subr.bf16.mxu1 %v8147_v21  ;;  %v589_v20 = vld [vmem:[#allocation2 + $0x808] sm:$0xff]  ;;  %v8275_v26 = vcombine.high %v525_v18, %v529_v19  ;;  %v8274_v34 = vcombine.low %v525_v18, %v529_v19 }
  0xdd   : > { %v593_v21 = vld [vmem:[#allocation2 + $0x828] sm:$0xff] }
  0xde   : > { %3328 = vmatpush1.bf16.msra.mxu0 %v8210_v29  ;;  %v8339_v27 = vcombine.high %v589_v20, %v593_v21  ;;  %v773_v29 = vld [vmem:[#allocation2 + $0xdc8] sm:$0xff]  ;;  %v8338_v35 = vcombine.low %v589_v20, %v593_v21 }
  0xdf   : > { %3301 = vmatpush2.bf16.msra.mxu1 %v8146_v30  ;;  %3329 = vmatprep.subr.bf16.mxu0 %v8331_v32  ;;  %v777_v30 = vld [vmem:[#allocation2 + $0xde8] sm:$0xff] }
  0xe0   : > { %3356 = vmatprep.subr.bf16.mxu1 %v8395_v33  ;;  %v709_v32 = vld [vmem:[#allocation2 + $0xbc8] sm:$0xff]  ;;  %v8523_v36 = vcombine.high %v773_v29, %v777_v30  ;;  %v8522_v42 = vcombine.low %v773_v29, %v777_v30 }
  0xe1   : > { %v713_v33 = vld [vmem:[#allocation2 + $0xbe8] sm:$0xff] }
  0xe2   : > { %3303 = vmatmul.mubr.bf16.vlgmr.msra.gmra.mxu1 %v9342_v12  ;;  %3330 = vmatpush2.bf16.msra.mxu0 %v8330_v38  ;;  %v8307_v12 = vcombine.high %v557_v50, %v561_v56  ;;  %v8459_v37 = vcombine.high %v709_v32, %v713_v33  ;;  %v765_v38 = vld [vmem:[#allocation2 + $0xd88] sm:$0xff]  ;;  %v8458_v43 = vcombine.low %v709_v32, %v713_v33  ;;  %v390_v33 = vld [vmem:[#allocation2 + $0x1d0] sm:$0xff] }
  0xe3   : > { %3357 = vmatpush1.bf16.msra.mxu1 %v8394_v39  ;;  %3331 = vmatprep.subr.bf16.mxu0 %v8323_v40  ;;  %v769_v39 = vld [vmem:[#allocation2 + $0xda8] sm:$0xff] }
  0xe4   : > { %3358 = vmatprep.subr.bf16.mxu1 %v8387_v41  ;;  %3388 = vmatprep.mubr.bf16.mxu1 %v9349_v24  ;;  %v8299_v24 = vcombine.high %v549_v55, %v553_v57  ;;  %v701_v40 = vld [vmem:[#allocation2 + $0xb88] sm:$0xff]  ;;  %v8515_v44 = vcombine.high %v765_v38, %v769_v39  ;;  %v8514_v50 = vcombine.low %v765_v38, %v769_v39 }
  0xe5   : > { %v705_v41 = vld [vmem:[#allocation2 + $0xba8] sm:$0xff] }
  0xe6   : > { %3332 = vmatpush2.bf16.msra.mxu0 %v8322_v46  ;;  %v8451_v45 = vcombine.high %v701_v40, %v705_v41  ;;  %v757_v46 = vld [vmem:[#allocation2 + $0xd48] sm:$0xff]  ;;  %v8450_v56 = vcombine.low %v701_v40, %v705_v41  ;;  %v382_v41 = vld [vmem:[#allocation2 + $0x190] sm:$0xff] }
  0xe7   : > { %3359 = vmatpush1.bf16.msra.mxu1 %v8386_v47  ;;  %3333 = vmatprep.subr.bf16.mxu0 %v8315_v48  ;;  %v761_v47 = vld [vmem:[#allocation2 + $0xd68] sm:$0xff] }
  0xe8   : > { %3360 = vmatprep.subr.bf16.mxu1 %v8379_v49  ;;  %v693_v48 = vld [vmem:[#allocation2 + $0xb48] sm:$0xff]  ;;  %v8507_v51 = vcombine.high %v757_v46, %v761_v47  ;;  %v8506_v55 = vcombine.low %v757_v46, %v761_v47 }
  0xe9   : > { %v697_v49 = vld [vmem:[#allocation2 + $0xb68] sm:$0xff] }
  0xea   : > { %3334 = vmatpush2.bf16.msra.mxu0 %v8314_v52  ;;  %v8443_v59 = vcombine.high %v693_v48, %v697_v49  ;;  %v749_v52 = vld [vmem:[#allocation2 + $0xd08] sm:$0xff] }
  0xeb   : > { %3361 = vmatpush1.bf16.msra.mxu1 %v8378_v53  ;;  %3335 = vmatprep.subr.bf16.mxu0 %v8307_v12  ;;  %v753_v53 = vld [vmem:[#allocation2 + $0xd28] sm:$0xff] }
  0xec   : > { %3362 = vmatprep.subr.bf16.mxu1 %v8371_v54  ;;  %v685_v12 = vld [vmem:[#allocation2 + $0xb08] sm:$0xff]  ;;  %v8499_v57 = vcombine.high %v749_v52, %v753_v53 }
  0xed   : > { %v689_v54 = vld [vmem:[#allocation2 + $0xb28] sm:$0xff] }
  0xee   : > { %3336 = vmatpush2.bf16.msra.mxu0 %v8306_v61  ;;  %v8435_v58 = vcombine.high %v685_v12, %v689_v54  ;;  %v741_v60 = vld [vmem:[#allocation2 + $0xcc8] sm:$0xff]  ;;  %v8434_v0 = vcombine.low %v685_v12, %v689_v54  ;;  %v366_v54 = vld [vmem:[#allocation2 + $0x110] sm:$0xff] }
  0xef   : > { %3363 = vmatpush1.bf16.msra.mxu1 %v8370_v62  ;;  %3337 = vmatprep.subr.bf16.mxu0 %v8299_v24  ;;  %v745_v61 = vld [vmem:[#allocation2 + $0xce8] sm:$0xff] }
  0xf0   : > { %3364 = vmatprep.subr.bf16.mxu1 %v8363_v63  ;;  %v677_v62 = vld [vmem:[#allocation2 + $0xac8] sm:$0xff]  ;;  %v8498_v63 = vcombine.low %v749_v52, %v753_v53  ;;  %v8491_v1 = vcombine.high %v741_v60, %v745_v61 }
  0xf1   : > { %v681_v24 = vld [vmem:[#allocation2 + $0xae8] sm:$0xff] }
  0xf2   : > { %3338 = vmatpush2.bf16.msra.mxu0 %v8298_v4  ;;  %v8427_v2 = vcombine.high %v677_v62, %v681_v24  ;;  %v733_v3 = vld [vmem:[#allocation2 + $0xc88] sm:$0xff]  ;;  %v8426_v8 = vcombine.low %v677_v62, %v681_v24  ;;  %v358_v24 = vld [vmem:[#allocation2 + $0xd0] sm:$0xff] }
  0xf3   : > { %3365 = vmatpush1.bf16.msra.mxu1 %v8362_v5  ;;  %3339 = vmatprep.subr.bf16.mxu0 %v8291_v6  ;;  %v737_v4 = vld [vmem:[#allocation2 + $0xca8] sm:$0xff] }
  0xf4   : > { %3366 = vmatprep.subr.bf16.mxu1 %v8355_v7  ;;  %v669_v5 = vld [vmem:[#allocation2 + $0xa88] sm:$0xff]  ;;  %v8490_v7 = vcombine.low %v741_v60, %v745_v61  ;;  %v8483_v9 = vcombine.high %v733_v3, %v737_v4 }
  0xf5   : > { %v673_v6 = vld [vmem:[#allocation2 + $0xaa8] sm:$0xff] }
  0xf6   : > { %3340 = vmatpush2.bf16.msra.mxu0 %v8290_v13  ;;  %v8419_v10 = vcombine.high %v669_v5, %v673_v6  ;;  %v725_v11 = vld [vmem:[#allocation2 + $0xc48] sm:$0xff]  ;;  %v8418_v18 = vcombine.low %v669_v5, %v673_v6  ;;  %v350_v6 = vld [vmem:[#allocation2 + $0x90] sm:$0xff] }
  0xf7   : > { %3367 = vmatpush1.bf16.msra.mxu1 %v8354_v14  ;;  %3341 = vmatprep.subr.bf16.mxu0 %v8283_v16  ;;  %v729_v13 = vld [vmem:[#allocation2 + $0xc68] sm:$0xff] }
  0xf8   : > { %3368 = vmatprep.subr.bf16.mxu1 %v8347_v17  ;;  %v661_v14 = vld [vmem:[#allocation2 + $0xa48] sm:$0xff]  ;;  %v8482_v17 = vcombine.low %v733_v3, %v737_v4  ;;  %v8475_v19 = vcombine.high %v725_v11, %v729_v13 }
  0xf9   : > { %v665_v16 = vld [vmem:[#allocation2 + $0xa68] sm:$0xff] }
  0xfa   : > { %3342 = vmatpush2.bf16.msra.mxu0 %v8282_v22  ;;  %v8411_v20 = vcombine.high %v661_v14, %v665_v16  ;;  %v717_v21 = vld [vmem:[#allocation2 + $0xc08] sm:$0xff]  ;;  %v8410_v29 = vcombine.low %v661_v14, %v665_v16  ;;  %v342_v16 = vld [vmem:[#allocation2 + $0x50] sm:$0xff] }
  0xfb   : > { %3369 = vmatpush1.bf16.msra.mxu1 %v8346_v25  ;;  %3343 = vmatprep.subr.bf16.mxu0 %v8275_v26  ;;  %v721_v22 = vld [vmem:[#allocation2 + $0xc28] sm:$0xff] }
  0xfc   : > { %3370 = vmatprep.subr.bf16.mxu1 %v8339_v27  ;;  %v653_v25 = vld [vmem:[#allocation2 + $0xa08] sm:$0xff]  ;;  %v8474_v27 = vcombine.low %v725_v11, %v729_v13  ;;  %v8467_v30 = vcombine.high %v717_v21, %v721_v22 }
  0xfd   : > { %v657_v26 = vld [vmem:[#allocation2 + $0xa28] sm:$0xff] }
  0xfe   : > { %3344 = vmatpush2.bf16.msra.mxu0 %v8274_v34  ;;  %v8403_v32 = vcombine.high %v653_v25, %v657_v26  ;;  %v394_v34 = vld [vmem:[#allocation2 + $0x1f0] sm:$0xff]  ;;  %v8402_v38 = vcombine.low %v653_v25, %v657_v26 }
  0xff   : > { %3371 = vmatpush1.bf16.msra.mxu1 %v8338_v35  ;;  %3399 = vmatprep.subr.bf16.mxu0 %v8523_v36  ;;  %v518_v35 = vld [vmem:[#allocation2 + $0x5d0] sm:$0xff]  ;;  %v8141_v39 = vcombine.high %v390_v33, %v394_v34 }
 0x100   : > { %3372 = vmatprep.subr.bf16.mxu1 %v8459_v37  ;;  %v522_v36 = vld [vmem:[#allocation2 + $0x5f0] sm:$0xff]  ;;  %v8466_v37 = vcombine.low %v717_v21, %v721_v22  ;;  %v782_v21 = vlaneseq }
 0x101   : > { %3346 = vmatmul.mubr.bf16.vlgmr.msra.gmra.mxu0 %v9345_v15  ;;  %v8442_v15 = vcombine.low %v693_v48, %v697_v49  ;;  %v8269_v40 = vcombine.high %v518_v35, %v522_v36  ;;  %v8268_v46 = vcombine.low %v518_v35, %v522_v36  ;;  %v374_v49 = vld [vmem:[#allocation2 + $0x150] sm:$0xff] }
 0x102   : > { %3400 = vmatpush1.bf16.msra.mxu0 %v8522_v42  ;;  %3431 = vmatprep.mubr.bf16.mxu0 %v9221_v31  ;;  %v386_v42 = vld [vmem:[#allocation2 + $0x1b0] sm:$0xff] }
 0x103   : > { %3373 = vmatpush2.bf16.msra.mxu1 %v8458_v43  ;;  %3401 = vmatprep.subr.bf16.mxu0 %v8515_v44  ;;  %v510_v43 = vld [vmem:[#allocation2 + $0x590] sm:$0xff]  ;;  %v8133_v47 = vcombine.high %v382_v41, %v386_v42 }
 0x104   : > { %3374 = vmatprep.subr.bf16.mxu1 %v8451_v45  ;;  %v514_v44 = vld [vmem:[#allocation2 + $0x5b0] sm:$0xff]  ;;  %v8140_v45 = vcombine.low %v390_v33, %v394_v34  ;;  %v9378_v34 = vshrl.u32 %v782_v21, 7 }
 0x105   : > { %v8261_v48 = vcombine.high %v510_v43, %v514_v44  ;;  %v8260_v52 = vcombine.low %v510_v43, %v514_v44  ;;  %v554_v21 = vld [vmem:[#allocation2 + $0x6f0] sm:$0xff] }
 0x106   : > { %3402 = vmatpush1.bf16.msra.mxu0 %v8514_v50  ;;  %v378_v50 = vld [vmem:[#allocation2 + $0x170] sm:$0xff]  ;;  %v784_v43 = vsub.s32 0, %v9378_v34 }
 0x107   : > { %3375 = vmatpush2.bf16.msra.mxu1 %v8450_v56  ;;  %3403 = vmatprep.subr.bf16.mxu0 %v8507_v51  ;;  %v502_v56 = vld [vmem:[#allocation2 + $0x550] sm:$0xff]  ;;  %v8125_v53 = vcombine.high %v374_v49, %v378_v50 }
 0x108   : > { %3376 = vmatprep.subr.bf16.mxu1 %v8443_v59  ;;  %v506_v51 = vld [vmem:[#allocation2 + $0x570] sm:$0xff]  ;;  %v8132_v59 = vcombine.low %v382_v41, %v386_v42 }
 0x109   : > { %v8253_v12 = vcombine.high %v502_v56, %v506_v51  ;;  %v8252_v60 = vcombine.low %v502_v56, %v506_v51  ;;  %v586_v41 = vld [vmem:[#allocation2 + $0x7f0] sm:$0xff] }
 0x10a   : > { %3404 = vmatpush1.bf16.msra.mxu0 %v8506_v55  ;;  %v370_v55 = vld [vmem:[#allocation2 + $0x130] sm:$0xff] }
 0x10b   : > { %3377 = vmatpush2.bf16.msra.mxu1 %v8442_v15  ;;  %3405 = vmatprep.subr.bf16.mxu0 %v8499_v57  ;;  %v9371_v15 = vld [vmem:[%s9331_s23 + $0x4] ss:$28 sps:$4 sm:$0xff]   ;;  %v498_v57 = vld [vmem:[#allocation2 + $0x530] sm:$0xff]  ;;  %v8117_v61 = vcombine.high %v366_v54, %v370_v55 }
 0x10c   : > { %3378 = vmatprep.subr.bf16.mxu1 %v8435_v58  ;;  %v9375_v58 = vld [vmem:[%s9331_s23 + $0xc] ss:$28 sps:$4 sm:$0xff]   ;;  %v578_v56 = vld [vmem:[#allocation2 + $0x7b0] sm:$0xff] }
 0x10e   : > { %3406 = vmatpush1.bf16.msra.mxu0 %v8498_v63  ;;  %v362_v63 = vld [vmem:[#allocation2 + $0xf0] sm:$0xff] }
 0x10f   : > { %3379 = vmatpush2.bf16.msra.mxu1 %v8434_v0  ;;  %3407 = vmatprep.subr.bf16.mxu0 %v8491_v1  ;;  %v486_v0 = vld [vmem:[#allocation2 + $0x4d0] sm:$0xff]  ;;  %v8109_v4 = vcombine.high %v358_v24, %v362_v63 }
 0x110   : > { %3380 = vmatprep.subr.bf16.mxu1 %v8427_v2  ;;  %v490_v1 = vld [vmem:[#allocation2 + $0x4f0] sm:$0xff]  ;;  %v8116_v2 = vcombine.low %v366_v54, %v370_v55 }
 0x111   : > { %v8237_v5 = vcombine.high %v486_v0, %v490_v1  ;;  %v8236_v11 = vcombine.low %v486_v0, %v490_v1  ;;  %v438_v54 = vld [vmem:[#allocation2 + $0x350] sm:$0xff] }
 0x112   : > { %3408 = vmatpush1.bf16.msra.mxu0 %v8490_v7  ;;  %v354_v7 = vld [vmem:[#allocation2 + $0xb0] sm:$0xff] }
 0x113   : > { %3381 = vmatpush2.bf16.msra.mxu1 %v8426_v8  ;;  %3409 = vmatprep.subr.bf16.mxu0 %v8483_v9  ;;  %v478_v8 = vld [vmem:[#allocation2 + $0x490] sm:$0xff]  ;;  %v8101_v13 = vcombine.high %v350_v6, %v354_v7 }
 0x114   : > { %3382 = vmatprep.subr.bf16.mxu1 %v8419_v10  ;;  %v482_v9 = vld [vmem:[#allocation2 + $0x4b0] sm:$0xff]  ;;  %v8108_v10 = vcombine.low %v358_v24, %v362_v63 }
 0x115   : > { %v8229_v14 = vcombine.high %v478_v8, %v482_v9  ;;  %v8228_v22 = vcombine.low %v478_v8, %v482_v9  ;;  %v442_v55 = vld [vmem:[#allocation2 + $0x370] sm:$0xff] }
 0x116   : > { %3410 = vmatpush1.bf16.msra.mxu0 %v8482_v17  ;;  %v346_v17 = vld [vmem:[#allocation2 + $0x70] sm:$0xff]  ;;  %v8189_v0 = vcombine.high %v438_v54, %v442_v55 }
 0x117   : > { %3383 = vmatpush2.bf16.msra.mxu1 %v8418_v18  ;;  %3411 = vmatprep.subr.bf16.mxu0 %v8475_v19  ;;  %v470_v18 = vld [vmem:[#allocation2 + $0x450] sm:$0xff]  ;;  %v8093_v25 = vcombine.high %v342_v16, %v346_v17  ;;  %v8092_v33 = vcombine.low %v342_v16, %v346_v17 }
 0x118   : > { %3384 = vmatprep.subr.bf16.mxu1 %v8411_v20  ;;  %v474_v19 = vld [vmem:[#allocation2 + $0x470] sm:$0xff]  ;;  %v8100_v20 = vcombine.low %v350_v6, %v354_v7 }
 0x119   : > { %v8221_v26 = vcombine.high %v470_v18, %v474_v19  ;;  %v8220_v35 = vcombine.low %v470_v18, %v474_v19  ;;  %v558_v7 = vld [vmem:[#allocation2 + $0x710] sm:$0xff] }
 0x11a   : > { %3412 = vmatpush1.bf16.msra.mxu0 %v8474_v27  ;;  %v334_v27 = vld [vmem:[#allocation2 + $0x10] sm:$0xff] }
 0x11b   : > { %3385 = vmatpush2.bf16.msra.mxu1 %v8410_v29  ;;  %3413 = vmatprep.subr.bf16.mxu0 %v8467_v30  ;;  %v338_v29 = vld [vmem:[#allocation2 + $0x30] sm:$0xff] }
 0x11c   : > { %3386 = vmatprep.subr.bf16.mxu1 %v8403_v32  ;;  %v462_v30 = vld [vmem:[#allocation2 + $0x410] sm:$0xff]  ;;  %v8085_v36 = vcombine.high %v334_v27, %v338_v29  ;;  %v8084_v42 = vcombine.low %v334_v27, %v338_v29 }
 0x11d   : > { %v466_v32 = vld [vmem:[#allocation2 + $0x430] sm:$0xff] }
 0x11e   : > { %3414 = vmatpush1.bf16.msra.mxu0 %v8466_v37  ;;  %v8213_v37 = vcombine.high %v462_v30, %v466_v32  ;;  %v8212_v44 = vcombine.low %v462_v30, %v466_v32  ;;  %v562_v8 = vld [vmem:[#allocation2 + $0x730] sm:$0xff] }
 0x11f   : > { %3387 = vmatpush2.bf16.msra.mxu1 %v8402_v38  ;;  %3442 = vmatprep.subr.bf16.mxu0 %v8141_v39  ;;  %v454_v38 = vld [vmem:[#allocation2 + $0x3d0] sm:$0xff]  ;;  %v8309_v17 = vcombine.high %v558_v7, %v562_v8 }
 0x120   : > { %3485 = vmatprep.subr.bf16.mxu1 %v8269_v40  ;;  %v458_v39 = vld [vmem:[#allocation2 + $0x3f0] sm:$0xff] }
 0x121   : > { %3432 = vmatmul.mubr.bf16.vlgmr.msra.gmra.mxu0 %v9355_v23  ;;  %v494_v23 = vld [vmem:[#allocation2 + $0x510] sm:$0xff] }
 0x122   : > { %3389 = vmatmul.mubr.bf16.vlgmr.msra.gmra.mxu1 %v9360_v28  ;;  %3443 = vmatpush1.bf16.msra.mxu0 %v8140_v45  ;;  %v8124_v28 = vcombine.low %v374_v49, %v378_v50  ;;  %v8245_v62 = vcombine.high %v494_v23, %v498_v57  ;;  %v8244_v3 = vcombine.low %v494_v23, %v498_v57  ;;  %v582_v40 = vld [vmem:[#allocation2 + $0x7d0] sm:$0xff]  ;;  %v9381_v45 = vld [vmem:[#allocation4] sm:$0xff] }
 0x123   : > { %3486 = vmatpush1.bf16.msra.mxu1 %v8268_v46  ;;  %3444 = vmatprep.subr.bf16.mxu0 %v8133_v47  ;;  %v8205_v46 = vcombine.high %v454_v38, %v458_v39  ;;  %v8333_v47 = vcombine.high %v582_v40, %v586_v41  ;;  %v450_v49 = vld [vmem:[#allocation2 + $0x3b0] sm:$0xff]  ;;  %v785_v51 = vrot.slane %v9381_v45, %v784_v43 }
 0x124   : > { %3487 = vmatprep.subr.bf16.mxu1 %v8261_v48  ;;  %3474 = vmatprep.mubr.bf16.mxu0 %v9371_v15  ;;  %v446_v48 = vld [vmem:[#allocation2 + $0x390] sm:$0xff] }
 0x125   : > { %3517 = vmatprep.mubr.bf16.mxu1 %v9375_v58  ;;  %v574_v50 = vld [vmem:[#allocation2 + $0x790] sm:$0xff] }
 0x126   : > { %3445 = vmatpush1.bf16.msra.mxu0 %v8132_v59  ;;  %v8204_v59 = vcombine.low %v454_v38, %v458_v39  ;;  %v566_v57 = vld [vmem:[#allocation2 + $0x750] sm:$0xff]  ;;  %v8324_v63 = vcombine.low %v574_v50, %v578_v56 }
 0x127   : > { %3488 = vmatpush1.bf16.msra.mxu1 %v8260_v52  ;;  %3446 = vmatprep.subr.bf16.mxu0 %v8125_v53  ;;  %v8332_v52 = vcombine.low %v582_v40, %v586_v41  ;;  %v8197_v53 = vcombine.high %v446_v48, %v450_v49  ;;  %v422_v18 = vld [vmem:[#allocation2 + $0x2d0] sm:$0xff] }
 0x128   : > { %3489 = vmatprep.subr.bf16.mxu1 %v8253_v12  ;;  %v8325_v12 = vcombine.high %v574_v50, %v578_v56  ;;  %v426_v19 = vld [vmem:[#allocation2 + $0x2f0] sm:$0xff] }
 0x129   : > { %v414_v29 = vld [vmem:[#allocation2 + $0x290] sm:$0xff] }
 0x12a   : > { %3447 = vmatpush1.bf16.msra.mxu0 %v8124_v28  ;;  %v570_v28 = vld [vmem:[#allocation2 + $0x770] sm:$0xff] }
 0x12b   : > { %3490 = vmatpush1.bf16.msra.mxu1 %v8252_v60  ;;  %3448 = vmatprep.subr.bf16.mxu0 %v8117_v61  ;;  %v418_v30 = vld [vmem:[#allocation2 + $0x2b0] sm:$0xff] }
 0x12c   : > { %3491 = vmatprep.subr.bf16.mxu1 %v8245_v62  ;;  %v8196_v62 = vcombine.low %v446_v48, %v450_v49  ;;  %v542_v32 = vld [vmem:[#allocation2 + $0x690] sm:$0xff]  ;;  %v8164_v43 = vcombine.low %v414_v29, %v418_v30 }
 0x12d   : > { %v406_v39 = vld [vmem:[#allocation2 + $0x250] sm:$0xff] }
 0x12e   : > { %3449 = vmatpush1.bf16.msra.mxu0 %v8116_v2  ;;  %v410_v40 = vld [vmem:[#allocation2 + $0x270] sm:$0xff] }
 0x12f   : > { %3492 = vmatpush1.bf16.msra.mxu1 %v8244_v3  ;;  %3450 = vmatprep.subr.bf16.mxu0 %v8109_v4  ;;  %v8317_v3 = vcombine.high %v566_v57, %v570_v28  ;;  %v430_v4 = vld [vmem:[#allocation2 + $0x310] sm:$0xff] }
 0x130   : > { %3493 = vmatprep.subr.bf16.mxu1 %v8237_v5  ;;  %v434_v5 = vld [vmem:[#allocation2 + $0x330] sm:$0xff] }
 0x131   : > { %v534_v41 = vld [vmem:[#allocation2 + $0x650] sm:$0xff] }
 0x132   : > { %3451 = vmatpush1.bf16.msra.mxu0 %v8108_v10  ;;  %v8188_v10 = vcombine.low %v438_v54, %v442_v55  ;;  %v398_v48 = vld [vmem:[#allocation2 + $0x210] sm:$0xff] }
 0x133   : > { %3494 = vmatpush1.bf16.msra.mxu1 %v8236_v11  ;;  %3452 = vmatprep.subr.bf16.mxu0 %v8101_v13  ;;  %v8316_v13 = vcombine.low %v566_v57, %v570_v28  ;;  %v402_v49 = vld [vmem:[#allocation2 + $0x230] sm:$0xff] }
 0x134   : > { %3495 = vmatprep.subr.bf16.mxu1 %v8229_v14  ;;  %v8181_v14 = vcombine.high %v430_v4, %v434_v5  ;;  %v526_v50 = vld [vmem:[#allocation2 + $0x610] sm:$0xff]  ;;  %v8148_v57 = vcombine.low %v398_v48, %v402_v49 }
 0x135   : > { %v530_v56 = vld [vmem:[#allocation2 + $0x630] sm:$0xff] }
 0x136   : > { %3453 = vmatpush1.bf16.msra.mxu0 %v8100_v20  ;;  %v550_v20 = vld [vmem:[#allocation2 + $0x6d0] sm:$0xff]  ;;  %v8276_v28 = vcombine.low %v526_v50, %v530_v56 }
 0x137   : > { %3496 = vmatpush1.bf16.msra.mxu1 %v8228_v22  ;;  %3454 = vmatprep.subr.bf16.mxu0 %v8093_v25  ;;  %v8180_v22 = vcombine.low %v430_v4, %v434_v5  ;;  %v8308_v25 = vcombine.low %v558_v7, %v562_v8  ;;  %v8301_v27 = vcombine.high %v550_v20, %v554_v21  ;;  %v650_v54 = vld [vmem:[#allocation2 + $0x9f0] sm:$0xff] }
 0x138   : > { %3497 = vmatprep.subr.bf16.mxu1 %v8221_v26  ;;  %v8173_v26 = vcombine.high %v422_v18, %v426_v19  ;;  %v774_v55 = vld [vmem:[#allocation2 + $0xdd0] sm:$0xff] }
 0x139   : > { %v630_v8 = vld [vmem:[#allocation2 + $0x950] sm:$0xff] }
 0x13a   : > { %3455 = vmatpush1.bf16.msra.mxu0 %v8092_v33  ;;  %v546_v33 = vld [vmem:[#allocation2 + $0x6b0] sm:$0xff] }
 0x13b   : > { %3498 = vmatpush1.bf16.msra.mxu1 %v8220_v35  ;;  %3456 = vmatprep.subr.bf16.mxu0 %v8085_v36  ;;  %v8172_v35 = vcombine.low %v422_v18, %v426_v19  ;;  %v8300_v36 = vcombine.low %v550_v20, %v554_v21  ;;  %v8293_v38 = vcombine.high %v542_v32, %v546_v33  ;;  %v622_v21 = vld [vmem:[#allocation2 + $0x910] sm:$0xff] }
 0x13c   : > { %3499 = vmatprep.subr.bf16.mxu1 %v8213_v37  ;;  %v8165_v37 = vcombine.high %v414_v29, %v418_v30 }
 0x13e   : > { %3457 = vmatpush1.bf16.msra.mxu0 %v8084_v42  ;;  %v538_v42 = vld [vmem:[#allocation2 + $0x670] sm:$0xff] }
 0x13f   : > { %3500 = vmatpush1.bf16.msra.mxu1 %v8212_v44  ;;  %3458 = vmatprep.subr.bf16.mxu0 %v8205_v46  ;;  %v8292_v44 = vcombine.low %v542_v32, %v546_v33  ;;  %v8157_v46 = vcombine.high %v406_v39, %v410_v40 }
 0x140   : > { %3501 = vmatprep.subr.bf16.mxu1 %v8333_v47  ;;  %v8285_v47 = vcombine.high %v534_v41, %v538_v42 }
 0x141   : > { %v3132_v23 = vpop.f32.mrf.mxu0  ;;  %v3175_v61 = vpop.f32.mrf.mxu1 }
 0x142   : > { %v3133_v60 = vadd.f32 %v3132_v23, %v785_v51  ;;  %3459 = vmatpush2.bf16.msra.mxu0 %v8204_v59  ;;  %v8284_v59 = vcombine.low %v534_v41, %v538_v42  ;;  %v778_v23 = vld [vmem:[#allocation2 + $0xdf0] sm:$0xff] }
 0x143   : > { %3502 = vmatpush2.bf16.msra.mxu1 %v8332_v52  ;;  %v9384_v24 = vpop.f32.mrf.mxu0  ;;  %3460 = vmatprep.subr.bf16.mxu0 %v8197_v53  ;;  %v9388_v2 = vpop.f32.mrf.mxu1  ;;  %v8149_v52 = vcombine.high %v398_v48, %v402_v49  ;;  %v8277_v53 = vcombine.high %v526_v50, %v530_v56  ;;  %v8524_v5 = vcombine.low %v774_v55, %v778_v23 }
 0x144   : > { %v9386_v1 = vadd.f32 %v3175_v61, %v3133_v60  ;;  %3503 = vmatprep.subr.bf16.mxu1 %v8325_v12  ;;  %v646_v12 = vld [vmem:[#allocation2 + $0x9d0] sm:$0xff]  ;;  %v8525_v61 = vcombine.high %v774_v55, %v778_v23 }
 0x145   : > { %v3136_v6 = vpop.f32.mrf.mxu0  ;;  %v3179_v11 = vpop.f32.mrf.mxu1  ;;  %v8397_v60 = vcombine.high %v646_v12, %v650_v54  ;;  %v8396_v4 = vcombine.low %v646_v12, %v650_v54 }
 0x146   : > { %v3137_v9 = vadd.f32 %v3136_v6, %v785_v51  ;;  %3461 = vmatpush2.bf16.msra.mxu0 %v8196_v62  ;;  %v8156_v51 = vcombine.low %v406_v39, %v410_v40  ;;  %v638_v62 = vld [vmem:[#allocation2 + $0x990] sm:$0xff] }
 0x147   : > { %3504 = vmatpush2.bf16.msra.mxu1 %v8324_v63  ;;  %3462 = vmatprep.subr.bf16.mxu0 %v8189_v0  ;;  %v642_v63 = vld [vmem:[#allocation2 + $0x9b0] sm:$0xff] }
 0x148   : > { %v9390_v16 = vadd.f32 %v3179_v11, %v3137_v9  ;;  %3505 = vmatprep.subr.bf16.mxu1 %v8317_v3  ;;  %v766_v0 = vld [vmem:[#allocation2 + $0xd90] sm:$0xff]  ;;  %v8389_v6 = vcombine.high %v638_v62, %v642_v63 }
 0x149   : > { %v770_v3 = vld [vmem:[#allocation2 + $0xdb0] sm:$0xff] }
 0x14a   : > { %3463 = vmatpush2.bf16.msra.mxu0 %v8188_v10  ;;  %v8517_v7 = vcombine.high %v766_v0, %v770_v3  ;;  %v634_v9 = vld [vmem:[#allocation2 + $0x970] sm:$0xff]  ;;  %v9393_v10 = vld [vmem:[%s9331_s23] ss:$28 sps:$4 sm:$0xff]   ;;  %v8516_v18 = vcombine.low %v766_v0, %v770_v3 }
 0x14b   : > { %3506 = vmatpush2.bf16.msra.mxu1 %v8316_v13  ;;  %3464 = vmatprep.subr.bf16.mxu0 %v8181_v14  ;;  %v758_v11 = vld [vmem:[#allocation2 + $0xd50] sm:$0xff]  ;;  %v9397_v14 = vld [vmem:[%s9331_s23 + $0x8] ss:$28 sps:$4 sm:$0xff]   ;;  %v8381_v19 = vcombine.high %v630_v8, %v634_v9  ;;  %v8380_v29 = vcombine.low %v630_v8, %v634_v9 }
 0x14c   : > { %3507 = vmatprep.subr.bf16.mxu1 %v8309_v17  ;;  %v762_v13 = vld [vmem:[#allocation2 + $0xd70] sm:$0xff]  ;;  %v8388_v17 = vcombine.low %v638_v62, %v642_v63 }
 0x14d   : > { %v8509_v20 = vcombine.high %v758_v11, %v762_v13  ;;  %v8508_v30 = vcombine.low %v758_v11, %v762_v13 }
 0x14e   : > { %3465 = vmatpush2.bf16.msra.mxu0 %v8180_v22  ;;  %v626_v22 = vld [vmem:[#allocation2 + $0x930] sm:$0xff] }
 0x14f   : > { %3508 = vmatpush2.bf16.msra.mxu1 %v8308_v25  ;;  %3466 = vmatprep.subr.bf16.mxu0 %v8173_v26  ;;  %v750_v25 = vld [vmem:[#allocation2 + $0xd10] sm:$0xff]  ;;  %v8373_v32 = vcombine.high %v622_v21, %v626_v22  ;;  %v8372_v39 = vcombine.low %v622_v21, %v626_v22  ;;  %v387_v21 = vld [vmem:[#allocation2 + $0x1b8] sm:$0xff] }
 0x150   : > { %3509 = vmatprep.subr.bf16.mxu1 %v8301_v27  ;;  %v754_v26 = vld [vmem:[#allocation2 + $0xd30] sm:$0xff] }
 0x151   : > { %v9402_v27 = vld [vmem:[%s9331_s23 + $0x14] ss:$28 sps:$4 sm:$0xff]   ;;  %v8501_v33 = vcombine.high %v750_v25, %v754_v26  ;;  %v8500_v40 = vcombine.low %v750_v25, %v754_v26  ;;  %v9407_v25 = vpop.f32.mrf.mxu0 }
 0x152   : > { %3467 = vmatpush2.bf16.msra.mxu0 %v8172_v35  ;;  %v614_v35 = vld [vmem:[#allocation2 + $0x8d0] sm:$0xff] }
 0x153   : > { %3510 = vmatpush2.bf16.msra.mxu1 %v8300_v36  ;;  %3468 = vmatprep.subr.bf16.mxu0 %v8165_v37  ;;  %v618_v36 = vld [vmem:[#allocation2 + $0x8f0] sm:$0xff] }
 0x154   : > { %3511 = vmatprep.subr.bf16.mxu1 %v8293_v38  ;;  %v742_v37 = vld [vmem:[#allocation2 + $0xcd0] sm:$0xff]  ;;  %v8365_v41 = vcombine.high %v614_v35, %v618_v36  ;;  %v8364_v48 = vcombine.low %v614_v35, %v618_v36 }
 0x155   : > { %v746_v38 = vld [vmem:[#allocation2 + $0xcf0] sm:$0xff] }
 0x156   : > { %3469 = vmatpush2.bf16.msra.mxu0 %v8164_v43  ;;  %v8493_v42 = vcombine.high %v742_v37, %v746_v38  ;;  %v606_v43 = vld [vmem:[#allocation2 + $0x890] sm:$0xff]  ;;  %v8492_v49 = vcombine.low %v742_v37, %v746_v38  ;;  %v375_v37 = vld [vmem:[#allocation2 + $0x158] sm:$0xff] }
 0x157   : > { %3512 = vmatpush2.bf16.msra.mxu1 %v8292_v44  ;;  %3470 = vmatprep.subr.bf16.mxu0 %v8157_v46  ;;  %v610_v44 = vld [vmem:[#allocation2 + $0x8b0] sm:$0xff]  ;;  %v379_v38 = vld [vmem:[#allocation2 + $0x178] sm:$0xff] }
 0x158   : > { %3513 = vmatprep.subr.bf16.mxu1 %v8285_v47  ;;  %v734_v46 = vld [vmem:[#allocation2 + $0xc90] sm:$0xff]  ;;  %v8357_v50 = vcombine.high %v606_v43, %v610_v44  ;;  %v8356_v12 = vcombine.low %v606_v43, %v610_v44 }
 0x159   : > { %v738_v47 = vld [vmem:[#allocation2 + $0xcb0] sm:$0xff] }
 0x15a   : > { %3471 = vmatpush2.bf16.msra.mxu0 %v8156_v51  ;;  %v8485_v56 = vcombine.high %v734_v46, %v738_v47  ;;  %v598_v51 = vld [vmem:[#allocation2 + $0x850] sm:$0xff]  ;;  %v8484_v54 = vcombine.low %v734_v46, %v738_v47 }
 0x15b   : > { %3514 = vmatpush2.bf16.msra.mxu1 %v8284_v59  ;;  %3472 = vmatprep.subr.bf16.mxu0 %v8149_v52  ;;  %v602_v59 = vld [vmem:[#allocation2 + $0x870] sm:$0xff] }
 0x15c   : > { %3515 = vmatprep.subr.bf16.mxu1 %v8277_v53  ;;  %v726_v52 = vld [vmem:[#allocation2 + $0xc50] sm:$0xff]  ;;  %v8349_v55 = vcombine.high %v598_v51, %v602_v59  ;;  %v8348_v62 = vcombine.low %v598_v51, %v602_v59  ;;  %v371_v51 = vld [vmem:[#allocation2 + $0x138] sm:$0xff] }
 0x15d   : > { %v730_v53 = vld [vmem:[#allocation2 + $0xc70] sm:$0xff] }
 0x15e   : > { %3473 = vmatpush2.bf16.msra.mxu0 %v8148_v57  ;;  %v8477_v23 = vcombine.high %v726_v52, %v730_v53  ;;  %v590_v57 = vld [vmem:[#allocation2 + $0x810] sm:$0xff]  ;;  %v8476_v63 = vcombine.low %v726_v52, %v730_v53 }
 0x15f   : > { %3516 = vmatpush2.bf16.msra.mxu1 %v8276_v28  ;;  %3528 = vmatprep.subr.bf16.mxu0 %v8397_v60  ;;  %v594_v28 = vld [vmem:[#allocation2 + $0x830] sm:$0xff] }
 0x160   : > { %3571 = vmatprep.subr.bf16.mxu1 %v8525_v61  ;;  %v718_v60 = vld [vmem:[#allocation2 + $0xc10] sm:$0xff]  ;;  %v8341_v0 = vcombine.high %v590_v57, %v594_v28  ;;  %v8340_v8 = vcombine.low %v590_v57, %v594_v28 }
 0x161   : > { %3475 = vmatmul.mubr.bf16.vlgmr.msra.gmra.mxu0 %v9393_v10  ;;  %v722_v61 = vld [vmem:[#allocation2 + $0xc30] sm:$0xff] }
 0x162   : > { %3518 = vmatmul.mubr.bf16.vlgmr.msra.gmra.mxu1 %v9397_v14  ;;  %3529 = vmatpush1.bf16.msra.mxu0 %v8396_v4  ;;  %v8469_v3 = vcombine.high %v718_v60, %v722_v61  ;;  %v710_v4 = vld [vmem:[#allocation2 + $0xbd0] sm:$0xff]  ;;  %v8468_v9 = vcombine.low %v718_v60, %v722_v61  ;;  %v359_v61 = vld [vmem:[#allocation2 + $0xd8] sm:$0xff] }
 0x163   : > { %3572 = vmatpush1.bf16.msra.mxu1 %v8524_v5  ;;  %3530 = vmatprep.subr.bf16.mxu0 %v8389_v6  ;;  %v714_v5 = vld [vmem:[#allocation2 + $0xbf0] sm:$0xff]  ;;  %v391_v6 = vld [vmem:[#allocation2 + $0x1d8] sm:$0xff] }
 0x164   : > { %3573 = vmatprep.subr.bf16.mxu1 %v8517_v7  ;;  %3603 = vmatprep.mubr.bf16.mxu1 %v9221_v31  ;;  %v395_v7 = vld [vmem:[#allocation2 + $0x1f8] sm:$0xff]  ;;  %v8461_v11 = vcombine.high %v710_v4, %v714_v5  ;;  %v8460_v22 = vcombine.low %v710_v4, %v714_v5  ;;  %v698_v35 = vld [vmem:[#allocation2 + $0xb70] sm:$0xff] }
 0x165   : > { %3560 = vmatprep.mubr.bf16.mxu0 %v9402_v27  ;;  %v8143_v13 = vcombine.high %v391_v6, %v395_v7  ;;  %v678_v57 = vld [vmem:[#allocation2 + $0xad0] sm:$0xff] }
 0x166   : > { %3531 = vmatpush1.bf16.msra.mxu0 %v8388_v17  ;;  %v702_v17 = vld [vmem:[#allocation2 + $0xb90] sm:$0xff] }
 0x167   : > { %3574 = vmatpush1.bf16.msra.mxu1 %v8516_v18  ;;  %3532 = vmatprep.subr.bf16.mxu0 %v8381_v19  ;;  %v706_v18 = vld [vmem:[#allocation2 + $0xbb0] sm:$0xff]  ;;  %v9405_v19 = vpop.f32.mrf.mxu1 }
 0x168   : > { %3575 = vmatprep.subr.bf16.mxu1 %v8509_v20  ;;  %v383_v20 = vld [vmem:[#allocation2 + $0x198] sm:$0xff]  ;;  %v682_v28 = vld [vmem:[#allocation2 + $0xaf0] sm:$0xff] }
 0x169   : > { %v3261_v26 = vpop.f32.mrf.mxu1  ;;  %v8134_v44 = vcombine.low %v383_v20, %v387_v21  ;;  %v670_v5 = vld [vmem:[#allocation2 + $0xa90] sm:$0xff] }
 0x16a   : > { %3533 = vmatpush1.bf16.msra.mxu0 %v8380_v29  ;;  %v8142_v29 = vcombine.low %v391_v6, %v395_v7  ;;  %v674_v6 = vld [vmem:[#allocation2 + $0xab0] sm:$0xff] }
 0x16b   : > { %3576 = vmatpush1.bf16.msra.mxu1 %v8508_v30  ;;  %3534 = vmatprep.subr.bf16.mxu0 %v8373_v32  ;;  %v8453_v30 = vcombine.high %v702_v17, %v706_v18  ;;  %v8135_v32 = vcombine.high %v383_v20, %v387_v21  ;;  %v662_v21 = vld [vmem:[#allocation2 + $0xa50] sm:$0xff] }
 0x16c   : > { %3577 = vmatprep.subr.bf16.mxu1 %v8501_v33  ;;  %v694_v33 = vld [vmem:[#allocation2 + $0xb50] sm:$0xff] }
 0x16d   : > { %v8445_v46 = vcombine.high %v694_v33, %v698_v35  ;;  %v8444_v52 = vcombine.low %v694_v33, %v698_v35 }
 0x16e   : > { %3535 = vmatpush1.bf16.msra.mxu0 %v8372_v39 }
 0x16f   : > { %3578 = vmatpush1.bf16.msra.mxu1 %v8500_v40  ;;  %3536 = vmatprep.subr.bf16.mxu0 %v8365_v41  ;;  %v9411_v40 = vld [vmem:[%s9331_s23 + $0x18] ss:$28 sps:$4 sm:$0xff]   ;;  %v8452_v41 = vcombine.low %v702_v17, %v706_v18  ;;  %v8421_v18 = vcombine.high %v670_v5, %v674_v6 }
 0x170   : > { %3579 = vmatprep.subr.bf16.mxu1 %v8493_v42  ;;  %v9414_v42 = vpop.f32.mrf.mxu1 }
 0x172   : > { %3537 = vmatpush1.bf16.msra.mxu0 %v8364_v48  ;;  %v8127_v48 = vcombine.high %v375_v37, %v379_v38  ;;  %v3265_v53 = vpop.f32.mrf.mxu1 }
 0x173   : > { %3580 = vmatpush1.bf16.msra.mxu1 %v8492_v49  ;;  %3538 = vmatprep.subr.bf16.mxu0 %v8357_v50  ;;  %v686_v49 = vld [vmem:[#allocation2 + $0xb10] sm:$0xff] }
 0x174   : > { %3581 = vmatprep.subr.bf16.mxu1 %v8485_v56  ;;  %v690_v50 = vld [vmem:[#allocation2 + $0xb30] sm:$0xff]  ;;  %v367_v56 = vld [vmem:[#allocation2 + $0x118] sm:$0xff] }
 0x176   : > { %3539 = vmatpush1.bf16.msra.mxu0 %v8356_v12  ;;  %v8126_v12 = vcombine.low %v375_v37, %v379_v38  ;;  %v658_v37 = vld [vmem:[#allocation2 + $0xa30] sm:$0xff]  ;;  %v335_v38 = vld [vmem:[#allocation2 + $0x18] sm:$0xff] }
 0x177   : > { %3582 = vmatpush1.bf16.msra.mxu1 %v8484_v54  ;;  %3540 = vmatprep.subr.bf16.mxu0 %v8349_v55  ;;  %v8437_v54 = vcombine.high %v686_v49, %v690_v50 }
 0x178   : > { %3583 = vmatprep.subr.bf16.mxu1 %v8477_v23  ;;  %v8119_v23 = vcombine.high %v367_v56, %v371_v51 }
 0x17a   : > { %3541 = vmatpush1.bf16.msra.mxu0 %v8348_v62 }
 0x17b   : > { %3584 = vmatpush1.bf16.msra.mxu1 %v8476_v63  ;;  %3542 = vmatprep.subr.bf16.mxu0 %v8341_v0  ;;  %v8118_v63 = vcombine.low %v367_v56, %v371_v51  ;;  %v8429_v0 = vcombine.high %v678_v57, %v682_v28 }
 0x17c   : > { %3585 = vmatprep.subr.bf16.mxu1 %v8469_v3 }
 0x17e   : > { %3543 = vmatpush1.bf16.msra.mxu0 %v8340_v8  ;;  %v351_v8 = vld [vmem:[#allocation2 + $0x98] sm:$0xff] }
 0x17f   : > { %3586 = vmatpush1.bf16.msra.mxu1 %v8468_v9  ;;  %3544 = vmatprep.subr.bf16.mxu0 %v8461_v11  ;;  %v355_v9 = vld [vmem:[#allocation2 + $0xb8] sm:$0xff]  ;;  %v8428_v11 = vcombine.low %v678_v57, %v682_v28 }
 0x180   : > { %3614 = vmatprep.subr.bf16.mxu1 %v8143_v13  ;;  %v8103_v20 = vcombine.high %v351_v8, %v355_v9 }
 0x181   : > { %v3218_v36 = vpop.f32.mrf.mxu0 }
 0x182   : > { %v3219_v39 = vadd.f32 %v3218_v36, %v9386_v1  ;;  %3604 = vmatmul.mubr.bf16.vlgmr.msra.gmra.mxu1 %v9411_v40  ;;  %3545 = vmatpush2.bf16.msra.mxu0 %v8460_v22  ;;  %v666_v22 = vld [vmem:[#allocation2 + $0xa70] sm:$0xff] }
 0x183   : > { %3615 = vmatpush1.bf16.msra.mxu1 %v8142_v29  ;;  %v9416_v43 = vpop.f32.mrf.mxu0  ;;  %3546 = vmatprep.subr.bf16.mxu0 %v8453_v30  ;;  %v347_v29 = vld [vmem:[#allocation2 + $0x78] sm:$0xff]  ;;  %v8420_v30 = vcombine.low %v670_v5, %v674_v6  ;;  %v8413_v33 = vcombine.high %v662_v21, %v666_v22  ;;  %v654_v36 = vld [vmem:[#allocation2 + $0xa10] sm:$0xff] }
 0x184   : > { %v3262_v47 = vadd.f32 %v3261_v26, %v3219_v39  ;;  %3616 = vmatprep.subr.bf16.mxu1 %v8135_v32  ;;  %3646 = vmatprep.mubr.bf16.mxu1 %v9371_v15  ;;  %v363_v15 = vld [vmem:[#allocation2 + $0xf8] sm:$0xff]  ;;  %v8102_v32 = vcombine.low %v351_v8, %v355_v9  ;;  %v8404_v56 = vcombine.low %v654_v36, %v658_v37 }
 0x185   : > { %v3222_v1 = vpop.f32.mrf.mxu0  ;;  %v8111_v4 = vcombine.high %v359_v61, %v363_v15  ;;  %v8110_v17 = vcombine.low %v359_v61, %v363_v15  ;;  %v343_v26 = vld [vmem:[#allocation2 + $0x58] sm:$0xff] }
 0x186   : > { %v3223_v59 = vadd.f32 %v3222_v1, %v9390_v16  ;;  %3547 = vmatpush2.bf16.msra.mxu0 %v8452_v41  ;;  %v3802_v60 = vmul.f32 0.2, %v3262_v47  ;;  %vm3786_vm0 = vcmp.gt.f32.partialorder %v3262_v47, 0.0  ;;  %v8436_v16 = vcombine.low %v686_v49, %v690_v50  ;;  %v339_v39 = vld [vmem:[#allocation2 + $0x38] sm:$0xff] }
 0x187   : > { %3617 = vmatpush1.bf16.msra.mxu1 %v8134_v44  ;;  %3548 = vmatprep.subr.bf16.mxu0 %v8445_v46  ;;  %v8095_v35 = vcombine.high %v343_v26, %v347_v29  ;;  %v8412_v41 = vcombine.low %v662_v21, %v666_v22  ;;  %v8094_v44 = vcombine.low %v343_v26, %v347_v29  ;;  %v523_v49 = vld [vmem:[#allocation2 + $0x5f8] sm:$0xff] }
 0x188   : > { %v3266_v55 = vadd.f32 %v3265_v53, %v3223_v59  ;;  %3618 = vmatprep.subr.bf16.mxu1 %v8127_v48  ;;  %v3818_v7 = vsel %vm3786_vm0, %v3262_v47, %v3802_v60  ;;  %v8405_v46 = vcombine.high %v654_v36, %v658_v37  ;;  %v8087_v47 = vcombine.high %v335_v38, %v339_v39  ;;  %v519_v48 = vld [vmem:[#allocation2 + $0x5d8] sm:$0xff] }
 0x189   : > { %v455_v50 = vld [vmem:[#allocation2 + $0x3d8] sm:$0xff]  ;;  %v8086_v51 = vcombine.low %v335_v38, %v339_v39  ;;  %v8271_v59 = vcombine.high %v519_v48, %v523_v49 }
 0x18a   : > { %vm3794_vm1 = vcmp.gt.f32.partialorder %v3266_v55, 0.0  ;;  %v3810_v62 = vmul.f32 0.2, %v3266_v55  ;;  %3549 = vmatpush2.bf16.msra.mxu0 %v8444_v52  ;;  %v459_v1 = vld [vmem:[#allocation2 + $0x3f8] sm:$0xff] }
 0x18b   : > { %3619 = vmatpush1.bf16.msra.mxu1 %v8126_v12  ;;  %3550 = vmatprep.subr.bf16.mxu0 %v8437_v54  ;;  %v8207_v52 = vcombine.high %v455_v50, %v459_v1  ;;  %v511_v53 = vld [vmem:[#allocation2 + $0x598] sm:$0xff]  ;;  %v8206_v57 = vcombine.low %v455_v50, %v459_v1 }
 0x18c   : > { %v3826_v3 = vsel %vm3794_vm1, %v3266_v55, %v3810_v62  ;;  %3620 = vmatprep.subr.bf16.mxu1 %v8119_v23  ;;  %v515_v12 = vld [vmem:[#allocation2 + $0x5b8] sm:$0xff]  ;;  %v8270_v23 = vcombine.low %v519_v48, %v523_v49  ;;  %v9423_v62 = vld [vmem:[%s9331_s23 + $0x10] ss:$28 sps:$4 sm:$0xff]  }
 0x18d   : > { %v9420_v13 = vpack.c.bf16 %v3826_v3, %v3818_v7  ;;  %v447_v54 = vld [vmem:[#allocation2 + $0x398] sm:$0xff]  ;;  %v8263_v28 = vcombine.high %v511_v53, %v515_v12 }
 0x18e   : > { %3551 = vmatpush2.bf16.msra.mxu0 %v8436_v16  ;;  %v451_v55 = vld [vmem:[#allocation2 + $0x3b8] sm:$0xff] }
 0x18f   : > { %3621 = vmatpush1.bf16.msra.mxu1 %v8118_v63  ;;  %3552 = vmatprep.subr.bf16.mxu0 %v8429_v0  ;;  %v8199_v60 = vcombine.high %v447_v54, %v451_v55  ;;  %v503_v61 = vld [vmem:[#allocation2 + $0x558] sm:$0xff]  ;;  %v8262_v0 = vcombine.low %v511_v53, %v515_v12  ;;  %v8198_v3 = vcombine.low %v447_v54, %v451_v55 }
 0x190   : > { %3622 = vmatprep.subr.bf16.mxu1 %v8111_v4  ;;  %v507_v15 = vld [vmem:[#allocation2 + $0x578] sm:$0xff] }
 0x191   : > { %v439_v16 = vld [vmem:[#allocation2 + $0x358] sm:$0xff]  ;;  %v8255_v4 = vcombine.high %v503_v61, %v507_v15 }
 0x192   : > { %3553 = vmatpush2.bf16.msra.mxu0 %v8428_v11  ;;  %v443_v63 = vld [vmem:[#allocation2 + $0x378] sm:$0xff]  ;;  %v8254_v11 = vcombine.low %v503_v61, %v507_v15 }
 0x193   : > { %3623 = vmatpush1.bf16.msra.mxu1 %v8110_v17  ;;  %3554 = vmatprep.subr.bf16.mxu0 %v8421_v18  ;;  %v8191_v5 = vcombine.high %v439_v16, %v443_v63  ;;  %v495_v6 = vld [vmem:[#allocation2 + $0x518] sm:$0xff]  ;;  %v8190_v17 = vcombine.low %v439_v16, %v443_v63 }
 0x194   : > { %3624 = vmatprep.subr.bf16.mxu1 %v8103_v20  ;;  %v499_v7 = vld [vmem:[#allocation2 + $0x538] sm:$0xff] }
 0x195   : > { %v431_v8 = vld [vmem:[#allocation2 + $0x318] sm:$0xff]  ;;  %v8247_v18 = vcombine.high %v495_v6, %v499_v7  ;;  %v8246_v29 = vcombine.low %v495_v6, %v499_v7 }
 0x196   : > { %3555 = vmatpush2.bf16.msra.mxu0 %v8420_v30  ;;  %v435_v9 = vld [vmem:[#allocation2 + $0x338] sm:$0xff] }
 0x197   : > { %3625 = vmatpush1.bf16.msra.mxu1 %v8102_v32  ;;  %3556 = vmatprep.subr.bf16.mxu0 %v8413_v33  ;;  %v8183_v20 = vcombine.high %v431_v8, %v435_v9  ;;  %v487_v21 = vld [vmem:[#allocation2 + $0x4d8] sm:$0xff]  ;;  %v8182_v30 = vcombine.low %v431_v8, %v435_v9 }
 0x198   : > { %3626 = vmatprep.subr.bf16.mxu1 %v8095_v35  ;;  %v423_v22 = vld [vmem:[#allocation2 + $0x2d8] sm:$0xff] }
 0x199   : > { %v427_v26 = vld [vmem:[#allocation2 + $0x2f8] sm:$0xff] }
 0x19a   : > { %3557 = vmatpush2.bf16.msra.mxu0 %v8412_v41  ;;  %v8175_v33 = vcombine.high %v423_v22, %v427_v26  ;;  %v479_v35 = vld [vmem:[#allocation2 + $0x498] sm:$0xff]  ;;  %v8174_v41 = vcombine.low %v423_v22, %v427_v26 }
 0x19b   : > { %3627 = vmatpush1.bf16.msra.mxu1 %v8094_v44  ;;  %3558 = vmatprep.subr.bf16.mxu0 %v8405_v46  ;;  %v483_v36 = vld [vmem:[#allocation2 + $0x4b8] sm:$0xff] }
 0x19c   : > { %3628 = vmatprep.subr.bf16.mxu1 %v8087_v47  ;;  %v415_v37 = vld [vmem:[#allocation2 + $0x298] sm:$0xff]  ;;  %v8231_v44 = vcombine.high %v479_v35, %v483_v36  ;;  %v8230_v1 = vcombine.low %v479_v35, %v483_v36 }
 0x19d   : > { %v419_v38 = vld [vmem:[#allocation2 + $0x2b8] sm:$0xff] }
 0x19e   : > { %3559 = vmatpush2.bf16.msra.mxu0 %v8404_v56  ;;  %v8167_v46 = vcombine.high %v415_v37, %v419_v38  ;;  %v471_v47 = vld [vmem:[#allocation2 + $0x458] sm:$0xff]  ;;  %v8166_v56 = vcombine.low %v415_v37, %v419_v38 }
 0x19f   : > { %3629 = vmatpush1.bf16.msra.mxu1 %v8086_v51  ;;  %3657 = vmatprep.subr.bf16.mxu0 %v8271_v59  ;;  %v475_v48 = vld [vmem:[#allocation2 + $0x478] sm:$0xff] }
 0x1a0   : > { %3630 = vmatprep.subr.bf16.mxu1 %v8207_v52  ;;  %v407_v49 = vld [vmem:[#allocation2 + $0x258] sm:$0xff]  ;;  %v8223_v51 = vcombine.high %v471_v47, %v475_v48  ;;  %v8222_v55 = vcombine.low %v471_v47, %v475_v48 }
 0x1a1   : > { %3561 = vmatmul.mubr.bf16.vlgmr.msra.gmra.mxu0 %v9423_v62  ;;  %v411_v50 = vld [vmem:[#allocation2 + $0x278] sm:$0xff] }
 0x1a2   : > { %3658 = vmatpush1.bf16.msra.mxu0 %v8270_v23  ;;  %3689 = vmatprep.mubr.bf16.mxu0 %v9375_v58  ;;  %v491_v58 = vld [vmem:[#allocation2 + $0x4f8] sm:$0xff]  ;;  %v8159_v59 = vcombine.high %v407_v49, %v411_v50  ;;  %v9427_v23 = vpop.f32.mrf.mxu1 }
 0x1a3   : > { %3631 = vmatpush2.bf16.msra.mxu1 %v8206_v57  ;;  %3659 = vmatprep.subr.bf16.mxu0 %v8263_v28  ;;  %v8239_v32 = vcombine.high %v487_v21, %v491_v58  ;;  %v8238_v39 = vcombine.low %v487_v21, %v491_v58  ;;  %v463_v52 = vld [vmem:[#allocation2 + $0x418] sm:$0xff]  ;;  %v8158_v57 = vcombine.low %v407_v49, %v411_v50  ;;  %v9433_v58 = vpop.f32.mrf.mxu0 }
 0x1a4   : > { %3632 = vmatprep.subr.bf16.mxu1 %v8199_v60  ;;  %v467_v53 = vld [vmem:[#allocation2 + $0x438] sm:$0xff]  ;;  %v792_v60 = vsub.s32 2, %v9378_v34  ;;  %v3304_v63 = vpop.f32.mrf.mxu1 }
 0x1a5   : > { %v399_v12 = vld [vmem:[#allocation2 + $0x218] sm:$0xff]  ;;  %v8215_v28 = vcombine.high %v463_v52, %v467_v53 }
 0x1a6   : > { %3660 = vmatpush1.bf16.msra.mxu0 %v8262_v0  ;;  %v403_v54 = vld [vmem:[#allocation2 + $0x238] sm:$0xff]  ;;  %v793_v7 = vrot.slane %v9381_v45, %v792_v60 }
 0x1a7   : > { %3633 = vmatpush2.bf16.msra.mxu1 %v8198_v3  ;;  %3661 = vmatprep.subr.bf16.mxu0 %v8255_v4  ;;  %v8151_v61 = vcombine.high %v399_v12, %v403_v54  ;;  %v583_v15 = vld [vmem:[#allocation2 + $0x7d8] sm:$0xff]  ;;  %v8214_v4 = vcombine.low %v463_v52, %v467_v53 }
 0x1a8   : > { %3634 = vmatprep.subr.bf16.mxu1 %v8191_v5  ;;  %v587_v16 = vld [vmem:[#allocation2 + $0x7f8] sm:$0xff]  ;;  %v8150_v5 = vcombine.low %v399_v12, %v403_v54 }
 0x1a9   : > { %v647_v0 = vld [vmem:[#allocation2 + $0x9d8] sm:$0xff]  ;;  %v8335_v6 = vcombine.high %v583_v15, %v587_v16  ;;  %v8334_v21 = vcombine.low %v583_v15, %v587_v16 }
 0x1aa   : > { %3662 = vmatpush1.bf16.msra.mxu0 %v8254_v11  ;;  %v651_v3 = vld [vmem:[#allocation2 + $0x9f8] sm:$0xff] }
 0x1ab   : > { %3635 = vmatpush2.bf16.msra.mxu1 %v8190_v17  ;;  %3663 = vmatprep.subr.bf16.mxu0 %v8247_v18  ;;  %v8399_v8 = vcombine.high %v647_v0, %v651_v3  ;;  %v575_v9 = vld [vmem:[#allocation2 + $0x798] sm:$0xff]  ;;  %v9431_v17 = vpop.f32.mrf.mxu1  ;;  %v8398_v22 = vcombine.low %v647_v0, %v651_v3 }
 0x1ac   : > { %3636 = vmatprep.subr.bf16.mxu1 %v8183_v20  ;;  %v579_v11 = vld [vmem:[#allocation2 + $0x7b8] sm:$0xff] }
 0x1ad   : > { %v639_v18 = vld [vmem:[#allocation2 + $0x998] sm:$0xff]  ;;  %v8327_v26 = vcombine.high %v575_v9, %v579_v11 }
 0x1ae   : > { %3664 = vmatpush1.bf16.msra.mxu0 %v8246_v29  ;;  %v643_v20 = vld [vmem:[#allocation2 + $0x9b8] sm:$0xff]  ;;  %v3305_v29 = vadd.f32 %v3304_v63, %v793_v7 }
 0x1af   : > { %3637 = vmatpush2.bf16.msra.mxu1 %v8182_v30  ;;  %3665 = vmatprep.subr.bf16.mxu0 %v8239_v32  ;;  %v8391_v30 = vcombine.high %v639_v18, %v643_v20  ;;  %v567_v45 = vld [vmem:[#allocation2 + $0x758] sm:$0xff] }
 0x1b0   : > { %3638 = vmatprep.subr.bf16.mxu1 %v8175_v33  ;;  %v571_v32 = vld [vmem:[#allocation2 + $0x778] sm:$0xff]  ;;  %v3308_v33 = vpop.f32.mrf.mxu1 }
 0x1b1   : > { %v631_v36 = vld [vmem:[#allocation2 + $0x958] sm:$0xff]  ;;  %v3309_v47 = vadd.f32 %v3308_v33, %v793_v7 }
 0x1b2   : > { %3666 = vmatpush1.bf16.msra.mxu0 %v8238_v39  ;;  %v635_v37 = vld [vmem:[#allocation2 + $0x978] sm:$0xff]  ;;  %v8326_v39 = vcombine.low %v575_v9, %v579_v11 }
 0x1b3   : > { %3639 = vmatpush2.bf16.msra.mxu1 %v8174_v41  ;;  %3667 = vmatprep.subr.bf16.mxu0 %v8231_v44  ;;  %v8390_v44 = vcombine.low %v639_v18, %v643_v20  ;;  %v8383_v48 = vcombine.high %v631_v36, %v635_v37  ;;  %v559_v49 = vld [vmem:[#allocation2 + $0x718] sm:$0xff]  ;;  %v8382_v52 = vcombine.low %v631_v36, %v635_v37 }
 0x1b4   : > { %3640 = vmatprep.subr.bf16.mxu1 %v8167_v46  ;;  %v8319_v46 = vcombine.high %v567_v45, %v571_v32  ;;  %v563_v50 = vld [vmem:[#allocation2 + $0x738] sm:$0xff] }
 0x1b5   : > { %v8311_v53 = vcombine.high %v559_v49, %v563_v50  ;;  %v551_v54 = vld [vmem:[#allocation2 + $0x6d8] sm:$0xff]  ;;  %v8310_v60 = vcombine.low %v559_v49, %v563_v50 }
 0x1b6   : > { %3668 = vmatpush1.bf16.msra.mxu0 %v8230_v1  ;;  %v543_v16 = vld [vmem:[#allocation2 + $0x698] sm:$0xff] }
 0x1b7   : > { %3641 = vmatpush2.bf16.msra.mxu1 %v8166_v56  ;;  %3669 = vmatprep.subr.bf16.mxu0 %v8223_v51  ;;  %v623_v56 = vld [vmem:[#allocation2 + $0x918] sm:$0xff] }
 0x1b8   : > { %3642 = vmatprep.subr.bf16.mxu1 %v8159_v59  ;;  %v627_v51 = vld [vmem:[#allocation2 + $0x938] sm:$0xff] }
 0x1b9   : > { %v8375_v12 = vcombine.high %v623_v56, %v627_v51  ;;  %v547_v63 = vld [vmem:[#allocation2 + $0x6b8] sm:$0xff] }
 0x1ba   : > { %3670 = vmatpush1.bf16.msra.mxu0 %v8222_v55  ;;  %v555_v55 = vld [vmem:[#allocation2 + $0x6f8] sm:$0xff]  ;;  %v8294_v20 = vcombine.low %v543_v16, %v547_v63 }
 0x1bb   : > { %3643 = vmatpush2.bf16.msra.mxu1 %v8158_v57  ;;  %3671 = vmatprep.subr.bf16.mxu0 %v8215_v28  ;;  %v615_v57 = vld [vmem:[#allocation2 + $0x8d8] sm:$0xff] }
 0x1bc   : > { %3644 = vmatprep.subr.bf16.mxu1 %v8151_v61  ;;  %v619_v28 = vld [vmem:[#allocation2 + $0x8f8] sm:$0xff]  ;;  %v8303_v61 = vcombine.high %v551_v54, %v555_v55 }
 0x1bd   : > { %v8367_v15 = vcombine.high %v615_v57, %v619_v28  ;;  %v607_v0 = vld [vmem:[#allocation2 + $0x898] sm:$0xff] }
 0x1be   : > { %3672 = vmatpush1.bf16.msra.mxu0 %v8214_v4  ;;  %v611_v3 = vld [vmem:[#allocation2 + $0x8b8] sm:$0xff]  ;;  %v8302_v4 = vcombine.low %v551_v54, %v555_v55 }
 0x1bf   : > { %3645 = vmatpush2.bf16.msra.mxu1 %v8150_v5  ;;  %3673 = vmatprep.subr.bf16.mxu0 %v8335_v6  ;;  %v8366_v5 = vcombine.low %v615_v57, %v619_v28  ;;  %v8295_v6 = vcombine.high %v543_v16, %v547_v63  ;;  %v8359_v7 = vcombine.high %v607_v0, %v611_v3  ;;  %v539_v9 = vld [vmem:[#allocation2 + $0x678] sm:$0xff]  ;;  %v9445_v57 = vpop.f32.mrf.mxu1 }
 0x1c0   : > { %3700 = vmatprep.subr.bf16.mxu1 %v8399_v8  ;;  %v535_v8 = vld [vmem:[#allocation2 + $0x658] sm:$0xff] }
 0x1c1   : > { %v3347_v35 = vpop.f32.mrf.mxu0  ;;  %v599_v11 = vld [vmem:[#allocation2 + $0x858] sm:$0xff]  ;;  %v8286_v33 = vcombine.low %v535_v8, %v539_v9 }
 0x1c2   : > { %v9435_v38 = vadd.f32 %v3347_v35, %v3305_v29  ;;  %3647 = vmatmul.mubr.bf16.vlgmr.msra.gmra.mxu1 %v9393_v10  ;;  %3674 = vmatpush2.bf16.msra.mxu0 %v8334_v21  ;;  %v8318_v10 = vcombine.low %v567_v45, %v571_v32  ;;  %v603_v18 = vld [vmem:[#allocation2 + $0x878] sm:$0xff]  ;;  %v8358_v21 = vcombine.low %v607_v0, %v611_v3 }
 0x1c3   : > { %3701 = vmatpush1.bf16.msra.mxu1 %v8398_v22  ;;  %v9438_v41 = vpop.f32.mrf.mxu0  ;;  %3675 = vmatprep.subr.bf16.mxu0 %v8327_v26  ;;  %v8287_v22 = vcombine.high %v535_v8, %v539_v9  ;;  %v8351_v26 = vcombine.high %v599_v11, %v603_v18  ;;  %v527_v29 = vld [vmem:[#allocation2 + $0x618] sm:$0xff]  ;;  %v8350_v35 = vcombine.low %v599_v11, %v603_v18 }
 0x1c4   : > { %3702 = vmatprep.subr.bf16.mxu1 %v8391_v30  ;;  %3732 = vmatprep.mubr.bf16.mxu1 %v9402_v27  ;;  %v8374_v27 = vcombine.low %v623_v56, %v627_v51  ;;  %v531_v30 = vld [vmem:[#allocation2 + $0x638] sm:$0xff] }
 0x1c5   : > { %v3351_v1 = vpop.f32.mrf.mxu0  ;;  %v591_v45 = vld [vmem:[#allocation2 + $0x818] sm:$0xff]  ;;  %v8279_v36 = vcombine.high %v527_v29, %v531_v30 }
 0x1c6   : > { %v9441_v59 = vadd.f32 %v3351_v1, %v3309_v47  ;;  %3676 = vmatpush2.bf16.msra.mxu0 %v8326_v39  ;;  %v595_v32 = vld [vmem:[#allocation2 + $0x838] sm:$0xff] }
 0x1c7   : > { %3703 = vmatpush1.bf16.msra.mxu1 %v8390_v44  ;;  %3677 = vmatprep.subr.bf16.mxu0 %v8319_v46  ;;  %v8343_v37 = vcombine.high %v591_v45, %v595_v32  ;;  %v775_v39 = vld [vmem:[#allocation2 + $0xdd8] sm:$0xff]  ;;  %v8342_v49 = vcombine.low %v591_v45, %v595_v32 }
 0x1c8   : > { %3704 = vmatprep.subr.bf16.mxu1 %v8383_v48  ;;  %v779_v44 = vld [vmem:[#allocation2 + $0xdf8] sm:$0xff]  ;;  %v8278_v48 = vcombine.low %v527_v29, %v531_v30 }
 0x1c9   : > { %v711_v46 = vld [vmem:[#allocation2 + $0xbd8] sm:$0xff]  ;;  %v8527_v50 = vcombine.high %v775_v39, %v779_v44 }
 0x1ca   : > { %3678 = vmatpush2.bf16.msra.mxu0 %v8318_v10  ;;  %v715_v47 = vld [vmem:[#allocation2 + $0xbf8] sm:$0xff] }
 0x1cb   : > { %3705 = vmatpush1.bf16.msra.mxu1 %v8382_v52  ;;  %3679 = vmatprep.subr.bf16.mxu0 %v8311_v53  ;;  %v8463_v1 = vcombine.high %v711_v46, %v715_v47  ;;  %v767_v56 = vld [vmem:[#allocation2 + $0xd98] sm:$0xff]  ;;  %v8526_v53 = vcombine.low %v775_v39, %v779_v44  ;;  %v8462_v54 = vcombine.low %v711_v46, %v715_v47  ;;  %v9457_v46 = vld [vmem:[#allocation4] sm:$0xff] }
 0x1cc   : > { %3706 = vmatprep.subr.bf16.mxu1 %v8375_v12  ;;  %v771_v51 = vld [vmem:[#allocation2 + $0xdb8] sm:$0xff]  ;;  %v9443_v12 = vpop.f32.mrf.mxu0 }
 0x1cd   : > { %v703_v10 = vld [vmem:[#allocation2 + $0xb98] sm:$0xff]  ;;  %v8519_v55 = vcombine.high %v767_v56, %v771_v51  ;;  %v8518_v0 = vcombine.low %v767_v56, %v771_v51 }
 0x1ce   : > { %3680 = vmatpush2.bf16.msra.mxu0 %v8310_v60  ;;  %v707_v52 = vld [vmem:[#allocation2 + $0xbb8] sm:$0xff] }
 0x1cf   : > { %3707 = vmatpush1.bf16.msra.mxu1 %v8374_v27  ;;  %3681 = vmatprep.subr.bf16.mxu0 %v8303_v61  ;;  %v8455_v28 = vcombine.high %v703_v10, %v707_v52  ;;  %v759_v60 = vld [vmem:[#allocation2 + $0xd58] sm:$0xff] }
 0x1d0   : > { %3708 = vmatprep.subr.bf16.mxu1 %v8367_v15  ;;  %v763_v27 = vld [vmem:[#allocation2 + $0xd78] sm:$0xff] }
 0x1d1   : > { %v695_v15 = vld [vmem:[#allocation2 + $0xb58] sm:$0xff] }
 0x1d2   : > { %3682 = vmatpush2.bf16.msra.mxu0 %v8302_v4  ;;  %v699_v16 = vld [vmem:[#allocation2 + $0xb78] sm:$0xff]  ;;  %v8454_v4 = vcombine.low %v703_v10, %v707_v52 }
 0x1d3   : > { %3709 = vmatpush1.bf16.msra.mxu1 %v8366_v5  ;;  %3683 = vmatprep.subr.bf16.mxu0 %v8295_v6  ;;  %v8511_v5 = vcombine.high %v759_v60, %v763_v27  ;;  %v8447_v8 = vcombine.high %v695_v15, %v699_v16  ;;  %v755_v9 = vld [vmem:[#allocation2 + $0xd38] sm:$0xff] }
 0x1d4   : > { %3710 = vmatprep.subr.bf16.mxu1 %v8359_v7  ;;  %v687_v18 = vld [vmem:[#allocation2 + $0xb18] sm:$0xff] }
 0x1d5   : > { %v743_v32 = vld [vmem:[#allocation2 + $0xcd8] sm:$0xff] }
 0x1d6   : > { %3684 = vmatpush2.bf16.msra.mxu0 %v8294_v20  ;;  %v691_v20 = vld [vmem:[#allocation2 + $0xb38] sm:$0xff] }
 0x1d7   : > { %3711 = vmatpush1.bf16.msra.mxu1 %v8358_v21  ;;  %3685 = vmatprep.subr.bf16.mxu0 %v8287_v22  ;;  %v788_v21 = vsub.s32 1, %v9378_v34  ;;  %v8439_v45 = vcombine.high %v687_v18, %v691_v20  ;;  %v679_v39 = vld [vmem:[#allocation2 + $0xad8] sm:$0xff] }
 0x1d8   : > { %3712 = vmatprep.subr.bf16.mxu1 %v8351_v26  ;;  %v8446_v26 = vcombine.low %v695_v15, %v699_v16  ;;  %v683_v44 = vld [vmem:[#allocation2 + $0xaf8] sm:$0xff] }
 0x1d9   : > { %v789_v47 = vrot.slane %v9457_v46, %v788_v21  ;;  %v8431_v56 = vcombine.high %v679_v39, %v683_v44  ;;  %v735_v51 = vld [vmem:[#allocation2 + $0xc98] sm:$0xff] }
 0x1da   : > { %3686 = vmatpush2.bf16.msra.mxu0 %v8286_v33  ;;  %v747_v33 = vld [vmem:[#allocation2 + $0xcf8] sm:$0xff] }
 0x1db   : > { %3713 = vmatpush1.bf16.msra.mxu1 %v8350_v35  ;;  %3687 = vmatprep.subr.bf16.mxu0 %v8279_v36  ;;  %v796_v35 = vsub.s32 3, %v9378_v34  ;;  %v739_v10 = vld [vmem:[#allocation2 + $0xcb8] sm:$0xff] }
 0x1dc   : > { %3714 = vmatprep.subr.bf16.mxu1 %v8343_v37  ;;  %v8487_v16 = vcombine.high %v735_v51, %v739_v10 }
 0x1dd   : > { %v797_v52 = vrot.slane %v9457_v46, %v796_v35 }
 0x1de   : > { %3688 = vmatpush2.bf16.msra.mxu0 %v8278_v48 }
 0x1df   : > { %3715 = vmatpush1.bf16.msra.mxu1 %v8342_v49  ;;  %3743 = vmatprep.subr.bf16.mxu0 %v8527_v50  ;;  %v8438_v49 = vcombine.low %v687_v18, %v691_v20  ;;  %v8495_v50 = vcombine.high %v743_v32, %v747_v33  ;;  %v3311_v15 = vadd.f32 %v9445_v57, %v797_v52 }
 0x1e0   : > { %3716 = vmatprep.subr.bf16.mxu1 %v8463_v1  ;;  %v3139_v1 = vadd.f32 %v9407_v25, %v789_v47  ;;  %v8430_v25 = vcombine.low %v679_v39, %v683_v44  ;;  %v8486_v20 = vcombine.low %v735_v51, %v739_v10  ;;  %v4026_v39 = vld [vmem:[#allocation6 + $0x5c0] sm:$0xff] }
 0x1e1   : > { %v3433_v61 = vpop.f32.mrf.mxu0  ;;  %3690 = vmatmul.mubr.bf16.vlgmr.msra.gmra.mxu0 %v9397_v14  ;;  %v751_v14 = vld [vmem:[#allocation2 + $0xd18] sm:$0xff]  ;;  %v4030_v44 = vld [vmem:[#allocation6 + $0x5e0] sm:$0xff] }
 0x1e2   : > { %v3390_v63 = vpop.f32.mrf.mxu1  ;;  %3744 = vmatpush1.bf16.msra.mxu0 %v8526_v53  ;;  %3775 = vmatprep.mubr.bf16.mxu0 %v9221_v31  ;;  %v8503_v29 = vcombine.high %v751_v14, %v755_v9  ;;  %v3894_v51 = vld [vmem:[#allocation6 + $0x1a0] sm:$0xff] }
 0x1e3   : > { %v3391_v3 = vadd.f32 %v3390_v63, %v9435_v38  ;;  %3717 = vmatpush2.bf16.msra.mxu1 %v8462_v54  ;;  %3745 = vmatprep.subr.bf16.mxu0 %v8519_v55  ;;  %v9452_v7 = vpop.f32.mrf.mxu0  ;;  %v8510_v38 = vcombine.low %v759_v60, %v763_v27  ;;  %v671_v55 = vld [vmem:[#allocation2 + $0xa98] sm:$0xff]  ;;  %v3135_v60 = vadd.f32 %v9384_v24, %v789_v47 }
 0x1e4   : > { %v9450_v6 = vpop.f32.mrf.mxu1  ;;  %3718 = vmatprep.subr.bf16.mxu1 %v8455_v28  ;;  %v675_v28 = vld [vmem:[#allocation2 + $0xab8] sm:$0xff]  ;;  %v3182_v63 = vadd.f32 %v9405_v19, %v3139_v1  ;;  %v3354_v24 = vadd.f32 %v9443_v12, %v3311_v15  ;;  %v3886_v15 = vld [vmem:[#allocation6 + $0x160] sm:$0xff] }
 0x1e5   : > { %v3434_v11 = vadd.f32 %v3433_v61, %v3391_v3  ;;  %v3437_v30 = vpop.f32.mrf.mxu0  ;;  %v8494_v61 = vcombine.low %v743_v32, %v747_v33  ;;  %v8423_v3 = vcombine.high %v671_v55, %v675_v28  ;;  %v8422_v18 = vcombine.low %v671_v55, %v675_v28  ;;  %v719_v12 = vld [vmem:[#allocation2 + $0xc18] sm:$0xff] }
 0x1e6   : > { %v3394_v31 = vpop.f32.mrf.mxu1  ;;  %3746 = vmatpush1.bf16.msra.mxu0 %v8518_v0  ;;  %v3225_v57 = vadd.f32 %v9433_v58, %v3182_v63  ;;  %v8712_v55 = vcombine.low %v4026_v39, %v4030_v44 }
 0x1e7   : > { %v3395_v22 = vadd.f32 %v3394_v31, %v9441_v59  ;;  %3719 = vmatpush2.bf16.msra.mxu1 %v8454_v4  ;;  %3747 = vmatprep.subr.bf16.mxu0 %v8511_v5  ;;  %v3804_v36 = vmul.f32 0.2, %v3434_v11  ;;  %vm3788_vm2 = vcmp.gt.f32.partialorder %v3434_v11, 0.0  ;;  %v8502_v59 = vcombine.low %v751_v14, %v755_v9  ;;  %v727_v4 = vld [vmem:[#allocation2 + $0xc58] sm:$0xff] }
 0x1e8   : > { %3720 = vmatprep.subr.bf16.mxu1 %v8447_v8  ;;  %v3396_v0 = vpop.f32.mrf.mxu1  ;;  %v731_v5 = vld [vmem:[#allocation2 + $0xc78] sm:$0xff]  ;;  %v3307_v8 = vadd.f32 %v9431_v17, %v797_v52  ;;  %v3268_v58 = vadd.f32 %v9427_v23, %v3225_v57  ;;  %v4018_v52 = vld [vmem:[#allocation6 + $0x580] sm:$0xff] }
 0x1e9   : > { %v3438_v37 = vadd.f32 %v3437_v30, %v3395_v22  ;;  %v3820_v53 = vsel %vm3788_vm2, %v3434_v11, %v3804_v36  ;;  %v663_v14 = vld [vmem:[#allocation2 + $0xa58] sm:$0xff]  ;;  %v3178_v11 = vadd.f32 %v9388_v2, %v3135_v60  ;;  %v3397_v21 = vadd.f32 %v3396_v0, %v3354_v24  ;;  %v3439_v30 = vpop.f32.mrf.mxu0  ;;  %v3898_v36 = vld [vmem:[#allocation6 + $0x1c0] sm:$0xff] }
 0x1ea   : > { %3748 = vmatpush1.bf16.msra.mxu0 %v8510_v38  ;;  %v667_v9 = vld [vmem:[#allocation2 + $0xa78] sm:$0xff]  ;;  %v3350_v19 = vadd.f32 %v9438_v41, %v3307_v8  ;;  %v8479_v31 = vcombine.high %v727_v4, %v731_v5  ;;  %v3811_v47 = vmul.f32 0.2, %v3268_v58  ;;  %vm3795_vm4 = vcmp.gt.f32.partialorder %v3268_v58, 0.0  ;;  %v4010_v0 = vld [vmem:[#allocation6 + $0x540] sm:$0xff] }
 0x1eb   : > { %vm3796_vm3 = vcmp.gt.f32.partialorder %v3438_v37, 0.0  ;;  %v3812_v48 = vmul.f32 0.2, %v3438_v37  ;;  %3721 = vmatpush2.bf16.msra.mxu1 %v8446_v26  ;;  %3749 = vmatprep.subr.bf16.mxu0 %v8503_v29  ;;  %v3221_v38 = vadd.f32 %v9416_v43, %v3178_v11  ;;  %v8415_v17 = vcombine.high %v663_v14, %v667_v9  ;;  %v723_v22 = vld [vmem:[#allocation2 + $0xc38] sm:$0xff]  ;;  %v4002_v11 = vld [vmem:[#allocation6 + $0x500] sm:$0xff] }
 0x1ec   : > { %3722 = vmatprep.subr.bf16.mxu1 %v8439_v45  ;;  %v3393_v26 = vadd.f32 %v9450_v6, %v3350_v19  ;;  %v655_v2 = vld [vmem:[#allocation2 + $0xa18] sm:$0xff]  ;;  %v8478_v45 = vcombine.low %v727_v4, %v731_v5  ;;  %v3440_v41 = vadd.f32 %v3439_v30, %v3397_v21  ;;  %v8414_v32 = vcombine.low %v663_v14, %v667_v9  ;;  %v3874_v14 = vld [vmem:[#allocation6 + $0x100] sm:$0xff] }
 0x1ed   : > { %v3828_v54 = vsel %vm3796_vm3, %v3438_v37, %v3812_v48  ;;  %v659_v29 = vld [vmem:[#allocation2 + $0xa38] sm:$0xff]  ;;  %v8471_v33 = vcombine.high %v719_v12, %v723_v22  ;;  %v3264_v43 = vadd.f32 %v9414_v42, %v3221_v38  ;;  %v3902_v37 = vld [vmem:[#allocation6 + $0x1e0] sm:$0xff]  ;;  %v8470_v23 = vcombine.low %v719_v12, %v723_v22 }
 0x1ee   : > { %v9463_v27 = vpack.c.bf16 %v3828_v54, %v3820_v53  ;;  %3750 = vmatpush1.bf16.msra.mxu0 %v8502_v59  ;;  %v8407_v35 = vcombine.high %v655_v2, %v659_v29  ;;  %v3436_v6 = vadd.f32 %v9452_v7, %v3393_v26  ;;  %v3813_v59 = vmul.f32 0.2, %v3440_v41  ;;  %v4022_v53 = vld [vmem:[#allocation6 + $0x5a0] sm:$0xff] }
 0x1ef   : > { %3723 = vmatpush2.bf16.msra.mxu1 %v8438_v49  ;;  %3751 = vmatprep.subr.bf16.mxu0 %v8495_v50  ;;  %v8406_v48 = vcombine.low %v655_v2, %v659_v29  ;;  %v8585_v49 = vcombine.high %v3898_v36, %v3902_v37  ;;  %v3803_v50 = vmul.f32 0.2, %v3264_v43  ;;  %vm3797_vm5 = vcmp.gt.f32.partialorder %v3440_v41, 0.0  ;;  %v3878_v9 = vld [vmem:[#allocation6 + $0x120] sm:$0xff] }
 0x1f0   : > { %3724 = vmatprep.subr.bf16.mxu1 %v8431_v56  ;;  %v8713_v42 = vcombine.high %v4026_v39, %v4030_v44  ;;  %vm3787_vm6 = vcmp.gt.f32.partialorder %v3264_v43, 0.0  ;;  %v3805_v1 = vmul.f32 0.2, %v3436_v6  ;;  %v3890_v56 = vld [vmem:[#allocation6 + $0x180] sm:$0xff]  ;;  %v3827_v7 = vsel %vm3795_vm4, %v3268_v58, %v3811_v47 }
 0x1f1   : > { %vm3789_vm7 = vcmp.gt.f32.partialorder %v3436_v6, 0.0  ;;  %v8584_v10 = vcombine.low %v3898_v36, %v3902_v37  ;;  %v3829_v54 = vsel %vm3797_vm5, %v3440_v41, %v3813_v59  ;;  %v3819_v28 = vsel %vm3787_vm6, %v3264_v43, %v3803_v50  ;;  %v4006_v57 = vld [vmem:[#allocation6 + $0x520] sm:$0xff] }
 0x1f2   : > { %3752 = vmatpush1.bf16.msra.mxu0 %v8494_v61  ;;  %v8577_v60 = vcombine.high %v3890_v56, %v3894_v51  ;;  %v3882_v61 = vld [vmem:[#allocation6 + $0x140] sm:$0xff]  ;;  %v8705_v63 = vcombine.high %v4018_v52, %v4022_v53  ;;  %v8576_v5 = vcombine.low %v3890_v56, %v3894_v51  ;;  %v8704_v8 = vcombine.low %v4018_v52, %v4022_v53 }
 0x1f3   : > { %3725 = vmatpush2.bf16.msra.mxu1 %v8430_v25  ;;  %3753 = vmatprep.subr.bf16.mxu0 %v8487_v16  ;;  %v3821_v25 = vsel %vm3789_vm7, %v3436_v6, %v3805_v1  ;;  %v9478_v16 = vpack.c.bf16 %v3827_v7, %v3819_v28  ;;  %v8569_v24 = vcombine.high %v3882_v61, %v3886_v15  ;;  %v3866_v21 = vld [vmem:[#allocation6 + $0xc0] sm:$0xff] }
 0x1f4   : > { %3726 = vmatprep.subr.bf16.mxu1 %v8423_v3  ;;  %v4014_v3 = vld [vmem:[#allocation6 + $0x560] sm:$0xff]  ;;  %v9480_v4 = vpack.c.bf16 %v3829_v54, %v3821_v25  ;;  %v8689_v19 = vcombine.high %v4002_v11, %v4006_v57  ;;  %v8560_v12 = vcombine.low %v3874_v14, %v3878_v9  ;;  %v8688_v22 = vcombine.low %v4002_v11, %v4006_v57 }
 0x1f5   : > { %v3994_v38 = vld [vmem:[#allocation6 + $0x4c0] sm:$0xff] }
 0x1f6   : > { %3754 = vmatpush1.bf16.msra.mxu0 %v8486_v20  ;;  %v8561_v20 = vcombine.high %v3874_v14, %v3878_v9  ;;  %v3858_v29 = vld [vmem:[#allocation6 + $0x80] sm:$0xff] }
 0x1f7   : > { %3727 = vmatpush2.bf16.msra.mxu1 %v8422_v18  ;;  %3755 = vmatprep.subr.bf16.mxu0 %v8479_v31  ;;  %v8568_v18 = vcombine.low %v3882_v61, %v3886_v15  ;;  %v3870_v31 = vld [vmem:[#allocation6 + $0xe0] sm:$0xff] }
 0x1f8   : > { %3728 = vmatprep.subr.bf16.mxu1 %v8415_v17  ;;  %v3998_v17 = vld [vmem:[#allocation6 + $0x4e0] sm:$0xff]  ;;  %v8553_v26 = vcombine.high %v3866_v21, %v3870_v31  ;;  %v8552_v41 = vcombine.low %v3866_v21, %v3870_v31 }
 0x1f9   : > { %v8681_v2 = vcombine.high %v3994_v38, %v3998_v17  ;;  %v3862_v58 = vld [vmem:[#allocation6 + $0xa0] sm:$0xff] }
 0x1fa   : > { %3756 = vmatpush1.bf16.msra.mxu0 %v8478_v45  ;;  %v3986_v30 = vld [vmem:[#allocation6 + $0x480] sm:$0xff]  ;;  %v8544_v39 = vcombine.low %v3858_v29, %v3862_v58 }
 0x1fb   : > { %3729 = vmatpush2.bf16.msra.mxu1 %v8414_v32  ;;  %3757 = vmatprep.subr.bf16.mxu0 %v8471_v33  ;;  %v3990_v45 = vld [vmem:[#allocation6 + $0x4a0] sm:$0xff]  ;;  %v8680_v32 = vcombine.low %v3994_v38, %v3998_v17  ;;  %v8545_v33 = vcombine.high %v3858_v29, %v3862_v58 }
 0x1fc   : > { %3730 = vmatprep.subr.bf16.mxu1 %v8407_v35  ;;  %v8673_v43 = vcombine.high %v3986_v30, %v3990_v45  ;;  %v3850_v35 = vld [vmem:[#allocation6 + $0x40] sm:$0xff]  ;;  %v8672_v44 = vcombine.low %v3986_v30, %v3990_v45 }
 0x1fd   : > { %v3854_v36 = vld [vmem:[#allocation6 + $0x60] sm:$0xff] }
 0x1fe   : > { %3758 = vmatpush1.bf16.msra.mxu0 %v8470_v23  ;;  %v3978_v37 = vld [vmem:[#allocation6 + $0x440] sm:$0xff]  ;;  %v8537_v47 = vcombine.high %v3850_v35, %v3854_v36 }
 0x1ff   : > { %3731 = vmatpush2.bf16.msra.mxu1 %v8406_v48  ;;  %6914 = vmatprep.subr.bf16.mxu0 %v8585_v49  ;;  %v3982_v6 = vld [vmem:[#allocation6 + $0x460] sm:$0xff] }
 0x200   : > { %6957 = vmatprep.subr.bf16.mxu1 %v8713_v42  ;;  %v8665_v23 = vcombine.high %v3978_v37, %v3982_v6  ;;  %v3842_v59 = vld [vmem:[#allocation6] sm:$0xff]  ;;  %v8536_v42 = vcombine.low %v3850_v35, %v3854_v36  ;;  %v8664_v1 = vcombine.low %v3978_v37, %v3982_v6 }
 0x201   : > { %3776 = vmatmul.mubr.bf16.vlgmr.msra.gmra.mxu0 %v9411_v40  ;;  %v8697_v40 = vcombine.high %v4010_v0, %v4014_v3  ;;  %v3846_v48 = vld [vmem:[#allocation6 + $0x20] sm:$0xff] }
 0x202   : > { %3733 = vmatmul.mubr.bf16.vlgmr.msra.gmra.mxu1 %v9423_v62  ;;  %6915 = vmatpush1.bf16.msra.mxu0 %v8584_v10  ;;  %v8696_v62 = vcombine.low %v4010_v0, %v4014_v3  ;;  %v3970_v49 = vld [vmem:[#allocation6 + $0x400] sm:$0xff]  ;;  %v8529_v56 = vcombine.high %v3842_v59, %v3846_v48  ;;  %v8528_v54 = vcombine.low %v3842_v59, %v3846_v48 }
 0x203   : > { %6946 = vmatprep.mubr.bf16.mxu0 %v9478_v16  ;;  %6958 = vmatpush1.bf16.msra.mxu1 %v8712_v55  ;;  %v3974_v50 = vld [vmem:[#allocation6 + $0x420] sm:$0xff] }
 0x204   : > { %6989 = vmatprep.mubr.bf16.mxu1 %v9480_v4  ;;  %6916 = vmatprep.subr.bf16.mxu0 %v8577_v60  ;;  %v8657_v51 = vcombine.high %v3970_v49, %v3974_v50  ;;  %v3962_v7 = vld [vmem:[#allocation6 + $0x3c0] sm:$0xff]  ;;  %v8656_v55 = vcombine.low %v3970_v49, %v3974_v50 }
 0x205   : > { %6959 = vmatprep.subr.bf16.mxu1 %v8705_v63  ;;  %v3966_v10 = vld [vmem:[#allocation6 + $0x3e0] sm:$0xff] }
 0x206   : > { %6917 = vmatpush1.bf16.msra.mxu0 %v8576_v5  ;;  %v4090_v52 = vld [vmem:[#allocation6 + $0x7c0] sm:$0xff]  ;;  %v8649_v28 = vcombine.high %v3962_v7, %v3966_v10  ;;  %v8648_v0 = vcombine.low %v3962_v7, %v3966_v10 }
 0x207   : > { %6960 = vmatpush1.bf16.msra.mxu1 %v8704_v8  ;;  %6918 = vmatprep.subr.bf16.mxu0 %v8569_v24  ;;  %v4094_v53 = vld [vmem:[#allocation6 + $0x7e0] sm:$0xff] }
 0x208   : > { %6961 = vmatprep.subr.bf16.mxu1 %v8697_v40  ;;  %v8777_v60 = vcombine.high %v4090_v52, %v4094_v53  ;;  %v3954_v61 = vld [vmem:[#allocation6 + $0x380] sm:$0xff]  ;;  %v8776_v3 = vcombine.low %v4090_v52, %v4094_v53 }
 0x209   : > { %v3958_v15 = vld [vmem:[#allocation6 + $0x3a0] sm:$0xff] }
 0x20a   : > { %6919 = vmatpush1.bf16.msra.mxu0 %v8568_v18  ;;  %v4082_v25 = vld [vmem:[#allocation6 + $0x780] sm:$0xff]  ;;  %v8641_v5 = vcombine.high %v3954_v61, %v3958_v15  ;;  %v8640_v11 = vcombine.low %v3954_v61, %v3958_v15 }
 0x20b   : > { %6962 = vmatpush1.bf16.msra.mxu1 %v8696_v62  ;;  %6920 = vmatprep.subr.bf16.mxu0 %v8561_v20  ;;  %v4086_v63 = vld [vmem:[#allocation6 + $0x7a0] sm:$0xff] }
 0x20c   : > { %6963 = vmatprep.subr.bf16.mxu1 %v8689_v19  ;;  %v8769_v8 = vcombine.high %v4082_v25, %v4086_v63  ;;  %v3946_v24 = vld [vmem:[#allocation6 + $0x340] sm:$0xff]  ;;  %v8768_v57 = vcombine.low %v4082_v25, %v4086_v63 }
 0x20d   : > { %v3950_v40 = vld [vmem:[#allocation6 + $0x360] sm:$0xff] }
 0x20e   : > { %6921 = vmatpush1.bf16.msra.mxu0 %v8560_v12  ;;  %v4074_v14 = vld [vmem:[#allocation6 + $0x740] sm:$0xff]  ;;  %v8633_v18 = vcombine.high %v3946_v24, %v3950_v40  ;;  %v8632_v38 = vcombine.low %v3946_v24, %v3950_v40 }
 0x20f   : > { %6964 = vmatpush1.bf16.msra.mxu1 %v8688_v22  ;;  %6922 = vmatprep.subr.bf16.mxu0 %v8553_v26  ;;  %v4078_v9 = vld [vmem:[#allocation6 + $0x760] sm:$0xff] }
 0x210   : > { %6965 = vmatprep.subr.bf16.mxu1 %v8681_v2  ;;  %v8761_v62 = vcombine.high %v4074_v14, %v4078_v9  ;;  %v3938_v20 = vld [vmem:[#allocation6 + $0x300] sm:$0xff]  ;;  %v8760_v17 = vcombine.low %v4074_v14, %v4078_v9 }
 0x211   : > { %v3942_v19 = vld [vmem:[#allocation6 + $0x320] sm:$0xff] }
 0x212   : > { %6923 = vmatpush1.bf16.msra.mxu0 %v8552_v41  ;;  %v4066_v21 = vld [vmem:[#allocation6 + $0x700] sm:$0xff]  ;;  %v8625_v12 = vcombine.high %v3938_v20, %v3942_v19  ;;  %v8624_v30 = vcombine.low %v3938_v20, %v3942_v19 }
 0x213   : > { %6966 = vmatpush1.bf16.msra.mxu1 %v8680_v32  ;;  %6924 = vmatprep.subr.bf16.mxu0 %v8545_v33  ;;  %v4070_v31 = vld [vmem:[#allocation6 + $0x720] sm:$0xff] }
 0x214   : > { %6967 = vmatprep.subr.bf16.mxu1 %v8673_v43  ;;  %v8753_v22 = vcombine.high %v4066_v21, %v4070_v31  ;;  %v3930_v26 = vld [vmem:[#allocation6 + $0x2c0] sm:$0xff]  ;;  %v8752_v45 = vcombine.low %v4066_v21, %v4070_v31 }
 0x215   : > { %v3934_v2 = vld [vmem:[#allocation6 + $0x2e0] sm:$0xff] }
 0x216   : > { %6925 = vmatpush1.bf16.msra.mxu0 %v8544_v39  ;;  %v4058_v29 = vld [vmem:[#allocation6 + $0x6c0] sm:$0xff]  ;;  %v8617_v41 = vcombine.high %v3930_v26, %v3934_v2  ;;  %v8616_v37 = vcombine.low %v3930_v26, %v3934_v2 }
 0x217   : > { %6968 = vmatpush1.bf16.msra.mxu1 %v8672_v44  ;;  %6926 = vmatprep.subr.bf16.mxu0 %v8537_v47  ;;  %v4062_v58 = vld [vmem:[#allocation6 + $0x6e0] sm:$0xff] }
 0x218   : > { %6969 = vmatprep.subr.bf16.mxu1 %v8665_v23  ;;  %v8745_v32 = vcombine.high %v4058_v29, %v4062_v58  ;;  %v3922_v33 = vld [vmem:[#allocation6 + $0x280] sm:$0xff]  ;;  %v8744_v6 = vcombine.low %v4058_v29, %v4062_v58 }
 0x219   : > { %v3926_v43 = vld [vmem:[#allocation6 + $0x2a0] sm:$0xff] }
 0x21a   : > { %6927 = vmatpush1.bf16.msra.mxu0 %v8536_v42  ;;  %v4050_v35 = vld [vmem:[#allocation6 + $0x680] sm:$0xff]  ;;  %v8609_v39 = vcombine.high %v3922_v33, %v3926_v43  ;;  %v8608_v49 = vcombine.low %v3922_v33, %v3926_v43 }
 0x21b   : > { %6970 = vmatpush1.bf16.msra.mxu1 %v8664_v1  ;;  %6928 = vmatprep.subr.bf16.mxu0 %v8529_v56  ;;  %v4054_v36 = vld [vmem:[#allocation6 + $0x6a0] sm:$0xff] }
 0x21c   : > { %6971 = vmatprep.subr.bf16.mxu1 %v8657_v51  ;;  %v8737_v44 = vcombine.high %v4050_v35, %v4054_v36  ;;  %v3914_v47 = vld [vmem:[#allocation6 + $0x240] sm:$0xff]  ;;  %v8736_v50 = vcombine.low %v4050_v35, %v4054_v36 }
 0x21d   : > { %v3918_v23 = vld [vmem:[#allocation6 + $0x260] sm:$0xff] }
 0x21e   : > { %6929 = vmatpush1.bf16.msra.mxu0 %v8528_v54  ;;  %v4042_v59 = vld [vmem:[#allocation6 + $0x640] sm:$0xff]  ;;  %v8601_v42 = vcombine.high %v3914_v47, %v3918_v23  ;;  %v8600_v52 = vcombine.low %v3914_v47, %v3918_v23 }
 0x21f   : > { %6972 = vmatpush1.bf16.msra.mxu1 %v8656_v55  ;;  %6930 = vmatprep.subr.bf16.mxu0 %v8649_v28  ;;  %v4046_v48 = vld [vmem:[#allocation6 + $0x660] sm:$0xff] }
 0x220   : > { %6973 = vmatprep.subr.bf16.mxu1 %v8777_v60  ;;  %v8729_v1 = vcombine.high %v4042_v59, %v4046_v48  ;;  %v3906_v56 = vld [vmem:[#allocation6 + $0x200] sm:$0xff]  ;;  %v8728_v53 = vcombine.low %v4042_v59, %v4046_v48 }
 0x221   : > { %v3910_v51 = vld [vmem:[#allocation6 + $0x220] sm:$0xff] }
 0x222   : > { %6931 = vmatpush2.bf16.msra.mxu0 %v8648_v0  ;;  %v4034_v7 = vld [vmem:[#allocation6 + $0x600] sm:$0xff]  ;;  %v8593_v54 = vcombine.high %v3906_v56, %v3910_v51  ;;  %v8592_v25 = vcombine.low %v3906_v56, %v3910_v51  ;;  %v9489_v51 = vld [vmem:[#allocation6 + $0x5c8] sm:$0xff] }
 0x223   : > { %6974 = vmatpush2.bf16.msra.mxu1 %v8776_v3  ;;  %6932 = vmatprep.subr.bf16.mxu0 %v8641_v5  ;;  %v4038_v10 = vld [vmem:[#allocation6 + $0x620] sm:$0xff] }
 0x224   : > { %6975 = vmatprep.subr.bf16.mxu1 %v8769_v8  ;;  %v8721_v55 = vcombine.high %v4034_v7, %v4038_v10  ;;  %v4154_v28 = vld [vmem:[#allocation6 + $0x9c0] sm:$0xff]  ;;  %v8720_v63 = vcombine.low %v4034_v7, %v4038_v10  ;;  %v9491_v7 = vld [vmem:[#allocation6 + $0x5e8] sm:$0xff] }
 0x225   : > { %v4158_v60 = vld [vmem:[#allocation6 + $0x9e0] sm:$0xff] }
 0x226   : > { %6933 = vmatpush2.bf16.msra.mxu0 %v8640_v11  ;;  %v4282_v61 = vld [vmem:[#allocation6 + $0xdc0] sm:$0xff]  ;;  %v8841_v0 = vcombine.high %v4154_v28, %v4158_v60  ;;  %v8840_v14 = vcombine.low %v4154_v28, %v4158_v60 }
 0x227   : > { %6976 = vmatpush2.bf16.msra.mxu1 %v8768_v57  ;;  %6934 = vmatprep.subr.bf16.mxu0 %v8633_v18  ;;  %v4286_v15 = vld [vmem:[#allocation6 + $0xde0] sm:$0xff] }
 0x228   : > { %6977 = vmatprep.subr.bf16.mxu1 %v8761_v62  ;;  %v4146_v3 = vld [vmem:[#allocation6 + $0x980] sm:$0xff]  ;;  %v8969_v8 = vcombine.high %v4282_v61, %v4286_v15  ;;  %v8968_v11 = vcombine.low %v4282_v61, %v4286_v15 }
 0x229   : > { %v4150_v5 = vld [vmem:[#allocation6 + $0x9a0] sm:$0xff] }
 0x22a   : > { %6935 = vmatpush2.bf16.msra.mxu0 %v8632_v38  ;;  %v4274_v24 = vld [vmem:[#allocation6 + $0xd80] sm:$0xff]  ;;  %v8833_v9 = vcombine.high %v4146_v3, %v4150_v5  ;;  %v8832_v21 = vcombine.low %v4146_v3, %v4150_v5  ;;  %v804_v5 = vsub.s32 5, %v9378_v34 }
 0x22b   : > { %6978 = vmatpush2.bf16.msra.mxu1 %v8760_v17  ;;  %6936 = vmatprep.subr.bf16.mxu0 %v8625_v12  ;;  %v4278_v40 = vld [vmem:[#allocation6 + $0xda0] sm:$0xff] }
 0x22c   : > { %6979 = vmatprep.subr.bf16.mxu1 %v8753_v22  ;;  %v4138_v57 = vld [vmem:[#allocation6 + $0x940] sm:$0xff]  ;;  %v8961_v62 = vcombine.high %v4274_v24, %v4278_v40  ;;  %v8960_v38 = vcombine.low %v4274_v24, %v4278_v40 }
 0x22d   : > { %v4142_v18 = vld [vmem:[#allocation6 + $0x960] sm:$0xff] }
 0x22e   : > { %6937 = vmatpush2.bf16.msra.mxu0 %v8624_v30  ;;  %v4266_v20 = vld [vmem:[#allocation6 + $0xd40] sm:$0xff]  ;;  %v8825_v31 = vcombine.high %v4138_v57, %v4142_v18  ;;  %v8824_v29 = vcombine.low %v4138_v57, %v4142_v18 }
 0x22f   : > { %6980 = vmatpush2.bf16.msra.mxu1 %v8752_v45  ;;  %6938 = vmatprep.subr.bf16.mxu0 %v8617_v41  ;;  %v4270_v19 = vld [vmem:[#allocation6 + $0xd60] sm:$0xff] }
 0x230   : > { %6981 = vmatprep.subr.bf16.mxu1 %v8745_v32  ;;  %v4130_v17 = vld [vmem:[#allocation6 + $0x900] sm:$0xff]  ;;  %v8953_v22 = vcombine.high %v4266_v20, %v4270_v19  ;;  %v8952_v30 = vcombine.low %v4266_v20, %v4270_v19  ;;  %v805_v19 = vrot.slane %v9457_v46, %v804_v5 }
 0x231   : > { %v4134_v12 = vld [vmem:[#allocation6 + $0x920] sm:$0xff] }
 0x232   : > { %6939 = vmatpush2.bf16.msra.mxu0 %v8616_v37  ;;  %v4258_v26 = vld [vmem:[#allocation6 + $0xd00] sm:$0xff]  ;;  %v8817_v58 = vcombine.high %v4130_v17, %v4134_v12  ;;  %v8816_v35 = vcombine.low %v4130_v17, %v4134_v12 }
 0x233   : > { %6982 = vmatpush2.bf16.msra.mxu1 %v8744_v6  ;;  %6940 = vmatprep.subr.bf16.mxu0 %v8609_v39  ;;  %v4262_v2 = vld [vmem:[#allocation6 + $0xd20] sm:$0xff] }
 0x234   : > { %6983 = vmatprep.subr.bf16.mxu1 %v8737_v44  ;;  %v4122_v45 = vld [vmem:[#allocation6 + $0x8c0] sm:$0xff]  ;;  %v8945_v32 = vcombine.high %v4258_v26, %v4262_v2  ;;  %v8944_v37 = vcombine.low %v4258_v26, %v4262_v2 }
 0x235   : > { %v4126_v41 = vld [vmem:[#allocation6 + $0x8e0] sm:$0xff] }
 0x236   : > { %6941 = vmatpush2.bf16.msra.mxu0 %v8608_v49  ;;  %v4250_v33 = vld [vmem:[#allocation6 + $0xcc0] sm:$0xff]  ;;  %v8809_v36 = vcombine.high %v4122_v45, %v4126_v41  ;;  %v8808_v59 = vcombine.low %v4122_v45, %v4126_v41 }
 0x237   : > { %6984 = vmatpush2.bf16.msra.mxu1 %v8736_v50  ;;  %6942 = vmatprep.subr.bf16.mxu0 %v8601_v42  ;;  %v4254_v43 = vld [vmem:[#allocation6 + $0xce0] sm:$0xff]  ;;  %v9487_v42 = vpop.f32.mrf.mxu1 }
 0x238   : > { %6985 = vmatprep.subr.bf16.mxu1 %v8729_v1  ;;  %v4114_v6 = vld [vmem:[#allocation6 + $0x880] sm:$0xff]  ;;  %v8937_v44 = vcombine.high %v4250_v33, %v4254_v43  ;;  %v8936_v50 = vcombine.low %v4250_v33, %v4254_v43 }
 0x239   : > { %v4118_v39 = vld [vmem:[#allocation6 + $0x8a0] sm:$0xff]  ;;  %v3521_v61 = vpop.f32.mrf.mxu1 }
 0x23a   : > { %6943 = vmatpush2.bf16.msra.mxu0 %v8600_v52  ;;  %v4242_v47 = vld [vmem:[#allocation6 + $0xc80] sm:$0xff]  ;;  %v8801_v48 = vcombine.high %v4114_v6, %v4118_v39 }
 0x23b   : > { %6986 = vmatpush2.bf16.msra.mxu1 %v8728_v53  ;;  %6944 = vmatprep.subr.bf16.mxu0 %v8593_v54  ;;  %v4246_v23 = vld [vmem:[#allocation6 + $0xca0] sm:$0xff]  ;;  %v8800_v53 = vcombine.low %v4114_v6, %v4118_v39  ;;  %v8714_v54 = vcombine.low %v9489_v51, %v9491_v7 }
 0x23c   : > { %6987 = vmatprep.subr.bf16.mxu1 %v8721_v55  ;;  %v4106_v49 = vld [vmem:[#allocation6 + $0x840] sm:$0xff]  ;;  %v8929_v56 = vcombine.high %v4242_v47, %v4246_v23  ;;  %v9495_v55 = vpop.f32.mrf.mxu0  ;;  %v8928_v60 = vcombine.low %v4242_v47, %v4246_v23 }
 0x23d   : > { %v4110_v1 = vld [vmem:[#allocation6 + $0x860] sm:$0xff] }
 0x23e   : > { %6945 = vmatpush2.bf16.msra.mxu0 %v8592_v25  ;;  %v4234_v10 = vld [vmem:[#allocation6 + $0xc40] sm:$0xff]  ;;  %v8793_v28 = vcombine.high %v4106_v49, %v4110_v1  ;;  %v3478_v24 = vpop.f32.mrf.mxu0 }
 0x23f   : > { %6988 = vmatpush2.bf16.msra.mxu1 %v8720_v63  ;;  %7000 = vmatprep.subr.bf16.mxu0 %v8841_v0  ;;  %v4238_v52 = vld [vmem:[#allocation6 + $0xc60] sm:$0xff] }
 0x240   : > { %7043 = vmatprep.subr.bf16.mxu1 %v8969_v8  ;;  %v4098_v15 = vld [vmem:[#allocation6 + $0x800] sm:$0xff]  ;;  %v8921_v63 = vcombine.high %v4234_v10, %v4238_v52  ;;  %v8792_v8 = vcombine.low %v4106_v49, %v4110_v1 }
 0x241   : > { %6947 = vmatmul.mubr.bf16.vlgmr.msra.gmra.mxu0 %v9420_v13  ;;  %v4102_v25 = vld [vmem:[#allocation6 + $0x820] sm:$0xff] }
 0x242   : > { %6990 = vmatmul.mubr.bf16.vlgmr.msra.gmra.mxu1 %v9463_v27  ;;  %7001 = vmatpush1.bf16.msra.mxu0 %v8840_v14  ;;  %v4226_v0 = vld [vmem:[#allocation6 + $0xc00] sm:$0xff]  ;;  %v8785_v40 = vcombine.high %v4098_v15, %v4102_v25  ;;  %v8920_v14 = vcombine.low %v4234_v10, %v4238_v52  ;;  %v800_v52 = vsub.s32 4, %v9378_v34 }
 0x243   : > { %7002 = vmatprep.subr.bf16.mxu0 %v8833_v9  ;;  %7044 = vmatpush1.bf16.msra.mxu1 %v8968_v11  ;;  %v4230_v3 = vld [vmem:[#allocation6 + $0xc20] sm:$0xff]  ;;  %v9498_v9 = vpop.f32.mrf.mxu1 }
 0x244   : > { %7045 = vmatprep.subr.bf16.mxu1 %v8961_v62  ;;  %v4218_v11 = vld [vmem:[#allocation6 + $0xbc0] sm:$0xff]  ;;  %v8913_v18 = vcombine.high %v4226_v0, %v4230_v3  ;;  %v8912_v17 = vcombine.low %v4226_v0, %v4230_v3 }
 0x245   : > { %v4222_v57 = vld [vmem:[#allocation6 + $0xbe0] sm:$0xff]  ;;  %v3525_v12 = vpop.f32.mrf.mxu1 }
 0x246   : > { %7003 = vmatpush1.bf16.msra.mxu0 %v8832_v21  ;;  %v4346_v62 = vld [vmem:[#allocation6 + $0xfc0] sm:$0xff]  ;;  %v8784_v21 = vcombine.low %v4098_v15, %v4102_v25  ;;  %v8904_v41 = vcombine.low %v4218_v11, %v4222_v57 }
 0x247   : > { %7004 = vmatprep.subr.bf16.mxu0 %v8825_v31  ;;  %7046 = vmatpush1.bf16.msra.mxu1 %v8960_v38  ;;  %v4350_v20 = vld [vmem:[#allocation6 + $0xfe0] sm:$0xff]  ;;  %v9501_v31 = vpop.f32.mrf.mxu0  ;;  %v8905_v38 = vcombine.high %v4218_v11, %v4222_v57  ;;  %v9503_v45 = vpop.f32.mrf.mxu1 }
 0x248   : > { %7047 = vmatprep.subr.bf16.mxu1 %v8953_v22  ;;  %v4210_v22 = vld [vmem:[#allocation6 + $0xb80] sm:$0xff]  ;;  %v9033_v2 = vcombine.high %v4346_v62, %v4350_v20  ;;  %v9032_v43 = vcombine.low %v4346_v62, %v4350_v20 }
 0x249   : > { %v4214_v26 = vld [vmem:[#allocation6 + $0xba0] sm:$0xff]  ;;  %v3607_v23 = vpop.f32.mrf.mxu1 }
 0x24a   : > { %7005 = vmatpush1.bf16.msra.mxu0 %v8824_v29  ;;  %v4338_v29 = vld [vmem:[#allocation6 + $0xf80] sm:$0xff]  ;;  %v8897_v33 = vcombine.high %v4210_v22, %v4214_v26 }
 0x24b   : > { %7006 = vmatprep.subr.bf16.mxu0 %v8817_v58  ;;  %7048 = vmatpush1.bf16.msra.mxu1 %v8952_v30  ;;  %v4342_v58 = vld [vmem:[#allocation6 + $0xfa0] sm:$0xff]  ;;  %v3479_v30 = vadd.f32 %v3478_v24, %v805_v19 }
 0x24c   : > { %7049 = vmatprep.subr.bf16.mxu1 %v8945_v32  ;;  %v3482_v32 = vpop.f32.mrf.mxu0  ;;  %v4330_v39 = vld [vmem:[#allocation6 + $0xf40] sm:$0xff]  ;;  %v9024_v10 = vcombine.low %v4338_v29, %v4342_v58 }
 0x24d   : > { %v3522_v47 = vadd.f32 %v3521_v61, %v3479_v30  ;;  %v4194_v1 = vld [vmem:[#allocation6 + $0xb00] sm:$0xff]  ;;  %v9508_v61 = vpop.f32.mrf.mxu1 }
 0x24e   : > { %7007 = vmatpush1.bf16.msra.mxu0 %v8816_v35  ;;  %v4202_v35 = vld [vmem:[#allocation6 + $0xb40] sm:$0xff] }
 0x24f   : > { %7008 = vmatprep.subr.bf16.mxu0 %v8809_v36  ;;  %7050 = vmatpush1.bf16.msra.mxu1 %v8944_v37  ;;  %v4206_v36 = vld [vmem:[#allocation6 + $0xb60] sm:$0xff]  ;;  %v9025_v37 = vcombine.high %v4338_v29, %v4342_v58 }
 0x250   : > { %7051 = vmatprep.subr.bf16.mxu1 %v8937_v44  ;;  %v4334_v44 = vld [vmem:[#allocation6 + $0xf60] sm:$0xff] }
 0x251   : > { %v4322_v15 = vld [vmem:[#allocation6 + $0xf00] sm:$0xff]  ;;  %v9016_v24 = vcombine.low %v4330_v39, %v4334_v44 }
 0x252   : > { %7009 = vmatpush1.bf16.msra.mxu0 %v8808_v59  ;;  %v8896_v59 = vcombine.low %v4210_v22, %v4214_v26  ;;  %v4326_v25 = vld [vmem:[#allocation6 + $0xf20] sm:$0xff] }
 0x253   : > { %7010 = vmatprep.subr.bf16.mxu0 %v8801_v48  ;;  %7052 = vmatpush1.bf16.msra.mxu1 %v8936_v50  ;;  %v3483_v48 = vadd.f32 %v3482_v32, %v805_v19  ;;  %v8889_v50 = vcombine.high %v4202_v35, %v4206_v36  ;;  %v4190_v11 = vld [vmem:[#allocation6 + $0xae0] sm:$0xff]  ;;  %v9009_v57 = vcombine.high %v4322_v15, %v4326_v25 }
 0x254   : > { %7053 = vmatprep.subr.bf16.mxu1 %v8929_v56  ;;  %v4198_v56 = vld [vmem:[#allocation6 + $0xb20] sm:$0xff] }
 0x255   : > { %v8881_v0 = vcombine.high %v4194_v1, %v4198_v56  ;;  %v3526_v3 = vadd.f32 %v3525_v12, %v3483_v48  ;;  %v4314_v62 = vld [vmem:[#allocation6 + $0xec0] sm:$0xff] }
 0x256   : > { %7011 = vmatpush1.bf16.msra.mxu0 %v8800_v53  ;;  %v4318_v20 = vld [vmem:[#allocation6 + $0xee0] sm:$0xff] }
 0x257   : > { %7012 = vmatprep.subr.bf16.mxu0 %v8793_v28  ;;  %7054 = vmatpush1.bf16.msra.mxu1 %v8928_v60  ;;  %v9017_v28 = vcombine.high %v4330_v39, %v4334_v44  ;;  %v4178_v26 = vld [vmem:[#allocation6 + $0xa80] sm:$0xff]  ;;  %v9001_v58 = vcombine.high %v4314_v62, %v4318_v20 }
 0x258   : > { %7055 = vmatprep.subr.bf16.mxu1 %v8921_v63  ;;  %v8888_v63 = vcombine.low %v4202_v35, %v4206_v36  ;;  %v4298_v48 = vld [vmem:[#allocation6 + $0xe40] sm:$0xff] }
 0x25a   : > { %7013 = vmatpush1.bf16.msra.mxu0 %v8792_v8 }
 0x25b   : > { %7014 = vmatprep.subr.bf16.mxu0 %v8785_v40  ;;  %7056 = vmatpush1.bf16.msra.mxu1 %v8920_v14  ;;  %v801_v40 = vrot.slane %v9457_v46, %v800_v52  ;;  %v4186_v14 = vld [vmem:[#allocation6 + $0xac0] sm:$0xff]  ;;  %v9008_v46 = vcombine.low %v4322_v15, %v4326_v25 }
 0x25c   : > { %7057 = vmatprep.subr.bf16.mxu1 %v8913_v18  ;;  %v8873_v22 = vcombine.high %v4186_v14, %v4190_v11  ;;  %v4166_v52 = vld [vmem:[#allocation6 + $0xa20] sm:$0xff] }
 0x25d   : > { %v3481_v19 = vadd.f32 %v9501_v31, %v801_v40  ;;  %v3477_v29 = vadd.f32 %v9495_v55, %v801_v40  ;;  %v4310_v31 = vld [vmem:[#allocation6 + $0xea0] sm:$0xff] }
 0x25e   : > { %7015 = vmatpush1.bf16.msra.mxu0 %v8784_v21  ;;  %v3611_v21 = vpop.f32.mrf.mxu1 }
 0x25f   : > { %7016 = vmatprep.subr.bf16.mxu0 %v8905_v38  ;;  %7058 = vmatpush1.bf16.msra.mxu1 %v8912_v17  ;;  %v8880_v38 = vcombine.low %v4194_v1, %v4198_v56  ;;  %v3524_v32 = vadd.f32 %v9498_v9, %v3481_v19  ;;  %v3520_v39 = vadd.f32 %v9487_v42, %v3477_v29 }
 0x260   : > { %7059 = vmatprep.subr.bf16.mxu1 %v9033_v2  ;;  %v4182_v2 = vld [vmem:[#allocation6 + $0xaa0] sm:$0xff] }
 0x261   : > { %v9505_v6 = vpop.f32.mrf.mxu0 }
 0x262   : > { %7017 = vmatpush2.bf16.msra.mxu0 %v8904_v41  ;;  %v4306_v41 = vld [vmem:[#allocation6 + $0xe80] sm:$0xff]  ;;  %v3563_v9 = vadd.f32 %v9505_v6, %v3520_v39 }
 0x263   : > { %v3564_v49 = vpop.f32.mrf.mxu0  ;;  %7018 = vmatprep.subr.bf16.mxu0 %v8897_v33  ;;  %7060 = vmatpush2.bf16.msra.mxu1 %v9032_v43  ;;  %v8872_v33 = vcombine.low %v4186_v14, %v4190_v11  ;;  %v8865_v43 = vcombine.high %v4178_v26, %v4182_v2  ;;  %v8992_v56 = vcombine.low %v4306_v41, %v4310_v31  ;;  %v3891_v11 = vld [vmem:[#allocation6 + $0x188] sm:$0xff] }
 0x264   : > { %v3565_v53 = vadd.f32 %v3564_v49, %v3522_v47  ;;  %7061 = vmatprep.subr.bf16.mxu1 %v9025_v37  ;;  %v9000_v37 = vcombine.low %v4314_v62, %v4318_v20  ;;  %v4170_v47 = vld [vmem:[#allocation6 + $0xa40] sm:$0xff]  ;;  %v3606_v15 = vadd.f32 %v9503_v45, %v3563_v9  ;;  %v3967_v9 = vld [vmem:[#allocation6 + $0x3e8] sm:$0xff] }
 0x265   : > { %v3566_v60 = vpop.f32.mrf.mxu0  ;;  %v4302_v49 = vld [vmem:[#allocation6 + $0xe60] sm:$0xff] }
 0x266   : > { %7019 = vmatpush2.bf16.msra.mxu0 %v8896_v59  ;;  %v3608_v5 = vadd.f32 %v3607_v23, %v3565_v53  ;;  %v3567_v55 = vadd.f32 %v3566_v60, %v3524_v32  ;;  %v4174_v23 = vld [vmem:[#allocation6 + $0xa60] sm:$0xff]  ;;  %v8993_v59 = vcombine.high %v4306_v41, %v4310_v31  ;;  %v8985_v53 = vcombine.high %v4298_v48, %v4302_v49  ;;  %v3859_v32 = vld [vmem:[#allocation6 + $0x88] sm:$0xff] }
 0x267   : > { %v3568_v8 = vpop.f32.mrf.mxu0  ;;  %7020 = vmatprep.subr.bf16.mxu0 %v8889_v50  ;;  %7062 = vmatpush2.bf16.msra.mxu1 %v9024_v10  ;;  %v8864_v50 = vcombine.low %v4178_v26, %v4182_v2  ;;  %v8857_v1 = vcombine.high %v4170_v47, %v4174_v23  ;;  %v4162_v10 = vld [vmem:[#allocation6 + $0xa00] sm:$0xff]  ;;  %v8856_v6 = vcombine.low %v4170_v47, %v4174_v23  ;;  %vm3790_vm11 = vcmp.gt.f32.partialorder %v3606_v15, 0.0  ;;  %v3875_v26 = vld [vmem:[#allocation6 + $0x108] sm:$0xff] }
 0x268   : > { %7063 = vmatprep.subr.bf16.mxu1 %v9017_v28  ;;  %v3569_v18 = vadd.f32 %v3568_v8, %v3526_v3  ;;  %v3807_v17 = vmul.f32 0.2, %v3608_v5  ;;  %vm3791_vm8 = vcmp.gt.f32.partialorder %v3608_v5, 0.0  ;;  %v3610_v42 = vadd.f32 %v9508_v61, %v3567_v55  ;;  %v4290_v28 = vld [vmem:[#allocation6 + $0xe00] sm:$0xff]  ;;  %v3899_v3 = vld [vmem:[#allocation6 + $0x1c8] sm:$0xff] }
 0x269   : > { %v4294_v60 = vld [vmem:[#allocation6 + $0xe20] sm:$0xff]  ;;  %v8849_v25 = vcombine.high %v4162_v10, %v4166_v52  ;;  %v3806_v61 = vmul.f32 0.2, %v3606_v15  ;;  %v3879_v2 = vld [vmem:[#allocation6 + $0x128] sm:$0xff] }
 0x26a   : > { %7021 = vmatpush2.bf16.msra.mxu0 %v8888_v63  ;;  %v3612_v12 = vadd.f32 %v3611_v21, %v3569_v18  ;;  %v3823_v35 = vsel %vm3791_vm8, %v3608_v5, %v3807_v17  ;;  %v8984_v63 = vcombine.low %v4298_v48, %v4302_v49  ;;  %v3903_v5 = vld [vmem:[#allocation6 + $0x1e8] sm:$0xff]  ;;  %v8977_v8 = vcombine.high %v4290_v28, %v4294_v60 }
 0x26b   : > { %7022 = vmatprep.subr.bf16.mxu0 %v8881_v0  ;;  %7064 = vmatpush2.bf16.msra.mxu1 %v9016_v24  ;;  %v3814_v0 = vmul.f32 0.2, %v3610_v42  ;;  %vm3798_vm10 = vcmp.gt.f32.partialorder %v3610_v42, 0.0  ;;  %v8848_v24 = vcombine.low %v4162_v10, %v4166_v52  ;;  %v8587_v40 = vcombine.high %v3899_v3, %v3903_v5  ;;  %v3887_v17 = vld [vmem:[#allocation6 + $0x168] sm:$0xff] }
 0x26c   : > { %7065 = vmatprep.subr.bf16.mxu1 %v9009_v57  ;;  %vm3799_vm9 = vcmp.gt.f32.partialorder %v3612_v12, 0.0  ;;  %v3815_v30 = vmul.f32 0.2, %v3612_v12  ;;  %v8976_v45 = vcombine.low %v4290_v28, %v4294_v60  ;;  %v3895_v57 = vld [vmem:[#allocation6 + $0x1a8] sm:$0xff]  ;;  %v8715_v18 = vcombine.high %v9489_v51, %v9491_v7 }
 0x26d   : > { %v3830_v14 = vsel %vm3798_vm10, %v3610_v42, %v3814_v0  ;;  %v3822_v62 = vsel %vm3790_vm11, %v3606_v15, %v3806_v61  ;;  %v8586_v20 = vcombine.low %v3899_v3, %v3903_v5  ;;  %v8579_v21 = vcombine.high %v3891_v11, %v3895_v57  ;;  %v3843_v47 = vld [vmem:[#allocation6 + $0x8] sm:$0xff] }
 0x26e   : > { %7023 = vmatpush2.bf16.msra.mxu0 %v8880_v38  ;;  %v3831_v36 = vsel %vm3799_vm9, %v3612_v12, %v3815_v30  ;;  %v9523_v19 = vpack.c.bf16 %v3830_v14, %v3822_v62  ;;  %v3883_v38 = vld [vmem:[#allocation6 + $0x148] sm:$0xff]  ;;  %v8578_v12 = vcombine.low %v3891_v11, %v3895_v57  ;;  %v8563_v29 = vcombine.high %v3875_v26, %v3879_v2 }
 0x26f   : > { %7024 = vmatprep.subr.bf16.mxu0 %v8873_v22  ;;  %7066 = vmatpush2.bf16.msra.mxu1 %v9008_v46  ;;  %v9515_v44 = vpack.c.bf16 %v3831_v36, %v3823_v35  ;;  %v8571_v22 = vcombine.high %v3883_v38, %v3887_v17  ;;  %v8570_v46 = vcombine.low %v3883_v38, %v3887_v17  ;;  %v3871_v30 = vld [vmem:[#allocation6 + $0xe8] sm:$0xff] }
 0x270   : > { %7067 = vmatprep.subr.bf16.mxu1 %v9001_v58  ;;  %v3867_v58 = vld [vmem:[#allocation6 + $0xc8] sm:$0xff]  ;;  %v8562_v41 = vcombine.low %v3875_v26, %v3879_v2 }
 0x271   : > { %7032 = vmatprep.mubr.bf16.mxu0 %v9515_v44  ;;  %v8555_v31 = vcombine.high %v3867_v58, %v3871_v30  ;;  %v3851_v36 = vld [vmem:[#allocation6 + $0x48] sm:$0xff] }
 0x272   : > { %7025 = vmatpush2.bf16.msra.mxu0 %v8872_v33  ;;  %v3863_v33 = vld [vmem:[#allocation6 + $0xa8] sm:$0xff] }
 0x273   : > { %7026 = vmatprep.subr.bf16.mxu0 %v8865_v43  ;;  %7068 = vmatpush2.bf16.msra.mxu1 %v9000_v37  ;;  %v8554_v43 = vcombine.low %v3867_v58, %v3871_v30  ;;  %v8547_v35 = vcombine.high %v3859_v32, %v3863_v33  ;;  %v3855_v37 = vld [vmem:[#allocation6 + $0x68] sm:$0xff]  ;;  %v8546_v39 = vcombine.low %v3859_v32, %v3863_v33  ;;  %v808_v58 = vsub.s32 6, %v9378_v34 }
 0x274   : > { %7069 = vmatprep.subr.bf16.mxu1 %v8993_v59  ;;  %v8539_v55 = vcombine.high %v3851_v36, %v3855_v37  ;;  %v3847_v23 = vld [vmem:[#allocation6 + $0x28] sm:$0xff]  ;;  %v8538_v59 = vcombine.low %v3851_v36, %v3855_v37  ;;  %v812_v30 = vsub.s32 7, %v9378_v34  ;;  %v9121_v36 = vld [vmem:[#allocation4] sm:$0xff] }
 0x275   : > { %v8531_v48 = vcombine.high %v3843_v47, %v3847_v23  ;;  %v3963_v49 = vld [vmem:[#allocation6 + $0x3c8] sm:$0xff]  ;;  %v809_v37 = vrot.slane %v9121_v36, %v808_v58 }
 0x276   : > { %7027 = vmatpush2.bf16.msra.mxu0 %v8864_v50  ;;  %v8530_v50 = vcombine.low %v3843_v47, %v3847_v23  ;;  %v3959_v42 = vld [vmem:[#allocation6 + $0x3a8] sm:$0xff]  ;;  %v8650_v10 = vcombine.low %v3963_v49, %v3967_v9 }
 0x277   : > { %7028 = vmatprep.subr.bf16.mxu0 %v8857_v1  ;;  %7070 = vmatpush2.bf16.msra.mxu1 %v8992_v56  ;;  %v8651_v1 = vcombine.high %v3963_v49, %v3967_v9  ;;  %v3955_v56 = vld [vmem:[#allocation6 + $0x388] sm:$0xff] }
 0x278   : > { %7071 = vmatprep.subr.bf16.mxu1 %v8985_v53  ;;  %v8643_v52 = vcombine.high %v3955_v56, %v3959_v42  ;;  %v3947_v53 = vld [vmem:[#allocation6 + $0x348] sm:$0xff]  ;;  %v8642_v60 = vcombine.low %v3955_v56, %v3959_v42 }
 0x279   : > { %v3951_v28 = vld [vmem:[#allocation6 + $0x368] sm:$0xff] }
 0x27a   : > { %7029 = vmatpush2.bf16.msra.mxu0 %v8856_v6  ;;  %v8635_v15 = vcombine.high %v3947_v53, %v3951_v28  ;;  %v3939_v6 = vld [vmem:[#allocation6 + $0x308] sm:$0xff] }
 0x27b   : > { %7030 = vmatprep.subr.bf16.mxu0 %v8849_v25  ;;  %7072 = vmatpush2.bf16.msra.mxu1 %v8984_v63  ;;  %v3943_v25 = vld [vmem:[#allocation6 + $0x328] sm:$0xff]  ;;  %v8634_v63 = vcombine.low %v3947_v53, %v3951_v28 }
 0x27c   : > { %7073 = vmatprep.subr.bf16.mxu1 %v8977_v8  ;;  %v8627_v0 = vcombine.high %v3939_v6, %v3943_v25  ;;  %v3931_v3 = vld [vmem:[#allocation6 + $0x2c8] sm:$0xff]  ;;  %v8626_v8 = vcombine.low %v3939_v6, %v3943_v25 }
 0x27d   : > { %v3935_v5 = vld [vmem:[#allocation6 + $0x2e8] sm:$0xff] }
 0x27e   : > { %7031 = vmatpush2.bf16.msra.mxu0 %v8848_v24  ;;  %v8619_v61 = vcombine.high %v3931_v3, %v3935_v5  ;;  %v3923_v24 = vld [vmem:[#allocation6 + $0x288] sm:$0xff] }
 0x27f   : > { %7086 = vmatprep.subr.bf16.mxu0 %v8587_v40  ;;  %7074 = vmatpush2.bf16.msra.mxu1 %v8976_v45  ;;  %v3927_v40 = vld [vmem:[#allocation6 + $0x2a8] sm:$0xff]  ;;  %v8618_v45 = vcombine.low %v3931_v3, %v3935_v5 }
 0x280   : > { %7129 = vmatprep.subr.bf16.mxu1 %v8715_v18  ;;  %v8611_v14 = vcombine.high %v3923_v24, %v3927_v40  ;;  %v3915_v11 = vld [vmem:[#allocation6 + $0x248] sm:$0xff]  ;;  %v8610_v18 = vcombine.low %v3923_v24, %v3927_v40 }
 0x281   : > { %7033 = vmatmul.mubr.bf16.vlgmr.msra.gmra.mxu0 %v9523_v19  ;;  %v3919_v57 = vld [vmem:[#allocation6 + $0x268] sm:$0xff] }
 0x282   : > { %7087 = vmatpush1.bf16.msra.mxu0 %v8586_v20  ;;  %7118 = vmatprep.mubr.bf16.mxu0 %v9478_v16  ;;  %v8603_v20 = vcombine.high %v3915_v11, %v3919_v57  ;;  %v3907_v38 = vld [vmem:[#allocation6 + $0x208] sm:$0xff] }
 0x283   : > { %7088 = vmatprep.subr.bf16.mxu0 %v8579_v21  ;;  %v3648_v21 = vpop.f32.mrf.mxu1  ;;  %v3911_v17 = vld [vmem:[#allocation6 + $0x228] sm:$0xff] }
 0x284   : > { %v8595_v26 = vcombine.high %v3907_v38, %v3911_v17  ;;  %v4143_v49 = vld [vmem:[#allocation6 + $0x968] sm:$0xff]  ;;  %v3649_v9 = vadd.f32 %v3648_v21, %v809_v37 }
 0x285   : > { %v3650_v2 = vpop.f32.mrf.mxu1  ;;  %v4131_v6 = vld [vmem:[#allocation6 + $0x908] sm:$0xff] }
 0x286   : > { %7089 = vmatpush1.bf16.msra.mxu0 %v8578_v12  ;;  %v8602_v12 = vcombine.low %v3915_v11, %v3919_v57  ;;  %v4135_v25 = vld [vmem:[#allocation6 + $0x928] sm:$0xff] }
 0x287   : > { %7090 = vmatprep.subr.bf16.mxu0 %v8571_v22  ;;  %v3652_v33 = vpop.f32.mrf.mxu1  ;;  %v4119_v58 = vld [vmem:[#allocation6 + $0x8a8] sm:$0xff] }
 0x288   : > { %v3995_v7 = vld [vmem:[#allocation6 + $0x4c8] sm:$0xff] }
 0x28a   : > { %7091 = vmatpush1.bf16.msra.mxu0 %v8570_v46  ;;  %v4155_v46 = vld [vmem:[#allocation6 + $0x9c8] sm:$0xff] }
 0x28b   : > { %7092 = vmatprep.subr.bf16.mxu0 %v8563_v29  ;;  %v4159_v29 = vld [vmem:[#allocation6 + $0x9e8] sm:$0xff] }
 0x28c   : > { %v8843_v32 = vcombine.high %v4155_v46, %v4159_v29 }
 0x28e   : > { %7093 = vmatpush1.bf16.msra.mxu0 %v8562_v41  ;;  %v8594_v41 = vcombine.low %v3907_v38, %v3911_v17  ;;  %v8818_v17 = vcombine.low %v4131_v6, %v4135_v25 }
 0x28f   : > { %7094 = vmatprep.subr.bf16.mxu0 %v8555_v31 }
 0x292   : > { %7095 = vmatpush1.bf16.msra.mxu0 %v8554_v43  ;;  %v4147_v43 = vld [vmem:[#allocation6 + $0x988] sm:$0xff] }
 0x293   : > { %7096 = vmatprep.subr.bf16.mxu0 %v8547_v35  ;;  %v4151_v35 = vld [vmem:[#allocation6 + $0x9a8] sm:$0xff] }
 0x294   : > { %v8835_v23 = vcombine.high %v4147_v43, %v4151_v35  ;;  %v8834_v42 = vcombine.low %v4147_v43, %v4151_v35  ;;  %v4023_v43 = vld [vmem:[#allocation6 + $0x5a8] sm:$0xff] }
 0x296   : > { %7097 = vmatpush1.bf16.msra.mxu0 %v8546_v39  ;;  %v813_v39 = vrot.slane %v9121_v36, %v812_v30 }
 0x297   : > { %7098 = vmatprep.subr.bf16.mxu0 %v8539_v55  ;;  %v8842_v55 = vcombine.low %v4155_v46, %v4159_v29  ;;  %v4115_v29 = vld [vmem:[#allocation6 + $0x888] sm:$0xff] }
 0x298   : > { %v8803_v35 = vcombine.high %v4115_v29, %v4119_v58 }
 0x29a   : > { %7099 = vmatpush1.bf16.msra.mxu0 %v8538_v59  ;;  %v3654_v59 = vpop.f32.mrf.mxu1 }
 0x29b   : > { %7100 = vmatprep.subr.bf16.mxu0 %v8531_v48  ;;  %v4139_v48 = vld [vmem:[#allocation6 + $0x948] sm:$0xff]  ;;  %v3655_v5 = vadd.f32 %v3654_v59, %v813_v39 }
 0x29e   : > { %7101 = vmatpush1.bf16.msra.mxu0 %v8530_v50  ;;  %v3651_v50 = vadd.f32 %v3650_v2, %v813_v39  ;;  %v4107_v39 = vld [vmem:[#allocation6 + $0x848] sm:$0xff] }
 0x29f   : > { %7102 = vmatprep.subr.bf16.mxu0 %v8651_v1 }
 0x2a1   : > { %v3691_v62 = vpop.f32.mrf.mxu0 }
 0x2a2   : > { %7103 = vmatpush2.bf16.msra.mxu0 %v8650_v10  ;;  %v3653_v10 = vadd.f32 %v3652_v33, %v809_v37  ;;  %v4019_v33 = vld [vmem:[#allocation6 + $0x588] sm:$0xff] }
 0x2a3   : > { %7104 = vmatprep.subr.bf16.mxu0 %v8643_v52  ;;  %v3693_v22 = vpop.f32.mrf.mxu0  ;;  %v3692_v52 = vadd.f32 %v3691_v62, %v3649_v9  ;;  %v4127_v62 = vld [vmem:[#allocation6 + $0x8e8] sm:$0xff] }
 0x2a4   : > { %v3694_v53 = vadd.f32 %v3693_v22, %v3651_v50  ;;  %v4011_v9 = vld [vmem:[#allocation6 + $0x548] sm:$0xff] }
 0x2a5   : > { %v3695_v31 = vpop.f32.mrf.mxu0  ;;  %v4015_v50 = vld [vmem:[#allocation6 + $0x568] sm:$0xff] }
 0x2a6   : > { %7105 = vmatpush2.bf16.msra.mxu0 %v8642_v60  ;;  %v8827_v60 = vcombine.high %v4139_v48, %v4143_v49 }
 0x2a7   : > { %7106 = vmatprep.subr.bf16.mxu0 %v8635_v15  ;;  %v3697_v47 = vpop.f32.mrf.mxu0 }
 0x2aa   : > { %7107 = vmatpush2.bf16.msra.mxu0 %v8634_v63  ;;  %v3696_v63 = vadd.f32 %v3695_v31, %v3653_v10  ;;  %v8706_v10 = vcombine.low %v4019_v33, %v4023_v43 }
 0x2ab   : > { %7108 = vmatprep.subr.bf16.mxu0 %v8627_v0 }
 0x2ae   : > { %7109 = vmatpush2.bf16.msra.mxu0 %v8626_v8 }
 0x2af   : > { %7110 = vmatprep.subr.bf16.mxu0 %v8619_v61  ;;  %v8826_v61 = vcombine.low %v4139_v48, %v4143_v49  ;;  %v8707_v48 = vcombine.high %v4019_v33, %v4023_v43  ;;  %v8802_v49 = vcombine.low %v4115_v29, %v4119_v58  ;;  %v3971_v58 = vld [vmem:[#allocation6 + $0x408] sm:$0xff] }
 0x2b2   : > { %7111 = vmatpush2.bf16.msra.mxu0 %v8618_v45  ;;  %v8819_v45 = vcombine.high %v4131_v6, %v4135_v25  ;;  %v4219_v6 = vld [vmem:[#allocation6 + $0xbc8] sm:$0xff] }
 0x2b3   : > { %7112 = vmatprep.subr.bf16.mxu0 %v8611_v14  ;;  %v3698_v14 = vadd.f32 %v3697_v47, %v3655_v5  ;;  %v4223_v25 = vld [vmem:[#allocation6 + $0xbe8] sm:$0xff] }
 0x2b4   : > { %v4211_v5 = vld [vmem:[#allocation6 + $0xb88] sm:$0xff] }
 0x2b6   : > { %7113 = vmatpush2.bf16.msra.mxu0 %v8610_v18  ;;  %v4123_v18 = vld [vmem:[#allocation6 + $0x8c8] sm:$0xff] }
 0x2b7   : > { %7114 = vmatprep.subr.bf16.mxu0 %v8603_v20  ;;  %v8810_v31 = vcombine.low %v4123_v18, %v4127_v62 }
 0x2ba   : > { %7115 = vmatpush2.bf16.msra.mxu0 %v8602_v12 }
 0x2bb   : > { %7116 = vmatprep.subr.bf16.mxu0 %v8595_v26  ;;  %v8811_v26 = vcombine.high %v4123_v18, %v4127_v62  ;;  %v4207_v18 = vld [vmem:[#allocation6 + $0xb68] sm:$0xff] }
 0x2be   : > { %7117 = vmatpush2.bf16.msra.mxu0 %v8594_v41 }
 0x2bf   : > { %7172 = vmatprep.subr.bf16.mxu0 %v8843_v32 }
 0x2c1   : > { %v3777_v1 = vpop.f32.mrf.mxu0  ;;  %7119 = vmatmul.mubr.bf16.vlgmr.msra.gmra.mxu0 %v9420_v13 }
 0x2c2   : > { %v3734_v56 = vpop.f32.mrf.mxu1  ;;  %7173 = vmatpush1.bf16.msra.mxu0 %v8842_v55  ;;  %7204 = vmatprep.mubr.bf16.mxu0 %v9515_v44  ;;  %v4111_v55 = vld [vmem:[#allocation6 + $0x868] sm:$0xff] }
 0x2c3   : > { %v3779_v28 = vpop.f32.mrf.mxu0  ;;  %7174 = vmatprep.subr.bf16.mxu0 %v8835_v23  ;;  %v3735_v0 = vadd.f32 %v3734_v56, %v3692_v52  ;;  %v4099_v56 = vld [vmem:[#allocation6 + $0x808] sm:$0xff]  ;;  %v8699_v52 = vcombine.high %v4011_v9, %v4015_v50 }
 0x2c4   : > { %v3736_v15 = vpop.f32.mrf.mxu1 }
 0x2c5   : > { %v3737_v3 = vadd.f32 %v3736_v15, %v3694_v53  ;;  %v3781_v40 = vpop.f32.mrf.mxu0  ;;  %v3778_v20 = vadd.f32 %v3777_v1, %v3735_v0  ;;  %v8795_v1 = vcombine.high %v4107_v39, %v4111_v55  ;;  %v8794_v53 = vcombine.low %v4107_v39, %v4111_v55  ;;  %v4179_v55 = vld [vmem:[#allocation6 + $0xa88] sm:$0xff] }
 0x2c6   : > { %v3738_v8 = vpop.f32.mrf.mxu1  ;;  %7175 = vmatpush1.bf16.msra.mxu0 %v8834_v42  ;;  %v4103_v42 = vld [vmem:[#allocation6 + $0x828] sm:$0xff] }
 0x2c7   : > { %v3739_v24 = vadd.f32 %v3738_v8, %v3696_v63  ;;  %7176 = vmatprep.subr.bf16.mxu0 %v8827_v60  ;;  %v3780_v11 = vadd.f32 %v3779_v28, %v3737_v3  ;;  %v3783_v22 = vpop.f32.mrf.mxu0  ;;  %v3808_v30 = vmul.f32 0.2, %v3778_v20  ;;  %vm3792_vm14 = vcmp.gt.f32.partialorder %v3778_v20, 0.0  ;;  %v4003_v28 = vld [vmem:[#allocation6 + $0x508] sm:$0xff] }
 0x2c8   : > { %v3740_v57 = vpop.f32.mrf.mxu1  ;;  %v4007_v60 = vld [vmem:[#allocation6 + $0x528] sm:$0xff]  ;;  %v8787_v15 = vcombine.high %v4099_v56, %v4103_v42  ;;  %v8698_v63 = vcombine.low %v4011_v9, %v4015_v50  ;;  %v8786_v51 = vcombine.low %v4099_v56, %v4103_v42  ;;  %v8907_v3 = vcombine.high %v4219_v6, %v4223_v25 }
 0x2c9   : > { %v3782_v21 = vadd.f32 %v3781_v40, %v3739_v24  ;;  %v3741_v38 = vadd.f32 %v3740_v57, %v3698_v14  ;;  %v3809_v2 = vmul.f32 0.2, %v3780_v11  ;;  %vm3793_vm13 = vcmp.gt.f32.partialorder %v3780_v11, 0.0  ;;  %v4215_v8 = vld [vmem:[#allocation6 + $0xba8] sm:$0xff] }
 0x2ca   : > { %7177 = vmatpush1.bf16.msra.mxu0 %v8826_v61  ;;  %v3824_v47 = vsel %vm3792_vm14, %v3778_v20, %v3808_v30  ;;  %v8691_v0 = vcombine.high %v4003_v28, %v4007_v60  ;;  %v8690_v61 = vcombine.low %v4003_v28, %v4007_v60  ;;  %v8906_v40 = vcombine.low %v4219_v6, %v4223_v25  ;;  %v3991_v14 = vld [vmem:[#allocation6 + $0x4a8] sm:$0xff] }
 0x2cb   : > { %v3816_v12 = vmul.f32 0.2, %v3782_v21  ;;  %7178 = vmatprep.subr.bf16.mxu0 %v8819_v45  ;;  %vm3800_vm12 = vcmp.gt.f32.partialorder %v3782_v21, 0.0  ;;  %v3784_v46 = vadd.f32 %v3783_v22, %v3741_v38  ;;  %v3825_v36 = vsel %vm3793_vm13, %v3780_v11, %v3809_v2  ;;  %v3987_v45 = vld [vmem:[#allocation6 + $0x488] sm:$0xff] }
 0x2cc   : > { %v8899_v11 = vcombine.high %v4211_v5, %v4215_v8  ;;  %v4203_v57 = vld [vmem:[#allocation6 + $0xb48] sm:$0xff]  ;;  %v8675_v20 = vcombine.high %v3987_v45, %v3991_v14  ;;  %v8674_v2 = vcombine.low %v3987_v45, %v3991_v14 }
 0x2cd   : > { %vm3801_vm15 = vcmp.gt.f32.partialorder %v3784_v46, 0.0  ;;  %v3817_v41 = vmul.f32 0.2, %v3784_v46  ;;  %v3832_v32 = vsel %vm3800_vm12, %v3782_v21, %v3816_v12  ;;  %v8898_v21 = vcombine.low %v4211_v5, %v4215_v8  ;;  %v3979_v38 = vld [vmem:[#allocation6 + $0x448] sm:$0xff]  ;;  %v3900_v8 = vld [vmem:[#allocation6 + $0x1d0] sm:$0xff] }
 0x2ce   : > { %7179 = vmatpush1.bf16.msra.mxu0 %v8818_v17  ;;  %v9533_v59 = vpack.c.bf16 %v3832_v32, %v3824_v47  ;;  %v3983_v17 = vld [vmem:[#allocation6 + $0x468] sm:$0xff]  ;;  %v8891_v12 = vcombine.high %v4203_v57, %v4207_v18  ;;  %v8890_v29 = vcombine.low %v4203_v57, %v4207_v18  ;;  %v3892_v18 = vld [vmem:[#allocation6 + $0x190] sm:$0xff] }
 0x2cf   : > { %7180 = vmatprep.subr.bf16.mxu0 %v8811_v26  ;;  %v3833_v37 = vsel %vm3801_vm15, %v3784_v46, %v3817_v41  ;;  %v4195_v22 = vld [vmem:[#allocation6 + $0xb08] sm:$0xff]  ;;  %v8667_v46 = vcombine.high %v3979_v38, %v3983_v17  ;;  %v8666_v33 = vcombine.low %v3979_v38, %v3983_v17 }
 0x2d0   : > { %v9531_v23 = vpack.c.bf16 %v3833_v37, %v3825_v36  ;;  %v4199_v26 = vld [vmem:[#allocation6 + $0xb28] sm:$0xff] }
 0x2d1   : > { %v3975_v30 = vld [vmem:[#allocation6 + $0x428] sm:$0xff]  ;;  %v8883_v41 = vcombine.high %v4195_v22, %v4199_v26 }
 0x2d2   : > { %7181 = vmatpush1.bf16.msra.mxu0 %v8810_v31  ;;  %7075 = vmatprep.mubr.bf16.mxu1 %v9531_v23  ;;  %v4187_v31 = vld [vmem:[#allocation6 + $0xac8] sm:$0xff]  ;;  %v8659_v43 = vcombine.high %v3971_v58, %v3975_v30 }
 0x2d3   : > { %7182 = vmatprep.subr.bf16.mxu0 %v8803_v35  ;;  %7076 = vmatmul.mubr.bf16.vlgmr.msra.gmra.mxu1 %v9533_v59  ;;  %v4191_v32 = vld [vmem:[#allocation6 + $0xae8] sm:$0xff]  ;;  %v8882_v35 = vcombine.low %v4195_v22, %v4199_v26  ;;  %v3884_v26 = vld [vmem:[#allocation6 + $0x150] sm:$0xff] }
 0x2d4   : > { %7130 = vmatpush1.bf16.msra.mxu1 %v8714_v54  ;;  %7161 = vmatprep.mubr.bf16.mxu1 %v9480_v4  ;;  %v3999_v54 = vld [vmem:[#allocation6 + $0x4e8] sm:$0xff]  ;;  %v8875_v39 = vcombine.high %v4187_v31, %v4191_v32  ;;  %v8874_v9 = vcombine.low %v4187_v31, %v4191_v32  ;;  %v3876_v32 = vld [vmem:[#allocation6 + $0x110] sm:$0xff] }
 0x2d5   : > { %7131 = vmatprep.subr.bf16.mxu1 %v8707_v48  ;;  %v8683_v24 = vcombine.high %v3995_v7, %v3999_v54  ;;  %v8682_v62 = vcombine.low %v3995_v7, %v3999_v54  ;;  %v4091_v36 = vld [vmem:[#allocation6 + $0x7c8] sm:$0xff]  ;;  %v8658_v48 = vcombine.low %v3971_v58, %v3975_v30 }
 0x2d6   : > { %7183 = vmatpush1.bf16.msra.mxu0 %v8802_v49  ;;  %v4095_v37 = vld [vmem:[#allocation6 + $0x7e8] sm:$0xff] }
 0x2d7   : > { %7184 = vmatprep.subr.bf16.mxu0 %v8795_v1  ;;  %v4183_v47 = vld [vmem:[#allocation6 + $0xaa8] sm:$0xff]  ;;  %v8779_v49 = vcombine.high %v4091_v36, %v4095_v37 }
 0x2d8   : > { %7132 = vmatpush1.bf16.msra.mxu1 %v8706_v10  ;;  %v4083_v50 = vld [vmem:[#allocation6 + $0x788] sm:$0xff]  ;;  %v8867_v56 = vcombine.high %v4179_v55, %v4183_v47  ;;  %v8866_v28 = vcombine.low %v4179_v55, %v4183_v47  ;;  %v3868_v47 = vld [vmem:[#allocation6 + $0xd0] sm:$0xff] }
 0x2d9   : > { %7133 = vmatprep.subr.bf16.mxu1 %v8699_v52  ;;  %v4087_v1 = vld [vmem:[#allocation6 + $0x7a8] sm:$0xff]  ;;  %v8778_v52 = vcombine.low %v4091_v36, %v4095_v37 }
 0x2da   : > { %7185 = vmatpush1.bf16.msra.mxu0 %v8794_v53  ;;  %v4171_v42 = vld [vmem:[#allocation6 + $0xa48] sm:$0xff]  ;;  %v8771_v53 = vcombine.high %v4083_v50, %v4087_v1 }
 0x2db   : > { %7186 = vmatprep.subr.bf16.mxu0 %v8787_v15  ;;  %v4175_v10 = vld [vmem:[#allocation6 + $0xa68] sm:$0xff] }
 0x2dc   : > { %7134 = vmatpush1.bf16.msra.mxu1 %v8698_v63  ;;  %v4075_v60 = vld [vmem:[#allocation6 + $0x748] sm:$0xff]  ;;  %v8859_v6 = vcombine.high %v4171_v42, %v4175_v10  ;;  %v8858_v7 = vcombine.low %v4171_v42, %v4175_v10  ;;  %v3860_v10 = vld [vmem:[#allocation6 + $0x90] sm:$0xff] }
 0x2dd   : > { %7135 = vmatprep.subr.bf16.mxu1 %v8691_v0  ;;  %v4079_v15 = vld [vmem:[#allocation6 + $0x768] sm:$0xff]  ;;  %v8770_v0 = vcombine.low %v4083_v50, %v4087_v1 }
 0x2de   : > { %7187 = vmatpush1.bf16.msra.mxu0 %v8786_v51  ;;  %v4163_v25 = vld [vmem:[#allocation6 + $0xa08] sm:$0xff]  ;;  %v8763_v51 = vcombine.high %v4075_v60, %v4079_v15 }
 0x2df   : > { %7188 = vmatprep.subr.bf16.mxu0 %v8907_v3  ;;  %v4167_v63 = vld [vmem:[#allocation6 + $0xa28] sm:$0xff] }
 0x2e0   : > { %7136 = vmatpush1.bf16.msra.mxu1 %v8690_v61  ;;  %v4067_v54 = vld [vmem:[#allocation6 + $0x708] sm:$0xff]  ;;  %v8851_v5 = vcombine.high %v4163_v25, %v4167_v63  ;;  %v3904_v61 = vld [vmem:[#allocation6 + $0x1f0] sm:$0xff]  ;;  %v8850_v45 = vcombine.low %v4163_v25, %v4167_v63 }
 0x2e1   : > { %7137 = vmatprep.subr.bf16.mxu1 %v8683_v24  ;;  %v4071_v3 = vld [vmem:[#allocation6 + $0x728] sm:$0xff]  ;;  %v8762_v24 = vcombine.low %v4075_v60, %v4079_v15  ;;  %v8589_v57 = vcombine.high %v3900_v8, %v3904_v61  ;;  %v8588_v38 = vcombine.low %v3900_v8, %v3904_v61  ;;  %v3852_v63 = vld [vmem:[#allocation6 + $0x50] sm:$0xff] }
 0x2e2   : > { %7189 = vmatpush2.bf16.msra.mxu0 %v8906_v40  ;;  %v8755_v40 = vcombine.high %v4067_v54, %v4071_v3  ;;  %v4059_v14 = vld [vmem:[#allocation6 + $0x6c8] sm:$0xff]  ;;  %v3844_v61 = vld [vmem:[#allocation6 + $0x10] sm:$0xff] }
 0x2e3   : > { %7190 = vmatprep.subr.bf16.mxu0 %v8899_v11  ;;  %v4063_v11 = vld [vmem:[#allocation6 + $0x6e8] sm:$0xff] }
 0x2e4   : > { %7138 = vmatpush1.bf16.msra.mxu1 %v8682_v62  ;;  %v3896_v62 = vld [vmem:[#allocation6 + $0x1b0] sm:$0xff]  ;;  %v4051_v17 = vld [vmem:[#allocation6 + $0x688] sm:$0xff] }
 0x2e5   : > { %7139 = vmatprep.subr.bf16.mxu1 %v8675_v20  ;;  %v8754_v20 = vcombine.low %v4067_v54, %v4071_v3  ;;  %v8581_v22 = vcombine.high %v3892_v18, %v3896_v62  ;;  %v8580_v58 = vcombine.low %v3892_v18, %v3896_v62  ;;  %v4043_v30 = vld [vmem:[#allocation6 + $0x648] sm:$0xff]  ;;  %v3964_v62 = vld [vmem:[#allocation6 + $0x3d0] sm:$0xff] }
 0x2e6   : > { %7191 = vmatpush2.bf16.msra.mxu0 %v8898_v21  ;;  %v8747_v21 = vcombine.high %v4059_v14, %v4063_v11  ;;  %v4035_v37 = vld [vmem:[#allocation6 + $0x608] sm:$0xff] }
 0x2e7   : > { %7192 = vmatprep.subr.bf16.mxu0 %v8891_v12  ;;  %v4055_v12 = vld [vmem:[#allocation6 + $0x6a8] sm:$0xff] }
 0x2e8   : > { %7140 = vmatpush1.bf16.msra.mxu1 %v8674_v2  ;;  %v3888_v2 = vld [vmem:[#allocation6 + $0x170] sm:$0xff]  ;;  %v4283_v1 = vld [vmem:[#allocation6 + $0xdc8] sm:$0xff] }
 0x2e9   : > { %7141 = vmatprep.subr.bf16.mxu1 %v8667_v46  ;;  %v8746_v46 = vcombine.low %v4059_v14, %v4063_v11  ;;  %v8573_v31 = vcombine.high %v3884_v26, %v3888_v2  ;;  %v8572_v36 = vcombine.low %v3884_v26, %v3888_v2  ;;  %v4275_v15 = vld [vmem:[#allocation6 + $0xd88] sm:$0xff]  ;;  %v3956_v2 = vld [vmem:[#allocation6 + $0x390] sm:$0xff] }
 0x2ea   : > { %7193 = vmatpush2.bf16.msra.mxu0 %v8890_v29  ;;  %v8739_v29 = vcombine.high %v4051_v17, %v4055_v12  ;;  %v4267_v3 = vld [vmem:[#allocation6 + $0xd48] sm:$0xff] }
 0x2eb   : > { %7194 = vmatprep.subr.bf16.mxu0 %v8883_v41  ;;  %v4047_v41 = vld [vmem:[#allocation6 + $0x668] sm:$0xff] }
 0x2ec   : > { %7142 = vmatpush1.bf16.msra.mxu1 %v8666_v33  ;;  %v3880_v33 = vld [vmem:[#allocation6 + $0x130] sm:$0xff]  ;;  %v4259_v11 = vld [vmem:[#allocation6 + $0xd08] sm:$0xff] }
 0x2ed   : > { %7143 = vmatprep.subr.bf16.mxu1 %v8659_v43  ;;  %v8738_v43 = vcombine.low %v4051_v17, %v4055_v12  ;;  %v8565_v55 = vcombine.high %v3876_v32, %v3880_v33  ;;  %v8564_v50 = vcombine.low %v3876_v32, %v3880_v33  ;;  %v4251_v12 = vld [vmem:[#allocation6 + $0xcc8] sm:$0xff]  ;;  %v3948_v33 = vld [vmem:[#allocation6 + $0x350] sm:$0xff] }
 0x2ee   : > { %7195 = vmatpush2.bf16.msra.mxu0 %v8882_v35  ;;  %v8731_v35 = vcombine.high %v4043_v30, %v4047_v41 }
 0x2ef   : > { %7196 = vmatprep.subr.bf16.mxu0 %v8875_v39  ;;  %v4039_v39 = vld [vmem:[#allocation6 + $0x628] sm:$0xff] }
 0x2f0   : > { %7144 = vmatpush1.bf16.msra.mxu1 %v8658_v48  ;;  %v3872_v48 = vld [vmem:[#allocation6 + $0xf0] sm:$0xff] }
 0x2f1   : > { %7145 = vmatprep.subr.bf16.mxu1 %v8779_v49  ;;  %v8730_v49 = vcombine.low %v4043_v30, %v4047_v41  ;;  %v8557_v42 = vcombine.high %v3868_v47, %v3872_v48  ;;  %v8556_v60 = vcombine.low %v3868_v47, %v3872_v48  ;;  %v4243_v41 = vld [vmem:[#allocation6 + $0xc88] sm:$0xff]  ;;  %v3940_v48 = vld [vmem:[#allocation6 + $0x310] sm:$0xff] }
 0x2f2   : > { %7197 = vmatpush2.bf16.msra.mxu0 %v8874_v9  ;;  %v8723_v9 = vcombine.high %v4035_v37, %v4039_v39 }
 0x2f3   : > { %7198 = vmatprep.subr.bf16.mxu0 %v8867_v56  ;;  %v4287_v56 = vld [vmem:[#allocation6 + $0xde8] sm:$0xff] }
 0x2f4   : > { %7146 = vmatpush2.bf16.msra.mxu1 %v8778_v52  ;;  %v3864_v52 = vld [vmem:[#allocation6 + $0xb0] sm:$0xff] }
 0x2f5   : > { %7147 = vmatprep.subr.bf16.mxu1 %v8771_v53  ;;  %v8722_v53 = vcombine.low %v4035_v37, %v4039_v39  ;;  %v8549_v25 = vcombine.high %v3860_v10, %v3864_v52  ;;  %v8548_v54 = vcombine.low %v3860_v10, %v3864_v52  ;;  %v4235_v39 = vld [vmem:[#allocation6 + $0xc48] sm:$0xff]  ;;  %v3932_v52 = vld [vmem:[#allocation6 + $0x2d0] sm:$0xff] }
 0x2f6   : > { %7199 = vmatpush2.bf16.msra.mxu0 %v8866_v28  ;;  %v8971_v28 = vcombine.high %v4283_v1, %v4287_v56 }
 0x2f7   : > { %7200 = vmatprep.subr.bf16.mxu0 %v8859_v6  ;;  %v4279_v6 = vld [vmem:[#allocation6 + $0xda8] sm:$0xff] }
 0x2f8   : > { %7148 = vmatpush2.bf16.msra.mxu1 %v8770_v0  ;;  %v3856_v0 = vld [vmem:[#allocation6 + $0x70] sm:$0xff] }
 0x2f9   : > { %7149 = vmatprep.subr.bf16.mxu1 %v8763_v51  ;;  %v8970_v51 = vcombine.low %v4283_v1, %v4287_v56  ;;  %v8541_v8 = vcombine.high %v3852_v63, %v3856_v0  ;;  %v8540_v14 = vcombine.low %v3852_v63, %v3856_v0  ;;  %v4227_v56 = vld [vmem:[#allocation6 + $0xc08] sm:$0xff]  ;;  %v3924_v0 = vld [vmem:[#allocation6 + $0x290] sm:$0xff] }
 0x2fa   : > { %7201 = vmatpush2.bf16.msra.mxu0 %v8858_v7  ;;  %v8963_v7 = vcombine.high %v4275_v15, %v4279_v6 }
 0x2fb   : > { %7202 = vmatprep.subr.bf16.mxu0 %v8851_v5  ;;  %v4271_v5 = vld [vmem:[#allocation6 + $0xd68] sm:$0xff] }
 0x2fc   : > { %7150 = vmatpush2.bf16.msra.mxu1 %v8762_v24  ;;  %v3848_v24 = vld [vmem:[#allocation6 + $0x30] sm:$0xff] }
 0x2fd   : > { %7151 = vmatprep.subr.bf16.mxu1 %v8755_v40  ;;  %v8962_v40 = vcombine.low %v4275_v15, %v4279_v6  ;;  %v8533_v18 = vcombine.high %v3844_v61, %v3848_v24  ;;  %v8532_v17 = vcombine.low %v3844_v61, %v3848_v24  ;;  %v4347_v6 = vld [vmem:[#allocation6 + $0xfc8] sm:$0xff]  ;;  %v3916_v24 = vld [vmem:[#allocation6 + $0x250] sm:$0xff] }
 0x2fe   : > { %7203 = vmatpush2.bf16.msra.mxu0 %v8850_v45  ;;  %v8955_v45 = vcombine.high %v4267_v3, %v4271_v5 }
 0x2ff   : > { %7258 = vmatprep.subr.bf16.mxu0 %v8589_v57  ;;  %v4263_v57 = vld [vmem:[#allocation6 + $0xd28] sm:$0xff] }
 0x300   : > { %7152 = vmatpush2.bf16.msra.mxu1 %v8754_v20  ;;  %v3968_v20 = vld [vmem:[#allocation6 + $0x3f0] sm:$0xff] }
 0x301   : > { %7205 = vmatmul.mubr.bf16.vlgmr.msra.gmra.mxu0 %v9523_v19  ;;  %7153 = vmatprep.subr.bf16.mxu1 %v8747_v21  ;;  %v8954_v21 = vcombine.low %v4267_v3, %v4271_v5  ;;  %v8653_v26 = vcombine.high %v3964_v62, %v3968_v20  ;;  %v8652_v30 = vcombine.low %v3964_v62, %v3968_v20  ;;  %v4339_v5 = vld [vmem:[#allocation6 + $0xf88] sm:$0xff]  ;;  %v3908_v20 = vld [vmem:[#allocation6 + $0x210] sm:$0xff] }
 0x302   : > { %7259 = vmatpush1.bf16.msra.mxu0 %v8588_v38  ;;  %7290 = vmatprep.mubr.bf16.mxu0 %v9478_v16  ;;  %v8947_v38 = vcombine.high %v4259_v11, %v4263_v57 }
 0x303   : > { %7260 = vmatprep.subr.bf16.mxu0 %v8581_v22  ;;  %v4255_v22 = vld [vmem:[#allocation6 + $0xce8] sm:$0xff] }
 0x304   : > { %7154 = vmatpush2.bf16.msra.mxu1 %v8746_v46  ;;  %v3960_v46 = vld [vmem:[#allocation6 + $0x3b0] sm:$0xff] }
 0x305   : > { %7155 = vmatprep.subr.bf16.mxu1 %v8739_v29  ;;  %v8946_v29 = vcombine.low %v4259_v11, %v4263_v57  ;;  %v8645_v32 = vcombine.high %v3956_v2, %v3960_v46  ;;  %v8644_v37 = vcombine.low %v3956_v2, %v3960_v46  ;;  %v4331_v57 = vld [vmem:[#allocation6 + $0xf48] sm:$0xff]  ;;  %v4156_v46 = vld [vmem:[#allocation6 + $0x9d0] sm:$0xff] }
 0x306   : > { %7261 = vmatpush1.bf16.msra.mxu0 %v8580_v58  ;;  %v8939_v58 = vcombine.high %v4251_v12, %v4255_v22 }
 0x307   : > { %7262 = vmatprep.subr.bf16.mxu0 %v8573_v31  ;;  %v4247_v31 = vld [vmem:[#allocation6 + $0xca8] sm:$0xff] }
 0x308   : > { %7156 = vmatpush2.bf16.msra.mxu1 %v8738_v43  ;;  %v3952_v43 = vld [vmem:[#allocation6 + $0x370] sm:$0xff] }
 0x309   : > { %7157 = vmatprep.subr.bf16.mxu1 %v8731_v35  ;;  %v8938_v35 = vcombine.low %v4251_v12, %v4255_v22  ;;  %v8637_v47 = vcombine.high %v3948_v33, %v3952_v43  ;;  %v8636_v1 = vcombine.low %v3948_v33, %v3952_v43  ;;  %v4323_v22 = vld [vmem:[#allocation6 + $0xf08] sm:$0xff]  ;;  %v4148_v43 = vld [vmem:[#allocation6 + $0x990] sm:$0xff] }
 0x30a   : > { %7263 = vmatpush1.bf16.msra.mxu0 %v8572_v36  ;;  %v8931_v36 = vcombine.high %v4243_v41, %v4247_v31 }
 0x30b   : > { %7264 = vmatprep.subr.bf16.mxu0 %v8565_v55  ;;  %v4239_v55 = vld [vmem:[#allocation6 + $0xc68] sm:$0xff] }
 0x30c   : > { %7158 = vmatpush2.bf16.msra.mxu1 %v8730_v49  ;;  %v3944_v49 = vld [vmem:[#allocation6 + $0x330] sm:$0xff] }
 0x30d   : > { %7159 = vmatprep.subr.bf16.mxu1 %v8723_v9  ;;  %v8930_v9 = vcombine.low %v4243_v41, %v4247_v31  ;;  %v8629_v10 = vcombine.high %v3940_v48, %v3944_v49  ;;  %v8628_v15 = vcombine.low %v3940_v48, %v3944_v49  ;;  %v4315_v31 = vld [vmem:[#allocation6 + $0xec8] sm:$0xff]  ;;  %v4140_v49 = vld [vmem:[#allocation6 + $0x950] sm:$0xff] }
 0x30e   : > { %7265 = vmatpush1.bf16.msra.mxu0 %v8564_v50  ;;  %v8923_v50 = vcombine.high %v4235_v39, %v4239_v55 }
 0x30f   : > { %7266 = vmatprep.subr.bf16.mxu0 %v8557_v42  ;;  %v4231_v42 = vld [vmem:[#allocation6 + $0xc28] sm:$0xff] }
 0x310   : > { %7160 = vmatpush2.bf16.msra.mxu1 %v8722_v53  ;;  %v3936_v53 = vld [vmem:[#allocation6 + $0x2f0] sm:$0xff] }
 0x311   : > { %7215 = vmatprep.subr.bf16.mxu1 %v8971_v28  ;;  %v8922_v28 = vcombine.low %v4235_v39, %v4239_v55  ;;  %v8621_v63 = vcombine.high %v3932_v52, %v3936_v53  ;;  %v8620_v3 = vcombine.low %v3932_v52, %v3936_v53  ;;  %v4307_v55 = vld [vmem:[#allocation6 + $0xe88] sm:$0xff]  ;;  %v4132_v53 = vld [vmem:[#allocation6 + $0x910] sm:$0xff] }
 0x312   : > { %7267 = vmatpush1.bf16.msra.mxu0 %v8556_v60  ;;  %v8915_v60 = vcombine.high %v4227_v56, %v4231_v42 }
 0x313   : > { %7268 = vmatprep.subr.bf16.mxu0 %v8549_v25  ;;  %7162 = vmatmul.mubr.bf16.vlgmr.msra.gmra.mxu1 %v9463_v27  ;;  %v4351_v25 = vld [vmem:[#allocation6 + $0xfe8] sm:$0xff] }
 0x314   : > { %7216 = vmatpush1.bf16.msra.mxu1 %v8970_v51  ;;  %7247 = vmatprep.mubr.bf16.mxu1 %v9531_v23  ;;  %v3928_v51 = vld [vmem:[#allocation6 + $0x2b0] sm:$0xff] }
 0x315   : > { %7217 = vmatprep.subr.bf16.mxu1 %v8963_v7  ;;  %v8914_v7 = vcombine.low %v4227_v56, %v4231_v42  ;;  %v8613_v61 = vcombine.high %v3924_v0, %v3928_v51  ;;  %v8612_v11 = vcombine.low %v3924_v0, %v3928_v51  ;;  %v4299_v42 = vld [vmem:[#allocation6 + $0xe48] sm:$0xff]  ;;  %v4124_v51 = vld [vmem:[#allocation6 + $0x8d0] sm:$0xff] }
 0x316   : > { %7269 = vmatpush1.bf16.msra.mxu0 %v8548_v54  ;;  %v9035_v54 = vcombine.high %v4347_v6, %v4351_v25 }
 0x317   : > { %7270 = vmatprep.subr.bf16.mxu0 %v8541_v8  ;;  %v4343_v8 = vld [vmem:[#allocation6 + $0xfa8] sm:$0xff] }
 0x318   : > { %7218 = vmatpush1.bf16.msra.mxu1 %v8962_v40  ;;  %v3920_v40 = vld [vmem:[#allocation6 + $0x270] sm:$0xff] }
 0x319   : > { %7219 = vmatprep.subr.bf16.mxu1 %v8955_v45  ;;  %v9034_v45 = vcombine.low %v4347_v6, %v4351_v25  ;;  %v8605_v62 = vcombine.high %v3916_v24, %v3920_v40  ;;  %v8604_v12 = vcombine.low %v3916_v24, %v3920_v40  ;;  %v4291_v25 = vld [vmem:[#allocation6 + $0xe08] sm:$0xff]  ;;  %v4116_v40 = vld [vmem:[#allocation6 + $0x890] sm:$0xff] }
 0x31a   : > { %7271 = vmatpush1.bf16.msra.mxu0 %v8540_v14  ;;  %v9027_v14 = vcombine.high %v4339_v5, %v4343_v8 }
 0x31b   : > { %7272 = vmatprep.subr.bf16.mxu0 %v8533_v18  ;;  %v4335_v18 = vld [vmem:[#allocation6 + $0xf68] sm:$0xff] }
 0x31c   : > { %7220 = vmatpush1.bf16.msra.mxu1 %v8954_v21  ;;  %v3912_v21 = vld [vmem:[#allocation6 + $0x230] sm:$0xff] }
 0x31d   : > { %7221 = vmatprep.subr.bf16.mxu1 %v8947_v38  ;;  %v9026_v38 = vcombine.low %v4339_v5, %v4343_v8  ;;  %v8597_v2 = vcombine.high %v3908_v20, %v3912_v21  ;;  %v8596_v41 = vcombine.low %v3908_v20, %v3912_v21  ;;  %v4028_v8 = vld [vmem:[#allocation6 + $0x5d0] sm:$0xff] }
 0x31e   : > { %7273 = vmatpush1.bf16.msra.mxu0 %v8532_v17  ;;  %v9019_v17 = vcombine.high %v4331_v57, %v4335_v18  ;;  %v4108_v21 = vld [vmem:[#allocation6 + $0x850] sm:$0xff] }
 0x31f   : > { %7274 = vmatprep.subr.bf16.mxu0 %v8653_v26  ;;  %v4327_v26 = vld [vmem:[#allocation6 + $0xf28] sm:$0xff] }
 0x320   : > { %7222 = vmatpush1.bf16.msra.mxu1 %v8946_v29  ;;  %v4160_v29 = vld [vmem:[#allocation6 + $0x9f0] sm:$0xff] }
 0x321   : > { %7223 = vmatprep.subr.bf16.mxu1 %v8939_v58  ;;  %v9018_v58 = vcombine.low %v4331_v57, %v4335_v18  ;;  %v8845_v33 = vcombine.high %v4156_v46, %v4160_v29  ;;  %v8844_v39 = vcombine.low %v4156_v46, %v4160_v29  ;;  %v4020_v18 = vld [vmem:[#allocation6 + $0x590] sm:$0xff] }
 0x322   : > { %7275 = vmatpush2.bf16.msra.mxu0 %v8652_v30  ;;  %v9011_v30 = vcombine.high %v4323_v22, %v4327_v26  ;;  %v4100_v29 = vld [vmem:[#allocation6 + $0x810] sm:$0xff] }
 0x323   : > { %7276 = vmatprep.subr.bf16.mxu0 %v8645_v32  ;;  %v4319_v32 = vld [vmem:[#allocation6 + $0xee8] sm:$0xff] }
 0x324   : > { %7224 = vmatpush1.bf16.msra.mxu1 %v8938_v35  ;;  %v4152_v35 = vld [vmem:[#allocation6 + $0x9b0] sm:$0xff] }
 0x325   : > { %7225 = vmatprep.subr.bf16.mxu1 %v8931_v36  ;;  %v9010_v36 = vcombine.low %v4323_v22, %v4327_v26  ;;  %v8837_v48 = vcombine.high %v4148_v43, %v4152_v35  ;;  %v8836_v56 = vcombine.low %v4148_v43, %v4152_v35  ;;  %v4012_v26 = vld [vmem:[#allocation6 + $0x550] sm:$0xff] }
 0x326   : > { %7277 = vmatpush2.bf16.msra.mxu0 %v8644_v37  ;;  %v9003_v37 = vcombine.high %v4315_v31, %v4319_v32  ;;  %v4220_v35 = vld [vmem:[#allocation6 + $0xbd0] sm:$0xff] }
 0x327   : > { %7278 = vmatprep.subr.bf16.mxu0 %v8637_v47  ;;  %v4311_v47 = vld [vmem:[#allocation6 + $0xea8] sm:$0xff] }
 0x328   : > { %7226 = vmatpush1.bf16.msra.mxu1 %v8930_v9  ;;  %v4144_v9 = vld [vmem:[#allocation6 + $0x970] sm:$0xff] }
 0x329   : > { %7227 = vmatprep.subr.bf16.mxu1 %v8923_v50  ;;  %v9002_v50 = vcombine.low %v4315_v31, %v4319_v32  ;;  %v8829_v52 = vcombine.high %v4140_v49, %v4144_v9  ;;  %v8828_v6 = vcombine.low %v4140_v49, %v4144_v9  ;;  %v4004_v32 = vld [vmem:[#allocation6 + $0x510] sm:$0xff] }
 0x32a   : > { %7279 = vmatpush2.bf16.msra.mxu0 %v8636_v1  ;;  %v8995_v1 = vcombine.high %v4307_v55, %v4311_v47  ;;  %v4212_v9 = vld [vmem:[#allocation6 + $0xb90] sm:$0xff] }
 0x32b   : > { %7280 = vmatprep.subr.bf16.mxu0 %v8629_v10  ;;  %v4303_v10 = vld [vmem:[#allocation6 + $0xe68] sm:$0xff] }
 0x32c   : > { %7228 = vmatpush1.bf16.msra.mxu1 %v8922_v28  ;;  %v4136_v28 = vld [vmem:[#allocation6 + $0x930] sm:$0xff] }
 0x32d   : > { %7229 = vmatprep.subr.bf16.mxu1 %v8915_v60  ;;  %v8994_v60 = vcombine.low %v4307_v55, %v4311_v47  ;;  %v8821_v0 = vcombine.high %v4132_v53, %v4136_v28  ;;  %v8820_v5 = vcombine.low %v4132_v53, %v4136_v28  ;;  %v3996_v47 = vld [vmem:[#allocation6 + $0x4d0] sm:$0xff] }
 0x32e   : > { %7281 = vmatpush2.bf16.msra.mxu0 %v8628_v15  ;;  %v8987_v15 = vcombine.high %v4299_v42, %v4303_v10  ;;  %v4204_v28 = vld [vmem:[#allocation6 + $0xb50] sm:$0xff] }
 0x32f   : > { %7282 = vmatprep.subr.bf16.mxu0 %v8621_v63  ;;  %v4295_v63 = vld [vmem:[#allocation6 + $0xe28] sm:$0xff] }
 0x330   : > { %7230 = vmatpush1.bf16.msra.mxu1 %v8914_v7  ;;  %v4128_v7 = vld [vmem:[#allocation6 + $0x8f0] sm:$0xff] }
 0x331   : > { %7231 = vmatprep.subr.bf16.mxu1 %v9035_v54  ;;  %v8986_v54 = vcombine.low %v4299_v42, %v4303_v10  ;;  %v8813_v24 = vcombine.high %v4124_v51, %v4128_v7  ;;  %v8812_v57 = vcombine.low %v4124_v51, %v4128_v7  ;;  %v3988_v10 = vld [vmem:[#allocation6 + $0x490] sm:$0xff] }
 0x332   : > { %7283 = vmatpush2.bf16.msra.mxu0 %v8620_v3  ;;  %v8979_v3 = vcombine.high %v4291_v25, %v4295_v63  ;;  %v4196_v7 = vld [vmem:[#allocation6 + $0xb10] sm:$0xff] }
 0x333   : > { %7284 = vmatprep.subr.bf16.mxu0 %v8613_v61  ;;  %v4032_v61 = vld [vmem:[#allocation6 + $0x5f0] sm:$0xff] }
 0x334   : > { %7232 = vmatpush2.bf16.msra.mxu1 %v9034_v45  ;;  %v4120_v45 = vld [vmem:[#allocation6 + $0x8b0] sm:$0xff] }
 0x335   : > { %7233 = vmatprep.subr.bf16.mxu1 %v9027_v14  ;;  %v8978_v14 = vcombine.low %v4291_v25, %v4295_v63  ;;  %v8805_v20 = vcombine.high %v4116_v40, %v4120_v45  ;;  %v8804_v22 = vcombine.low %v4116_v40, %v4120_v45  ;;  %v3980_v63 = vld [vmem:[#allocation6 + $0x450] sm:$0xff] }
 0x336   : > { %7285 = vmatpush2.bf16.msra.mxu0 %v8612_v11  ;;  %v8717_v11 = vcombine.high %v4028_v8, %v4032_v61  ;;  %v4188_v45 = vld [vmem:[#allocation6 + $0xad0] sm:$0xff] }
 0x337   : > { %7286 = vmatprep.subr.bf16.mxu0 %v8605_v62  ;;  %v4024_v62 = vld [vmem:[#allocation6 + $0x5b0] sm:$0xff] }
 0x338   : > { %7234 = vmatpush2.bf16.msra.mxu1 %v9026_v38  ;;  %v4112_v38 = vld [vmem:[#allocation6 + $0x870] sm:$0xff] }
 0x339   : > { %7235 = vmatprep.subr.bf16.mxu1 %v9019_v17  ;;  %v8716_v17 = vcombine.low %v4028_v8, %v4032_v61  ;;  %v8797_v46 = vcombine.high %v4108_v21, %v4112_v38  ;;  %v8796_v31 = vcombine.low %v4108_v21, %v4112_v38  ;;  %v3972_v61 = vld [vmem:[#allocation6 + $0x410] sm:$0xff] }
 0x33a   : > { %7287 = vmatpush2.bf16.msra.mxu0 %v8604_v12  ;;  %v8709_v12 = vcombine.high %v4020_v18, %v4024_v62  ;;  %v4180_v38 = vld [vmem:[#allocation6 + $0xa90] sm:$0xff] }
 0x33b   : > { %7288 = vmatprep.subr.bf16.mxu0 %v8597_v2  ;;  %v4016_v2 = vld [vmem:[#allocation6 + $0x570] sm:$0xff] }
 0x33c   : > { %7236 = vmatpush2.bf16.msra.mxu1 %v9018_v58  ;;  %v4104_v58 = vld [vmem:[#allocation6 + $0x830] sm:$0xff] }
 0x33d   : > { %7237 = vmatprep.subr.bf16.mxu1 %v9011_v30  ;;  %v8708_v30 = vcombine.low %v4020_v18, %v4024_v62  ;;  %v8789_v43 = vcombine.high %v4100_v29, %v4104_v58  ;;  %v8788_v55 = vcombine.low %v4100_v29, %v4104_v58  ;;  %v4092_v62 = vld [vmem:[#allocation6 + $0x7d0] sm:$0xff] }
 0x33e   : > { %7289 = vmatpush2.bf16.msra.mxu0 %v8596_v41  ;;  %v8701_v41 = vcombine.high %v4012_v26, %v4016_v2  ;;  %v4172_v58 = vld [vmem:[#allocation6 + $0xa50] sm:$0xff] }
 0x33f   : > { %7344 = vmatprep.subr.bf16.mxu0 %v8845_v33  ;;  %v4008_v33 = vld [vmem:[#allocation6 + $0x530] sm:$0xff] }
 0x340   : > { %7238 = vmatpush2.bf16.msra.mxu1 %v9010_v36  ;;  %v4224_v36 = vld [vmem:[#allocation6 + $0xbf0] sm:$0xff] }
 0x341   : > { %7291 = vmatmul.mubr.bf16.vlgmr.msra.gmra.mxu0 %v9420_v13  ;;  %7239 = vmatprep.subr.bf16.mxu1 %v9003_v37  ;;  %v8700_v37 = vcombine.low %v4012_v26, %v4016_v2  ;;  %v8909_v49 = vcombine.high %v4220_v35, %v4224_v36  ;;  %v8908_v42 = vcombine.low %v4220_v35, %v4224_v36  ;;  %v4084_v2 = vld [vmem:[#allocation6 + $0x790] sm:$0xff] }
 0x342   : > { %7345 = vmatpush1.bf16.msra.mxu0 %v8844_v39  ;;  %7376 = vmatprep.mubr.bf16.mxu0 %v9515_v44  ;;  %v8693_v39 = vcombine.high %v4004_v32, %v4008_v33  ;;  %v4164_v36 = vld [vmem:[#allocation6 + $0xa10] sm:$0xff] }
 0x343   : > { %7346 = vmatprep.subr.bf16.mxu0 %v8837_v48  ;;  %v4000_v48 = vld [vmem:[#allocation6 + $0x4f0] sm:$0xff] }
 0x344   : > { %7240 = vmatpush2.bf16.msra.mxu1 %v9002_v50  ;;  %v4216_v50 = vld [vmem:[#allocation6 + $0xbb0] sm:$0xff] }
 0x345   : > { %7241 = vmatprep.subr.bf16.mxu1 %v8995_v1  ;;  %v8692_v1 = vcombine.low %v4004_v32, %v4008_v33  ;;  %v8901_v53 = vcombine.high %v4212_v9, %v4216_v50  ;;  %v8900_v25 = vcombine.low %v4212_v9, %v4216_v50  ;;  %v4076_v33 = vld [vmem:[#allocation6 + $0x750] sm:$0xff]  ;;  %v3901_v50 = vld [vmem:[#allocation6 + $0x1d8] sm:$0xff] }
 0x346   : > { %7347 = vmatpush1.bf16.msra.mxu0 %v8836_v56  ;;  %v8685_v56 = vcombine.high %v3996_v47, %v4000_v48 }
 0x347   : > { %7348 = vmatprep.subr.bf16.mxu0 %v8829_v52  ;;  %v3992_v52 = vld [vmem:[#allocation6 + $0x4b0] sm:$0xff] }
 0x348   : > { %7242 = vmatpush2.bf16.msra.mxu1 %v8994_v60  ;;  %v4208_v60 = vld [vmem:[#allocation6 + $0xb70] sm:$0xff] }
 0x349   : > { %7243 = vmatprep.subr.bf16.mxu1 %v8987_v15  ;;  %v8684_v15 = vcombine.low %v3996_v47, %v4000_v48  ;;  %v8893_v51 = vcombine.high %v4204_v28, %v4208_v60  ;;  %v8892_v8 = vcombine.low %v4204_v28, %v4208_v60  ;;  %v4068_v48 = vld [vmem:[#allocation6 + $0x710] sm:$0xff]  ;;  %v9549_v60 = vpop.f32.mrf.mxu0 }
 0x34a   : > { %7349 = vmatpush1.bf16.msra.mxu0 %v8828_v6  ;;  %v8677_v6 = vcombine.high %v3988_v10, %v3992_v52 }
 0x34b   : > { %7350 = vmatprep.subr.bf16.mxu0 %v8821_v0  ;;  %v3984_v0 = vld [vmem:[#allocation6 + $0x470] sm:$0xff] }
 0x34c   : > { %7244 = vmatpush2.bf16.msra.mxu1 %v8986_v54  ;;  %v4200_v54 = vld [vmem:[#allocation6 + $0xb30] sm:$0xff] }
 0x34d   : > { %7245 = vmatprep.subr.bf16.mxu1 %v8979_v3  ;;  %v8676_v3 = vcombine.low %v3988_v10, %v3992_v52  ;;  %v8885_v40 = vcombine.high %v4196_v7, %v4200_v54  ;;  %v8884_v18 = vcombine.low %v4196_v7, %v4200_v54  ;;  %v4060_v52 = vld [vmem:[#allocation6 + $0x6d0] sm:$0xff] }
 0x34e   : > { %7351 = vmatpush1.bf16.msra.mxu0 %v8820_v5  ;;  %v8669_v5 = vcombine.high %v3980_v63, %v3984_v0  ;;  %v4056_v7 = vld [vmem:[#allocation6 + $0x6b0] sm:$0xff] }
 0x34f   : > { %7352 = vmatprep.subr.bf16.mxu0 %v8813_v24  ;;  %v3976_v24 = vld [vmem:[#allocation6 + $0x430] sm:$0xff] }
 0x350   : > { %7246 = vmatpush2.bf16.msra.mxu1 %v8978_v14  ;;  %v4192_v14 = vld [vmem:[#allocation6 + $0xaf0] sm:$0xff] }
 0x351   : > { %7301 = vmatprep.subr.bf16.mxu1 %v8717_v11  ;;  %v8668_v11 = vcombine.low %v3980_v63, %v3984_v0  ;;  %v8877_v21 = vcombine.high %v4188_v45, %v4192_v14  ;;  %v8876_v26 = vcombine.low %v4188_v45, %v4192_v14  ;;  %v4044_v45 = vld [vmem:[#allocation6 + $0x650] sm:$0xff] }
 0x352   : > { %7353 = vmatpush1.bf16.msra.mxu0 %v8812_v57  ;;  %v8661_v57 = vcombine.high %v3972_v61, %v3976_v24  ;;  %v4048_v14 = vld [vmem:[#allocation6 + $0x670] sm:$0xff] }
 0x353   : > { %7354 = vmatprep.subr.bf16.mxu0 %v8805_v20  ;;  %7248 = vmatmul.mubr.bf16.vlgmr.msra.gmra.mxu1 %v9533_v59  ;;  %v4096_v20 = vld [vmem:[#allocation6 + $0x7f0] sm:$0xff] }
 0x354   : > { %7302 = vmatpush1.bf16.msra.mxu1 %v8716_v17  ;;  %7333 = vmatprep.mubr.bf16.mxu1 %v9480_v4  ;;  %v4184_v17 = vld [vmem:[#allocation6 + $0xab0] sm:$0xff] }
 0x355   : > { %7303 = vmatprep.subr.bf16.mxu1 %v8709_v12  ;;  %v8660_v12 = vcombine.low %v3972_v61, %v3976_v24  ;;  %v8869_v29 = vcombine.high %v4180_v38, %v4184_v17  ;;  %v8868_v32 = vcombine.low %v4180_v38, %v4184_v17  ;;  %v8733_v38 = vcombine.high %v4044_v45, %v4048_v14 }
 0x356   : > { %7355 = vmatpush1.bf16.msra.mxu0 %v8804_v22  ;;  %v8781_v22 = vcombine.high %v4092_v62, %v4096_v20 }
 0x357   : > { %7356 = vmatprep.subr.bf16.mxu0 %v8797_v46  ;;  %v4088_v46 = vld [vmem:[#allocation6 + $0x7b0] sm:$0xff] }
 0x358   : > { %7304 = vmatpush1.bf16.msra.mxu1 %v8708_v30  ;;  %v4176_v30 = vld [vmem:[#allocation6 + $0xa70] sm:$0xff] }
 0x359   : > { %7305 = vmatprep.subr.bf16.mxu1 %v8701_v41  ;;  %v8780_v41 = vcombine.low %v4092_v62, %v4096_v20  ;;  %v8861_v35 = vcombine.high %v4172_v58, %v4176_v30  ;;  %v8860_v47 = vcombine.low %v4172_v58, %v4176_v30  ;;  %v3881_v62 = vld [vmem:[#allocation6 + $0x138] sm:$0xff] }
 0x35a   : > { %7357 = vmatpush1.bf16.msra.mxu0 %v8796_v31  ;;  %v8773_v31 = vcombine.high %v4084_v2, %v4088_v46 }
 0x35b   : > { %7358 = vmatprep.subr.bf16.mxu0 %v8789_v43  ;;  %v4080_v43 = vld [vmem:[#allocation6 + $0x770] sm:$0xff] }
 0x35c   : > { %7306 = vmatpush1.bf16.msra.mxu1 %v8700_v37  ;;  %v4168_v37 = vld [vmem:[#allocation6 + $0xa30] sm:$0xff] }
 0x35d   : > { %7307 = vmatprep.subr.bf16.mxu1 %v8693_v39  ;;  %v8772_v39 = vcombine.low %v4084_v2, %v4088_v46  ;;  %v8853_v9 = vcombine.high %v4164_v36, %v4168_v37  ;;  %v8852_v10 = vcombine.low %v4164_v36, %v4168_v37  ;;  %v3873_v46 = vld [vmem:[#allocation6 + $0xf8] sm:$0xff] }
 0x35e   : > { %7359 = vmatpush1.bf16.msra.mxu0 %v8788_v55  ;;  %v8765_v55 = vcombine.high %v4076_v33, %v4080_v43  ;;  %v3865_v36 = vld [vmem:[#allocation6 + $0xb8] sm:$0xff] }
 0x35f   : > { %7360 = vmatprep.subr.bf16.mxu0 %v8909_v49  ;;  %v4072_v49 = vld [vmem:[#allocation6 + $0x730] sm:$0xff] }
 0x360   : > { %7308 = vmatpush1.bf16.msra.mxu1 %v8692_v1  ;;  %v3905_v1 = vld [vmem:[#allocation6 + $0x1f8] sm:$0xff] }
 0x361   : > { %7309 = vmatprep.subr.bf16.mxu1 %v8685_v56  ;;  %v8764_v56 = vcombine.low %v4076_v33, %v4080_v43  ;;  %v8591_v28 = vcombine.high %v3901_v50, %v3905_v1  ;;  %v8590_v0 = vcombine.low %v3901_v50, %v3905_v1  ;;  %v4288_v33 = vld [vmem:[#allocation6 + $0xdf0] sm:$0xff]  ;;  %v3853_v1 = vld [vmem:[#allocation6 + $0x58] sm:$0xff] }
 0x362   : > { %7361 = vmatpush2.bf16.msra.mxu0 %v8908_v42  ;;  %v8757_v42 = vcombine.high %v4068_v48, %v4072_v49 }
 0x363   : > { %7362 = vmatprep.subr.bf16.mxu0 %v8901_v53  ;;  %v4064_v53 = vld [vmem:[#allocation6 + $0x6f0] sm:$0xff] }
 0x364   : > { %7310 = vmatpush1.bf16.msra.mxu1 %v8684_v15  ;;  %v3893_v15 = vld [vmem:[#allocation6 + $0x198] sm:$0xff]  ;;  %v8749_v63 = vcombine.high %v4060_v52, %v4064_v53  ;;  %v8748_v61 = vcombine.low %v4060_v52, %v4064_v53 }
 0x365   : > { %7311 = vmatprep.subr.bf16.mxu1 %v8677_v6  ;;  %v3897_v6 = vld [vmem:[#allocation6 + $0x1b8] sm:$0xff] }
 0x366   : > { %7363 = vmatpush2.bf16.msra.mxu0 %v8900_v25  ;;  %v8756_v25 = vcombine.low %v4068_v48, %v4072_v49  ;;  %v8583_v54 = vcombine.high %v3893_v15, %v3897_v6  ;;  %v4276_v49 = vld [vmem:[#allocation6 + $0xd90] sm:$0xff] }
 0x367   : > { %7364 = vmatprep.subr.bf16.mxu0 %v8893_v51  ;;  %v4052_v51 = vld [vmem:[#allocation6 + $0x690] sm:$0xff] }
 0x368   : > { %7312 = vmatpush1.bf16.msra.mxu1 %v8676_v3  ;;  %v9551_v3 = vpop.f32.mrf.mxu0  ;;  %v8741_v24 = vcombine.high %v4052_v51, %v4056_v7  ;;  %v8740_v20 = vcombine.low %v4052_v51, %v4056_v7 }
 0x369   : > { %7313 = vmatprep.subr.bf16.mxu1 %v8669_v5  ;;  %v3885_v5 = vld [vmem:[#allocation6 + $0x158] sm:$0xff] }
 0x36a   : > { %7365 = vmatpush2.bf16.msra.mxu0 %v8892_v8  ;;  %v3889_v8 = vld [vmem:[#allocation6 + $0x178] sm:$0xff] }
 0x36b   : > { %7366 = vmatprep.subr.bf16.mxu0 %v8885_v40  ;;  %v8582_v40 = vcombine.low %v3893_v15, %v3897_v6  ;;  %v8574_v17 = vcombine.low %v3885_v5, %v3889_v8 }
 0x36c   : > { %7314 = vmatpush1.bf16.msra.mxu1 %v8668_v11  ;;  %v8575_v11 = vcombine.high %v3885_v5, %v3889_v8  ;;  %v3849_v5 = vld [vmem:[#allocation6 + $0x38] sm:$0xff] }
 0x36d   : > { %7315 = vmatprep.subr.bf16.mxu1 %v8661_v57  ;;  %v6952_v57 = vpop.f32.mrf.mxu0 }
 0x36e   : > { %7367 = vmatpush2.bf16.msra.mxu0 %v8884_v18  ;;  %v3877_v18 = vld [vmem:[#allocation6 + $0x118] sm:$0xff] }
 0x36f   : > { %7368 = vmatprep.subr.bf16.mxu0 %v8877_v21  ;;  %v6991_v21 = vpop.f32.mrf.mxu1  ;;  %v6954_v2 = vpop.f32.mrf.mxu0 }
 0x370   : > { %7316 = vmatpush1.bf16.msra.mxu1 %v8660_v12  ;;  %v4036_v12 = vld [vmem:[#allocation6 + $0x610] sm:$0xff]  ;;  %v6992_v15 = vadd.f32 %v6991_v21, %v9549_v60 }
 0x371   : > { %7317 = vmatprep.subr.bf16.mxu1 %v8781_v22  ;;  %v4040_v22 = vld [vmem:[#allocation6 + $0x630] sm:$0xff]  ;;  %v6993_v58 = vpop.f32.mrf.mxu1  ;;  %v7034_v30 = vpop.f32.mrf.mxu0 }
 0x372   : > { %7369 = vmatpush2.bf16.msra.mxu0 %v8876_v26  ;;  %v8567_v26 = vcombine.high %v3877_v18, %v3881_v62  ;;  %v8724_v37 = vcombine.low %v4036_v12, %v4040_v22  ;;  %v6994_v6 = vadd.f32 %v6993_v58, %v9551_v3  ;;  %v7035_v8 = vadd.f32 %v7034_v30, %v6992_v15 }
 0x373   : > { %7370 = vmatprep.subr.bf16.mxu0 %v8869_v29  ;;  %v8732_v29 = vcombine.low %v4044_v45, %v4048_v14 }
 0x374   : > { %7318 = vmatpush2.bf16.msra.mxu1 %v8780_v41  ;;  %v8725_v41 = vcombine.high %v4036_v12, %v4040_v22 }
 0x375   : > { %7319 = vmatprep.subr.bf16.mxu1 %v8773_v31  ;;  %v8566_v31 = vcombine.low %v3877_v18, %v3881_v62 }
 0x376   : > { %7371 = vmatpush2.bf16.msra.mxu0 %v8868_v32  ;;  %v4284_v32 = vld [vmem:[#allocation6 + $0xdd0] sm:$0xff] }
 0x377   : > { %7372 = vmatprep.subr.bf16.mxu0 %v8861_v35  ;;  %v3861_v35 = vld [vmem:[#allocation6 + $0x98] sm:$0xff] }
 0x378   : > { %7320 = vmatpush2.bf16.msra.mxu1 %v8772_v39  ;;  %v6995_v39 = vpop.f32.mrf.mxu1  ;;  %v8551_v50 = vcombine.high %v3861_v35, %v3865_v36 }
 0x379   : > { %7321 = vmatprep.subr.bf16.mxu1 %v8765_v55  ;;  %v7036_v55 = vpop.f32.mrf.mxu0  ;;  %v6996_v51 = vadd.f32 %v6995_v39, %v6952_v57  ;;  %v3957_v39 = vld [vmem:[#allocation6 + $0x398] sm:$0xff] }
 0x37a   : > { %7373 = vmatpush2.bf16.msra.mxu0 %v8860_v47  ;;  %v8973_v47 = vcombine.high %v4284_v32, %v4288_v33 }
 0x37b   : > { %7374 = vmatprep.subr.bf16.mxu0 %v8853_v9  ;;  %v4280_v9 = vld [vmem:[#allocation6 + $0xdb0] sm:$0xff]  ;;  %v7038_v52 = vpop.f32.mrf.mxu0 }
 0x37c   : > { %7322 = vmatpush2.bf16.msra.mxu1 %v8764_v56  ;;  %v3857_v56 = vld [vmem:[#allocation6 + $0x78] sm:$0xff]  ;;  %v8965_v53 = vcombine.high %v4276_v49, %v4280_v9  ;;  %v7039_v57 = vadd.f32 %v7038_v52, %v6996_v51 }
 0x37d   : > { %7323 = vmatprep.subr.bf16.mxu1 %v8757_v42  ;;  %v8972_v42 = vcombine.low %v4284_v32, %v4288_v33  ;;  %v8542_v14 = vcombine.low %v3853_v1, %v3857_v56 }
 0x37e   : > { %7375 = vmatpush2.bf16.msra.mxu0 %v8852_v10  ;;  %v6997_v10 = vpop.f32.mrf.mxu1 }
 0x37f   : > { %7430 = vmatprep.subr.bf16.mxu0 %v8591_v28  ;;  %v8550_v28 = vcombine.low %v3861_v35, %v3865_v36  ;;  %v6998_v60 = vadd.f32 %v6997_v10, %v6954_v2 }
 0x380   : > { %7324 = vmatpush2.bf16.msra.mxu1 %v8756_v25  ;;  %v4268_v25 = vld [vmem:[#allocation6 + $0xd50] sm:$0xff] }
 0x381   : > { %7377 = vmatmul.mubr.bf16.vlgmr.msra.gmra.mxu0 %v9523_v19  ;;  %7325 = vmatprep.subr.bf16.mxu1 %v8749_v63  ;;  %v4272_v63 = vld [vmem:[#allocation6 + $0xd70] sm:$0xff] }
 0x382   : > { %7431 = vmatpush1.bf16.msra.mxu0 %v8590_v0  ;;  %7462 = vmatprep.mubr.bf16.mxu0 %v9478_v16  ;;  %v3869_v16 = vld [vmem:[#allocation6 + $0xd8] sm:$0xff]  ;;  %v8543_v0 = vcombine.high %v3853_v1, %v3857_v56  ;;  %v8957_v45 = vcombine.high %v4268_v25, %v4272_v63 }
 0x383   : > { %7432 = vmatprep.subr.bf16.mxu0 %v8583_v54  ;;  %v8559_v43 = vcombine.high %v3869_v16, %v3873_v46  ;;  %v8558_v48 = vcombine.low %v3869_v16, %v3873_v46  ;;  %v3845_v54 = vld [vmem:[#allocation6 + $0x18] sm:$0xff]  ;;  %v8956_v16 = vcombine.low %v4268_v25, %v4272_v63  ;;  %v4252_v46 = vld [vmem:[#allocation6 + $0xcd0] sm:$0xff] }
 0x384   : > { %7326 = vmatpush2.bf16.msra.mxu1 %v8748_v61  ;;  %v7037_v61 = vadd.f32 %v7036_v55, %v6994_v6  ;;  %v8535_v21 = vcombine.high %v3845_v54, %v3849_v5  ;;  %v3961_v55 = vld [vmem:[#allocation6 + $0x3b8] sm:$0xff] }
 0x385   : > { %7327 = vmatprep.subr.bf16.mxu1 %v8741_v24  ;;  %v8964_v24 = vcombine.low %v4276_v49, %v4280_v9  ;;  %v8647_v15 = vcombine.high %v3957_v39, %v3961_v55  ;;  %v3949_v25 = vld [vmem:[#allocation6 + $0x358] sm:$0xff] }
 0x386   : > { %7433 = vmatpush1.bf16.msra.mxu0 %v8582_v40  ;;  %v7040_v40 = vpop.f32.mrf.mxu0  ;;  %v3953_v63 = vld [vmem:[#allocation6 + $0x378] sm:$0xff] }
 0x387   : > { %7434 = vmatprep.subr.bf16.mxu0 %v8575_v11  ;;  %v4260_v11 = vld [vmem:[#allocation6 + $0xd10] sm:$0xff]  ;;  %v7041_v22 = vadd.f32 %v7040_v40, %v6998_v60 }
 0x388   : > { %7328 = vmatpush2.bf16.msra.mxu1 %v8740_v20  ;;  %v4264_v20 = vld [vmem:[#allocation6 + $0xd30] sm:$0xff] }
 0x389   : > { %7329 = vmatprep.subr.bf16.mxu1 %v8733_v38  ;;  %v3965_v38 = vld [vmem:[#allocation6 + $0x3d8] sm:$0xff]  ;;  %v8949_v30 = vcombine.high %v4260_v11, %v4264_v20  ;;  %v8948_v36 = vcombine.low %v4260_v11, %v4264_v20 }
 0x38a   : > { %7435 = vmatpush1.bf16.msra.mxu0 %v8574_v17  ;;  %v3969_v17 = vld [vmem:[#allocation6 + $0x3f8] sm:$0xff] }
 0x38b   : > { %7436 = vmatprep.subr.bf16.mxu0 %v8567_v26  ;;  %v8654_v56 = vcombine.low %v3965_v38, %v3969_v17 }
 0x38c   : > { %7330 = vmatpush2.bf16.msra.mxu1 %v8732_v29  ;;  %v4256_v29 = vld [vmem:[#allocation6 + $0xcf0] sm:$0xff] }
 0x38d   : > { %7331 = vmatprep.subr.bf16.mxu1 %v8725_v41  ;;  %v8534_v41 = vcombine.low %v3845_v54, %v3849_v5  ;;  %v8940_v54 = vcombine.low %v4252_v46, %v4256_v29 }
 0x38e   : > { %7437 = vmatpush1.bf16.msra.mxu0 %v8566_v31  ;;  %v8655_v31 = vcombine.high %v3965_v38, %v3969_v17 }
 0x38f   : > { %7438 = vmatprep.subr.bf16.mxu0 %v8559_v43 }
 0x390   : > { %7332 = vmatpush2.bf16.msra.mxu1 %v8724_v37  ;;  %v8941_v37 = vcombine.high %v4252_v46, %v4256_v29 }
 0x391   : > { %7387 = vmatprep.subr.bf16.mxu1 %v8973_v47 }
 0x392   : > { %7439 = vmatpush1.bf16.msra.mxu0 %v8558_v48 }
 0x393   : > { %7440 = vmatprep.subr.bf16.mxu0 %v8551_v50  ;;  %7334 = vmatmul.mubr.bf16.vlgmr.msra.gmra.mxu1 %v9463_v27  ;;  %v7077_v7 = vpop.f32.mrf.mxu1 }
 0x394   : > { %7388 = vmatpush1.bf16.msra.mxu1 %v8972_v42  ;;  %7419 = vmatprep.mubr.bf16.mxu1 %v9531_v23  ;;  %v7078_v18 = vadd.f32 %v7077_v7, %v7035_v8 }
 0x395   : > { %v7079_v3 = vpop.f32.mrf.mxu1  ;;  %7389 = vmatprep.subr.bf16.mxu1 %v8965_v53  ;;  %v4244_v53 = vld [vmem:[#allocation6 + $0xc90] sm:$0xff] }
 0x396   : > { %7441 = vmatpush1.bf16.msra.mxu0 %v8550_v28  ;;  %v7080_v62 = vadd.f32 %v7079_v3, %v7037_v61  ;;  %v7773_v32 = vmul.f32 %v7078_v18, %v7078_v18  ;;  %v4248_v28 = vld [vmem:[#allocation6 + $0xcb0] sm:$0xff]  ;;  %v8646_v61 = vcombine.low %v3957_v39, %v3961_v55 }
 0x397   : > { %7442 = vmatprep.subr.bf16.mxu0 %v8543_v0  ;;  %v7081_v12 = vpop.f32.mrf.mxu1  ;;  %v8933_v8 = vcombine.high %v4244_v53, %v4248_v28  ;;  %v4236_v3 = vld [vmem:[#allocation6 + $0xc50] sm:$0xff]  ;;  %v8932_v38 = vcombine.low %v4244_v53, %v4248_v28 }
 0x398   : > { %v9051_v26 = vpack.c.bf16 %v7080_v62, %v7078_v18  ;;  %v7082_v2 = vadd.f32 %v7081_v12, %v7039_v57  ;;  %7390 = vmatpush1.bf16.msra.mxu1 %v8964_v24  ;;  %v7774_v50 = vmul.f32 %v7080_v62, %v7080_v62  ;;  %v3941_v57 = vld [vmem:[#allocation6 + $0x318] sm:$0xff]  ;;  %v4348_v39 = vld [vmem:[#allocation6 + $0xfd0] sm:$0xff] }
 0x399   : > { %v7083_v58 = vpop.f32.mrf.mxu1  ;;  %7391 = vmatprep.subr.bf16.mxu1 %v8957_v45  ;;  %v4240_v45 = vld [vmem:[#allocation6 + $0xc70] sm:$0xff] }
 0x39a   : > { %7443 = vmatpush1.bf16.msra.mxu0 %v8542_v14  ;;  %7650 = vst [vmem:[%s9563_s28] sm:$0xff] %v9051_v26  ;;  %v7658_v33 = vadd.f32 %v7082_v2, %v7078_v18  ;;  %v7781_v43 = vmul.f32 %v7082_v2, %v7082_v2  ;;  %v7084_v35 = vadd.f32 %v7083_v58, %v7041_v22  ;;  %v3945_v18 = vld [vmem:[#allocation6 + $0x338] sm:$0xff]  ;;  %v4352_v55 = vld [vmem:[#allocation6 + $0xff0] sm:$0xff] }
 0x39b   : > { %7444 = vmatprep.subr.bf16.mxu0 %v8535_v21  ;;  %v8639_v14 = vcombine.high %v3949_v25, %v3953_v63  ;;  %v8925_v12 = vcombine.high %v4236_v3, %v4240_v45  ;;  %v8638_v22 = vcombine.low %v3949_v25, %v3953_v63  ;;  %v8631_v46 = vcombine.high %v3941_v57, %v3945_v18  ;;  %v4344_v53 = vld [vmem:[#allocation6 + $0xfb0] sm:$0xff] }
 0x39c   : > { %v7659_v47 = vrot.slane %v7658_v33, 4  ;;  %v7789_v48 = vadd.f32 %v7781_v43, %v7773_v32  ;;  %v9055_v49 = vpack.c.bf16 %v7084_v35, %v7082_v2  ;;  %v7665_v9 = vadd.f32 %v7084_v35, %v7080_v62  ;;  %7392 = vmatpush1.bf16.msra.mxu1 %v8956_v16  ;;  %v4228_v2 = vld [vmem:[#allocation6 + $0xc10] sm:$0xff] }
 0x39d   : > { %v7782_v1 = vmul.f32 %v7084_v35, %v7084_v35  ;;  %7393 = vmatprep.subr.bf16.mxu1 %v8949_v30  ;;  %v4232_v16 = vld [vmem:[#allocation6 + $0xc30] sm:$0xff]  ;;  %v3933_v30 = vld [vmem:[#allocation6 + $0x2d8] sm:$0xff]  ;;  %v9036_v25 = vcombine.low %v4348_v39, %v4352_v55 }
 0x39e   : > { %7445 = vmatpush1.bf16.msra.mxu0 %v8534_v41  ;;  %v7660_v42 = vadd.f32 %v7659_v47, %v7658_v33  ;;  %v7790_v10 = vrot.slane %v7789_v48, 4  ;;  %7654 = vst [vmem:[%s9563_s28 + $0x20] sm:$0xff] %v9055_v49  ;;  %v7666_v52 = vrot.slane %v7665_v9, 4  ;;  %v3937_v41 = vld [vmem:[#allocation6 + $0x2f8] sm:$0xff]  ;;  %v8924_v33 = vcombine.low %v4236_v3, %v4240_v45  ;;  %v4328_v3 = vld [vmem:[#allocation6 + $0xf30] sm:$0xff] }
 0x39f   : > { %7446 = vmatprep.subr.bf16.mxu0 %v8655_v31  ;;  %v7796_v6 = vadd.f32 %v7782_v1, %v7774_v50  ;;  %v8917_v35 = vcombine.high %v4228_v2, %v4232_v16  ;;  %v8623_v47 = vcombine.high %v3933_v30, %v3937_v41  ;;  %v3929_v50 = vld [vmem:[#allocation6 + $0x2b8] sm:$0xff]  ;;  %v8916_v1 = vcombine.low %v4228_v2, %v4232_v16  ;;  %v4308_v16 = vld [vmem:[#allocation6 + $0xe90] sm:$0xff] }
 0x3a0   : > { %v7661_v0 = vrot.slane %v7660_v42, 2  ;;  %v7791_v51 = vadd.f32 %v7790_v10, %v7789_v48  ;;  %v7667_v7 = vadd.f32 %v7666_v52, %v7665_v9  ;;  %7394 = vmatpush1.bf16.msra.mxu1 %v8948_v36  ;;  %v8630_v36 = vcombine.low %v3941_v57, %v3945_v18  ;;  %v3925_v9 = vld [vmem:[#allocation6 + $0x298] sm:$0xff]  ;;  %v4340_v52 = vld [vmem:[#allocation6 + $0xf90] sm:$0xff] }
 0x3a1   : > { %v7797_v5 = vrot.slane %v7796_v6, 4  ;;  %7395 = vmatprep.subr.bf16.mxu1 %v8941_v37  ;;  %v8622_v10 = vcombine.low %v3933_v30, %v3937_v41  ;;  %v8615_v28 = vcombine.high %v3925_v9, %v3929_v50  ;;  %v9029_v63 = vcombine.high %v4340_v52, %v4344_v53  ;;  %v4145_v30 = vld [vmem:[#allocation6 + $0x978] sm:$0xff] }
 0x3a2   : > { %7447 = vmatpush2.bf16.msra.mxu0 %v8654_v56  ;;  %v7662_v24 = vadd.f32 %v7661_v0, %v7660_v42  ;;  %v7792_v60 = vrot.slane %v7791_v51, 2  ;;  %v7668_v40 = vrot.slane %v7667_v7, 2  ;;  %v9037_v42 = vcombine.high %v4348_v39, %v4352_v55  ;;  %v4133_v55 = vld [vmem:[#allocation6 + $0x918] sm:$0xff] }
 0x3a3   : > { %7448 = vmatprep.subr.bf16.mxu0 %v8647_v15  ;;  %v7798_v11 = vadd.f32 %v7797_v5, %v7796_v6  ;;  %v3917_v15 = vld [vmem:[#allocation6 + $0x258] sm:$0xff]  ;;  %v8614_v0 = vcombine.low %v3925_v9, %v3929_v50 }
 0x3a4   : > { %v7663_v62 = vrot.slane %v7662_v24, 1  ;;  %v7793_v20 = vadd.f32 %v7792_v60, %v7791_v51  ;;  %v7669_v21 = vadd.f32 %v7668_v40, %v7667_v7  ;;  %7396 = vmatpush1.bf16.msra.mxu1 %v8940_v54  ;;  %v3921_v6 = vld [vmem:[#allocation6 + $0x278] sm:$0xff]  ;;  %v4332_v51 = vld [vmem:[#allocation6 + $0xf50] sm:$0xff] }
 0x3a5   : > { %v7799_v17 = vrot.slane %v7798_v11, 2  ;;  %7397 = vmatprep.subr.bf16.mxu1 %v8933_v8  ;;  %v4336_v7 = vld [vmem:[#allocation6 + $0xf70] sm:$0xff]  ;;  %v8607_v54 = vcombine.high %v3917_v15, %v3921_v6  ;;  %v3909_v5 = vld [vmem:[#allocation6 + $0x218] sm:$0xff]  ;;  %v8606_v60 = vcombine.low %v3917_v15, %v3921_v6 }
 0x3a6   : > { %7449 = vmatpush2.bf16.msra.mxu0 %v8646_v61  ;;  %v7670_v26 = vrot.slane %v7669_v21, 1  ;;  %v7794_v29 = vrot.slane %v7793_v20, 1  ;;  %v9567_v31 = vadd.f32 %v7663_v62, %v7662_v24  ;;  %v3913_v8 = vld [vmem:[#allocation6 + $0x238] sm:$0xff]  ;;  %v9028_v61 = vcombine.low %v4340_v52, %v4344_v53  ;;  %v4324_v40 = vld [vmem:[#allocation6 + $0xf10] sm:$0xff] }
 0x3a7   : > { %7450 = vmatprep.subr.bf16.mxu0 %v8639_v14  ;;  %v7800_v58 = vadd.f32 %v7799_v17, %v7798_v11  ;;  %v9021_v24 = vcombine.high %v4332_v51, %v4336_v7  ;;  %v8599_v45 = vcombine.high %v3909_v5, %v3913_v8  ;;  %v4157_v14 = vld [vmem:[#allocation6 + $0x9d8] sm:$0xff]  ;;  %v9020_v57 = vcombine.low %v4332_v51, %v4336_v7 }
 0x3a8   : > { %v9569_v32 = vadd.f32 %v7670_v26, %v7669_v21  ;;  %7398 = vmatpush1.bf16.msra.mxu1 %v8932_v38  ;;  %v9573_v48 = vadd.f32 %v7794_v29, %v7793_v20  ;;  %v4161_v11 = vld [vmem:[#allocation6 + $0x9f8] sm:$0xff]  ;;  %v9013_v18 = vcombine.high %v4324_v40, %v4328_v3  ;;  %v8598_v62 = vcombine.low %v3909_v5, %v3913_v8  ;;  %v4316_v20 = vld [vmem:[#allocation6 + $0xed0] sm:$0xff] }
 0x3a9   : > { %v7801_v43 = vrot.slane %v7800_v58, 1  ;;  %7399 = vmatprep.subr.bf16.mxu1 %v8925_v12  ;;  %v4320_v21 = vld [vmem:[#allocation6 + $0xef0] sm:$0xff]  ;;  %v8847_v38 = vcombine.high %v4157_v14, %v4161_v11  ;;  %v4149_v17 = vld [vmem:[#allocation6 + $0x998] sm:$0xff]  ;;  %v8846_v2 = vcombine.low %v4157_v14, %v4161_v11 }
 0x3aa   : > { %7451 = vmatpush2.bf16.msra.mxu0 %v8638_v22  ;;  %v7722_v37 = vcombine.low %v9567_v31, %v9569_v32  ;;  %v4153_v12 = vld [vmem:[#allocation6 + $0x9b8] sm:$0xff]  ;;  %v9012_v22 = vcombine.low %v4324_v40, %v4328_v3  ;;  %v9005_v26 = vcombine.high %v4316_v20, %v4320_v21  ;;  %v9004_v41 = vcombine.low %v4316_v20, %v4320_v21 }
 0x3ab   : > { %7452 = vmatprep.subr.bf16.mxu0 %v8631_v46  ;;  %v9575_v49 = vadd.f32 %v7801_v43, %v7800_v58  ;;  %v4312_v46 = vld [vmem:[#allocation6 + $0xeb0] sm:$0xff]  ;;  %v8839_v29 = vcombine.high %v4149_v17, %v4153_v12  ;;  %v4141_v58 = vld [vmem:[#allocation6 + $0x958] sm:$0xff]  ;;  %v8838_v43 = vcombine.low %v4149_v17, %v4153_v12 }
 0x3ac   : > { %7400 = vmatpush1.bf16.msra.mxu1 %v8924_v33  ;;  %v8997_v33 = vcombine.high %v4308_v16, %v4312_v46  ;;  %v8831_v39 = vcombine.high %v4141_v58, %v4145_v30  ;;  %v8996_v9 = vcombine.low %v4308_v16, %v4312_v46  ;;  %v4125_v52 = vld [vmem:[#allocation6 + $0x8d8] sm:$0xff] }
 0x3ad   : > { %v7853_v56 = vcombine.low %v9573_v48, %v9575_v49  ;;  %7401 = vmatprep.subr.bf16.mxu1 %v8917_v35  ;;  %v4300_v35 = vld [vmem:[#allocation6 + $0xe50] sm:$0xff]  ;;  %v4129_v53 = vld [vmem:[#allocation6 + $0x8f8] sm:$0xff] }
 0x3ae   : > { %7453 = vmatpush2.bf16.msra.mxu0 %v8630_v36  ;;  %v4304_v36 = vld [vmem:[#allocation6 + $0xe70] sm:$0xff]  ;;  %v4029_v6 = vld [vmem:[#allocation6 + $0x5d8] sm:$0xff]  ;;  %v8814_v5 = vcombine.low %v4125_v52, %v4129_v53 }
 0x3af   : > { %7454 = vmatprep.subr.bf16.mxu0 %v8623_v47  ;;  %v4137_v47 = vld [vmem:[#allocation6 + $0x938] sm:$0xff]  ;;  %v8989_v50 = vcombine.high %v4300_v35, %v4304_v36 }
 0x3b0   : > { %7402 = vmatpush1.bf16.msra.mxu1 %v8916_v1  ;;  %v8830_v1 = vcombine.low %v4141_v58, %v4145_v30  ;;  %v8822_v15 = vcombine.low %v4133_v55, %v4137_v47  ;;  %v4121_v51 = vld [vmem:[#allocation6 + $0x8b8] sm:$0xff] }
 0x3b1   : > { %7403 = vmatprep.subr.bf16.mxu1 %v9037_v42  ;;  %v4296_v42 = vld [vmem:[#allocation6 + $0xe30] sm:$0xff]  ;;  %v4021_v8 = vld [vmem:[#allocation6 + $0x598] sm:$0xff] }
 0x3b2   : > { %7455 = vmatpush2.bf16.msra.mxu0 %v8622_v10  ;;  %v8823_v10 = vcombine.high %v4133_v55, %v4137_v47  ;;  %v4113_v40 = vld [vmem:[#allocation6 + $0x878] sm:$0xff] }
 0x3b3   : > { %7456 = vmatprep.subr.bf16.mxu0 %v8615_v28  ;;  %v4013_v11 = vld [vmem:[#allocation6 + $0x558] sm:$0xff] }
 0x3b4   : > { %7404 = vmatpush2.bf16.msra.mxu1 %v9036_v25  ;;  %v4033_v25 = vld [vmem:[#allocation6 + $0x5f8] sm:$0xff] }
 0x3b5   : > { %7405 = vmatprep.subr.bf16.mxu1 %v9029_v63  ;;  %v8815_v63 = vcombine.high %v4125_v52, %v4129_v53  ;;  %v8718_v3 = vcombine.low %v4029_v6, %v4033_v25  ;;  %v4105_v20 = vld [vmem:[#allocation6 + $0x838] sm:$0xff] }
 0x3b6   : > { %7457 = vmatpush2.bf16.msra.mxu0 %v8614_v0  ;;  %v4117_v0 = vld [vmem:[#allocation6 + $0x898] sm:$0xff] }
 0x3b7   : > { %7458 = vmatprep.subr.bf16.mxu0 %v8607_v54  ;;  %v8719_v54 = vcombine.high %v4029_v6, %v4033_v25  ;;  %v8806_v14 = vcombine.low %v4117_v0, %v4121_v51  ;;  %v4005_v12 = vld [vmem:[#allocation6 + $0x518] sm:$0xff] }
 0x3b8   : > { %7406 = vmatpush2.bf16.msra.mxu1 %v9028_v61  ;;  %v4025_v61 = vld [vmem:[#allocation6 + $0x5b8] sm:$0xff] }
 0x3b9   : > { %7407 = vmatprep.subr.bf16.mxu1 %v9021_v24  ;;  %v8807_v24 = vcombine.high %v4117_v0, %v4121_v51  ;;  %v8710_v21 = vcombine.low %v4021_v8, %v4025_v61  ;;  %v4225_v16 = vld [vmem:[#allocation6 + $0xbf8] sm:$0xff] }
 0x3ba   : > { %7459 = vmatpush2.bf16.msra.mxu0 %v8606_v60  ;;  %v4109_v60 = vld [vmem:[#allocation6 + $0x858] sm:$0xff] }
 0x3bb   : > { %7460 = vmatprep.subr.bf16.mxu0 %v8599_v45  ;;  %v8711_v45 = vcombine.high %v4021_v8, %v4025_v61  ;;  %v8798_v17 = vcombine.low %v4109_v60, %v4113_v40  ;;  %v3997_v30 = vld [vmem:[#allocation6 + $0x4d8] sm:$0xff] }
 0x3bc   : > { %7408 = vmatpush2.bf16.msra.mxu1 %v9020_v57  ;;  %v4017_v57 = vld [vmem:[#allocation6 + $0x578] sm:$0xff] }
 0x3bd   : > { %7409 = vmatprep.subr.bf16.mxu1 %v9013_v18  ;;  %v8799_v18 = vcombine.high %v4109_v60, %v4113_v40  ;;  %v8702_v46 = vcombine.low %v4013_v11, %v4017_v57  ;;  %v3989_v55 = vld [vmem:[#allocation6 + $0x498] sm:$0xff] }
 0x3be   : > { %7461 = vmatpush2.bf16.msra.mxu0 %v8598_v62  ;;  %v4101_v62 = vld [vmem:[#allocation6 + $0x818] sm:$0xff] }
 0x3bf   : > { %7516 = vmatprep.subr.bf16.mxu0 %v8847_v38  ;;  %v8703_v38 = vcombine.high %v4013_v11, %v4017_v57  ;;  %v8790_v58 = vcombine.low %v4101_v62, %v4105_v20  ;;  %v3993_v47 = vld [vmem:[#allocation6 + $0x4b8] sm:$0xff] }
 0x3c0   : > { %7410 = vmatpush2.bf16.msra.mxu1 %v9012_v22  ;;  %v4009_v22 = vld [vmem:[#allocation6 + $0x538] sm:$0xff]  ;;  %v8678_v6 = vcombine.low %v3989_v55, %v3993_v47 }
 0x3c1   : > { %7463 = vmatmul.mubr.bf16.vlgmr.msra.gmra.mxu0 %v9420_v13  ;;  %7411 = vmatprep.subr.bf16.mxu1 %v9005_v26  ;;  %v4292_v13 = vld [vmem:[#allocation6 + $0xe10] sm:$0xff]  ;;  %v8791_v26 = vcombine.high %v4101_v62, %v4105_v20  ;;  %v3981_v52 = vld [vmem:[#allocation6 + $0x458] sm:$0xff] }
 0x3c2   : > { %7517 = vmatpush1.bf16.msra.mxu0 %v8846_v2  ;;  %7548 = vmatprep.mubr.bf16.mxu0 %v9515_v44  ;;  %v8988_v44 = vcombine.low %v4300_v35, %v4304_v36  ;;  %v8981_v28 = vcombine.high %v4292_v13, %v4296_v42  ;;  %v8980_v7 = vcombine.low %v4292_v13, %v4296_v42  ;;  %v4221_v2 = vld [vmem:[#allocation6 + $0xbd8] sm:$0xff] }
 0x3c3   : > { %7518 = vmatprep.subr.bf16.mxu0 %v8839_v29  ;;  %v8695_v29 = vcombine.high %v4005_v12, %v4009_v22  ;;  %v8694_v35 = vcombine.low %v4005_v12, %v4009_v22  ;;  %v8679_v42 = vcombine.high %v3989_v55, %v3993_v47  ;;  %v3985_v53 = vld [vmem:[#allocation6 + $0x478] sm:$0xff] }
 0x3c4   : > { %7412 = vmatpush2.bf16.msra.mxu1 %v9004_v41  ;;  %v8911_v41 = vcombine.high %v4221_v2, %v4225_v16  ;;  %v8671_v25 = vcombine.high %v3981_v52, %v3985_v53  ;;  %v3973_v0 = vld [vmem:[#allocation6 + $0x418] sm:$0xff]  ;;  %v8670_v8 = vcombine.low %v3981_v52, %v3985_v53 }
 0x3c5   : > { %7413 = vmatprep.subr.bf16.mxu1 %v8997_v33  ;;  %v4213_v33 = vld [vmem:[#allocation6 + $0xb98] sm:$0xff] }
 0x3c6   : > { %7519 = vmatpush1.bf16.msra.mxu0 %v8838_v43  ;;  %v4217_v43 = vld [vmem:[#allocation6 + $0xbb8] sm:$0xff] }
 0x3c7   : > { %7520 = vmatprep.subr.bf16.mxu0 %v8831_v39  ;;  %v8910_v39 = vcombine.low %v4221_v2, %v4225_v16  ;;  %v3977_v51 = vld [vmem:[#allocation6 + $0x438] sm:$0xff] }
 0x3c8   : > { %7414 = vmatpush2.bf16.msra.mxu1 %v8996_v9  ;;  %v8903_v9 = vcombine.high %v4213_v33, %v4217_v43  ;;  %v8663_v61 = vcombine.high %v3973_v0, %v3977_v51  ;;  %v4093_v60 = vld [vmem:[#allocation6 + $0x7d8] sm:$0xff]  ;;  %v8662_v11 = vcombine.low %v3973_v0, %v3977_v51 }
 0x3c9   : > { %7415 = vmatprep.subr.bf16.mxu1 %v8989_v50  ;;  %v4205_v50 = vld [vmem:[#allocation6 + $0xb58] sm:$0xff] }
 0x3ca   : > { %7521 = vmatpush1.bf16.msra.mxu0 %v8830_v1  ;;  %v4209_v1 = vld [vmem:[#allocation6 + $0xb78] sm:$0xff] }
 0x3cb   : > { %7522 = vmatprep.subr.bf16.mxu0 %v8823_v10  ;;  %v8902_v10 = vcombine.low %v4213_v33, %v4217_v43  ;;  %v4097_v40 = vld [vmem:[#allocation6 + $0x7f8] sm:$0xff] }
 0x3cc   : > { %7416 = vmatpush2.bf16.msra.mxu1 %v8988_v44  ;;  %v8895_v44 = vcombine.high %v4205_v50, %v4209_v1  ;;  %v8783_v57 = vcombine.high %v4093_v60, %v4097_v40  ;;  %v4085_v62 = vld [vmem:[#allocation6 + $0x798] sm:$0xff]  ;;  %v8782_v12 = vcombine.low %v4093_v60, %v4097_v40 }
 0x3cd   : > { %7417 = vmatprep.subr.bf16.mxu1 %v8981_v28  ;;  %v4197_v28 = vld [vmem:[#allocation6 + $0xb18] sm:$0xff] }
 0x3ce   : > { %7523 = vmatpush1.bf16.msra.mxu0 %v8822_v15  ;;  %v4201_v15 = vld [vmem:[#allocation6 + $0xb38] sm:$0xff] }
 0x3cf   : > { %7524 = vmatprep.subr.bf16.mxu0 %v8815_v63  ;;  %v8894_v63 = vcombine.low %v4205_v50, %v4209_v1  ;;  %v4089_v20 = vld [vmem:[#allocation6 + $0x7b8] sm:$0xff]  ;;  %v7120_v1 = vpop.f32.mrf.mxu0 }
 0x3d0   : > { %7418 = vmatpush2.bf16.msra.mxu1 %v8980_v7  ;;  %v8887_v7 = vcombine.high %v4197_v28, %v4201_v15  ;;  %v8775_v22 = vcombine.high %v4085_v62, %v4089_v20  ;;  %v4077_v2 = vld [vmem:[#allocation6 + $0x758] sm:$0xff] }
 0x3d1   : > { %7473 = vmatprep.subr.bf16.mxu1 %v8719_v54  ;;  %v4189_v54 = vld [vmem:[#allocation6 + $0xad8] sm:$0xff]  ;;  %v7122_v53 = vpop.f32.mrf.mxu0 }
 0x3d2   : > { %7525 = vmatpush1.bf16.msra.mxu0 %v8814_v5  ;;  %v4193_v5 = vld [vmem:[#allocation6 + $0xaf8] sm:$0xff] }
 0x3d3   : > { %7526 = vmatprep.subr.bf16.mxu0 %v8807_v24  ;;  %7420 = vmatmul.mubr.bf16.vlgmr.msra.gmra.mxu1 %v9533_v59  ;;  %v8886_v24 = vcombine.low %v4197_v28, %v4201_v15  ;;  %v4081_v16 = vld [vmem:[#allocation6 + $0x778] sm:$0xff] }
 0x3d4   : > { %7474 = vmatpush1.bf16.msra.mxu1 %v8718_v3  ;;  %7505 = vmatprep.mubr.bf16.mxu1 %v9480_v4  ;;  %v4001_v4 = vld [vmem:[#allocation6 + $0x4f8] sm:$0xff]  ;;  %v8879_v3 = vcombine.high %v4189_v54, %v4193_v5 }
 0x3d5   : > { %7475 = vmatprep.subr.bf16.mxu1 %v8711_v45  ;;  %v8687_v36 = vcombine.high %v3997_v30, %v4001_v4  ;;  %v8686_v13 = vcombine.low %v3997_v30, %v4001_v4  ;;  %v4181_v45 = vld [vmem:[#allocation6 + $0xa98] sm:$0xff]  ;;  %v8774_v30 = vcombine.low %v4085_v62, %v4089_v20  ;;  %v8767_v4 = vcombine.high %v4077_v2, %v4081_v16 }
 0x3d6   : > { %7527 = vmatpush1.bf16.msra.mxu0 %v8806_v14  ;;  %v4185_v14 = vld [vmem:[#allocation6 + $0xab8] sm:$0xff] }
 0x3d7   : > { %7528 = vmatprep.subr.bf16.mxu0 %v8799_v18  ;;  %v8878_v18 = vcombine.low %v4189_v54, %v4193_v5  ;;  %v4069_v33 = vld [vmem:[#allocation6 + $0x718] sm:$0xff] }
 0x3d8   : > { %7476 = vmatpush1.bf16.msra.mxu1 %v8710_v21  ;;  %v8871_v21 = vcombine.high %v4181_v45, %v4185_v14  ;;  %v4073_v43 = vld [vmem:[#allocation6 + $0x738] sm:$0xff] }
 0x3d9   : > { %7477 = vmatprep.subr.bf16.mxu1 %v8703_v38  ;;  %v4173_v38 = vld [vmem:[#allocation6 + $0xa58] sm:$0xff]  ;;  %v8758_v50 = vcombine.low %v4069_v33, %v4073_v43 }
 0x3da   : > { %7529 = vmatpush1.bf16.msra.mxu0 %v8798_v17  ;;  %v4177_v17 = vld [vmem:[#allocation6 + $0xa78] sm:$0xff] }
 0x3db   : > { %7530 = vmatprep.subr.bf16.mxu0 %v8791_v26  ;;  %v8870_v26 = vcombine.low %v4181_v45, %v4185_v14  ;;  %v4061_v47 = vld [vmem:[#allocation6 + $0x6d8] sm:$0xff] }
 0x3dc   : > { %7478 = vmatpush1.bf16.msra.mxu1 %v8702_v46  ;;  %v8863_v46 = vcombine.high %v4173_v38, %v4177_v17  ;;  %v4045_v28 = vld [vmem:[#allocation6 + $0x658] sm:$0xff] }
 0x3dd   : > { %7479 = vmatprep.subr.bf16.mxu1 %v8695_v29  ;;  %v4165_v29 = vld [vmem:[#allocation6 + $0xa18] sm:$0xff] }
 0x3de   : > { %7531 = vmatpush1.bf16.msra.mxu0 %v8790_v58  ;;  %v4169_v58 = vld [vmem:[#allocation6 + $0xa38] sm:$0xff] }
 0x3df   : > { %7532 = vmatprep.subr.bf16.mxu0 %v8911_v41  ;;  %v8862_v41 = vcombine.low %v4173_v38, %v4177_v17  ;;  %v8854_v55 = vcombine.low %v4165_v29, %v4169_v58  ;;  %v4049_v15 = vld [vmem:[#allocation6 + $0x678] sm:$0xff] }
 0x3e0   : > { %7480 = vmatpush1.bf16.msra.mxu1 %v8694_v35  ;;  %v8855_v35 = vcombine.high %v4165_v29, %v4169_v58  ;;  %v8735_v0 = vcombine.high %v4045_v28, %v4049_v15  ;;  %v4037_v51 = vld [vmem:[#allocation6 + $0x618] sm:$0xff]  ;;  %v8734_v54 = vcombine.low %v4045_v28, %v4049_v15 }
 0x3e1   : > { %7481 = vmatprep.subr.bf16.mxu1 %v8687_v36  ;;  %v8766_v36 = vcombine.low %v4077_v2, %v4081_v16  ;;  %v4277_v14 = vld [vmem:[#allocation6 + $0xd98] sm:$0xff] }
 0x3e2   : > { %7533 = vmatpush2.bf16.msra.mxu0 %v8910_v39  ;;  %v8759_v39 = vcombine.high %v4069_v33, %v4073_v43  ;;  %v4329_v48 = vld [vmem:[#allocation6 + $0xf38] sm:$0xff] }
 0x3e3   : > { %7534 = vmatprep.subr.bf16.mxu0 %v8903_v9  ;;  %v4065_v9 = vld [vmem:[#allocation6 + $0x6f8] sm:$0xff] }
 0x3e4   : > { %7482 = vmatpush1.bf16.msra.mxu1 %v8686_v13  ;;  %v8751_v13 = vcombine.high %v4061_v47, %v4065_v9  ;;  %v8750_v52 = vcombine.low %v4061_v47, %v4065_v9 }
 0x3e5   : > { %7483 = vmatprep.subr.bf16.mxu1 %v8679_v42  ;;  %v4053_v42 = vld [vmem:[#allocation6 + $0x698] sm:$0xff] }
 0x3e6   : > { %7535 = vmatpush2.bf16.msra.mxu0 %v8902_v10  ;;  %v4057_v10 = vld [vmem:[#allocation6 + $0x6b8] sm:$0xff] }
 0x3e7   : > { %7536 = vmatprep.subr.bf16.mxu0 %v8895_v44  ;;  %v8743_v44 = vcombine.high %v4053_v42, %v4057_v10 }
 0x3e8   : > { %7484 = vmatpush1.bf16.msra.mxu1 %v8678_v6  ;;  %v8742_v6 = vcombine.low %v4053_v42, %v4057_v10 }
 0x3e9   : > { %7485 = vmatprep.subr.bf16.mxu1 %v8671_v25  ;;  %v7124_v25 = vpop.f32.mrf.mxu0 }
 0x3ea   : > { %7537 = vmatpush2.bf16.msra.mxu0 %v8894_v63  ;;  %v7163_v63 = vpop.f32.mrf.mxu1 }
 0x3eb   : > { %7538 = vmatprep.subr.bf16.mxu0 %v8887_v7  ;;  %v4041_v7 = vld [vmem:[#allocation6 + $0x638] sm:$0xff]  ;;  %v7126_v5 = vpop.f32.mrf.mxu0 }
 0x3ec   : > { %7486 = vmatpush1.bf16.msra.mxu1 %v8670_v8  ;;  %v7165_v8 = vpop.f32.mrf.mxu1  ;;  %v8726_v40 = vcombine.low %v4037_v51, %v4041_v7 }
 0x3ed   : > { %7487 = vmatprep.subr.bf16.mxu1 %v8663_v61  ;;  %v8727_v61 = vcombine.high %v4037_v51, %v4041_v7  ;;  %v7206_v60 = vpop.f32.mrf.mxu0  ;;  %v7166_v62 = vadd.f32 %v7165_v8, %v7122_v53  ;;  %v4253_v53 = vld [vmem:[#allocation6 + $0xcd8] sm:$0xff] }
 0x3ee   : > { %7539 = vmatpush2.bf16.msra.mxu0 %v8886_v24  ;;  %v4289_v24 = vld [vmem:[#allocation6 + $0xdf8] sm:$0xff] }
 0x3ef   : > { %7540 = vmatprep.subr.bf16.mxu0 %v8879_v3  ;;  %v7167_v3 = vpop.f32.mrf.mxu1 }
 0x3f0   : > { %7488 = vmatpush1.bf16.msra.mxu1 %v8662_v11  ;;  %v4281_v11 = vld [vmem:[#allocation6 + $0xdb8] sm:$0xff]  ;;  %v7168_v17 = vadd.f32 %v7167_v3, %v7124_v25 }
 0x3f1   : > { %7489 = vmatprep.subr.bf16.mxu1 %v8783_v57  ;;  %v7208_v57 = vpop.f32.mrf.mxu0  ;;  %v8967_v38 = vcombine.high %v4277_v14, %v4281_v11  ;;  %v8966_v16 = vcombine.low %v4277_v14, %v4281_v11 }
 0x3f2   : > { %7541 = vmatpush2.bf16.msra.mxu0 %v8878_v18  ;;  %v7164_v18 = vadd.f32 %v7163_v63, %v7120_v1  ;;  %v7209_v58 = vadd.f32 %v7208_v57, %v7166_v62 }
 0x3f3   : > { %7542 = vmatprep.subr.bf16.mxu0 %v8871_v21  ;;  %v7169_v21 = vpop.f32.mrf.mxu1 }
 0x3f4   : > { %7490 = vmatpush2.bf16.msra.mxu1 %v8782_v12  ;;  %v4269_v12 = vld [vmem:[#allocation6 + $0xd58] sm:$0xff]  ;;  %v7207_v29 = vadd.f32 %v7206_v60, %v7164_v18 }
 0x3f5   : > { %7491 = vmatprep.subr.bf16.mxu1 %v8775_v22  ;;  %v4273_v22 = vld [vmem:[#allocation6 + $0xd78] sm:$0xff] }
 0x3f6   : > { %7543 = vmatpush2.bf16.msra.mxu0 %v8870_v26  ;;  %v7210_v26 = vpop.f32.mrf.mxu0 }
 0x3f7   : > { %7544 = vmatprep.subr.bf16.mxu0 %v8863_v46  ;;  %v7170_v46 = vadd.f32 %v7169_v21, %v7126_v5  ;;  %v7211_v43 = vadd.f32 %v7210_v26, %v7168_v17  ;;  %v4241_v17 = vld [vmem:[#allocation6 + $0xc78] sm:$0xff] }
 0x3f8   : > { %7492 = vmatpush2.bf16.msra.mxu1 %v8774_v30 }
 0x3f9   : > { %7493 = vmatprep.subr.bf16.mxu1 %v8767_v4  ;;  %v8959_v4 = vcombine.high %v4269_v12, %v4273_v22 }
 0x3fa   : > { %7545 = vmatpush2.bf16.msra.mxu0 %v8862_v41 }
 0x3fb   : > { %7546 = vmatprep.subr.bf16.mxu0 %v8855_v35  ;;  %v4261_v35 = vld [vmem:[#allocation6 + $0xd18] sm:$0xff] }
 0x3fc   : > { %7494 = vmatpush2.bf16.msra.mxu1 %v8766_v36  ;;  %v4265_v36 = vld [vmem:[#allocation6 + $0xd38] sm:$0xff] }
 0x3fd   : > { %7495 = vmatprep.subr.bf16.mxu1 %v8759_v39  ;;  %v7212_v39 = vpop.f32.mrf.mxu0  ;;  %v8950_v28 = vcombine.low %v4261_v35, %v4265_v36 }
 0x3fe   : > { %7547 = vmatpush2.bf16.msra.mxu0 %v8854_v55  ;;  %v7213_v9 = vadd.f32 %v7212_v39, %v7170_v46 }
 0x400   : > { %7496 = vmatpush2.bf16.msra.mxu1 %v8758_v50  ;;  %v8958_v50 = vcombine.low %v4269_v12, %v4273_v22 }
 0x401   : > { %7549 = vmatmul.mubr.bf16.vlgmr.msra.gmra.mxu0 %v9523_v19  ;;  %7497 = vmatprep.subr.bf16.mxu1 %v8751_v13  ;;  %v4285_v19 = vld [vmem:[#allocation6 + $0xdd8] sm:$0xff] }
 0x402   : > { %v8975_v45 = vcombine.high %v4285_v19, %v4289_v24  ;;  %v8974_v20 = vcombine.low %v4285_v19, %v4289_v24  ;;  %v4249_v19 = vld [vmem:[#allocation6 + $0xcb8] sm:$0xff]  ;;  %v9222_v24 = vmov 1966171168  }
 0x403   : > { %v7727_v60 = vunpack.c.l.s4 %v9222_v24  ;;  %v4309_v24 = vld [vmem:[#allocation6 + $0xe98] sm:$0xff] }
 0x404   : > { %7498 = vmatpush2.bf16.msra.mxu1 %v8750_v52 }
 0x405   : > { %7499 = vmatprep.subr.bf16.mxu1 %v8743_v44  ;;  %v4257_v44 = vld [vmem:[#allocation6 + $0xcf8] sm:$0xff]  ;;  %v7728_v12 = vunpack.c.0.s8 %v7727_v60 }
 0x406   : > { %v8943_v7 = vcombine.high %v4253_v53, %v4257_v44  ;;  %v8942_v11 = vcombine.low %v4253_v53, %v4257_v44  ;;  %v4313_v60 = vld [vmem:[#allocation6 + $0xeb8] sm:$0xff] }
 0x408   : > { %7500 = vmatpush2.bf16.msra.mxu1 %v8742_v6 }
 0x409   : > { %7501 = vmatprep.subr.bf16.mxu1 %v8735_v0 }
 0x40c   : > { %7502 = vmatpush2.bf16.msra.mxu1 %v8734_v54 }
 0x40d   : > { %7503 = vmatprep.subr.bf16.mxu1 %v8727_v61  ;;  %v4245_v61 = vld [vmem:[#allocation6 + $0xc98] sm:$0xff] }
 0x40e   : > { %v8935_v18 = vcombine.high %v4245_v61, %v4249_v19  ;;  %v8934_v46 = vcombine.low %v4245_v61, %v4249_v19 }
 0x410   : > { %7504 = vmatpush2.bf16.msra.mxu1 %v8726_v40 }
 0x411   : > { %7559 = vmatprep.subr.bf16.mxu1 %v8975_v45 }
 0x413   : > { %v7249_v2 = vpop.f32.mrf.mxu1  ;;  %7506 = vmatmul.mubr.bf16.vlgmr.msra.gmra.mxu1 %v9463_v27 }
 0x414   : > { %7560 = vmatpush1.bf16.msra.mxu1 %v8974_v20  ;;  %7591 = vmatprep.mubr.bf16.mxu1 %v9531_v23  ;;  %v7250_v41 = vadd.f32 %v7249_v2, %v7207_v29  ;;  %v8951_v23 = vcombine.high %v4261_v35, %v4265_v36  ;;  %v9589_v35 = vsub.s32 %v7728_v12, %v9378_v34 }
 0x415   : > { %v7251_v30 = vpop.f32.mrf.mxu1  ;;  %7561 = vmatprep.subr.bf16.mxu1 %v8967_v38  ;;  %v4237_v38 = vld [vmem:[#allocation6 + $0xc58] sm:$0xff] }
 0x416   : > { %v7252_v33 = vadd.f32 %v7251_v30, %v7209_v58  ;;  %v7775_v13 = vmul.f32 %v7250_v41, %v7250_v41  ;;  %v8927_v58 = vcombine.high %v4237_v38, %v4241_v17  ;;  %v9606_v31 = vrot.slane %v7853_v56, %v9589_v35 }
 0x417   : > { %v7253_v55 = vpop.f32.mrf.mxu1 }
 0x418   : > { %v9052_v47 = vpack.c.bf16 %v7252_v33, %v7250_v41  ;;  %v7254_v27 = vadd.f32 %v7253_v55, %v7211_v43  ;;  %7562 = vmatpush1.bf16.msra.mxu1 %v8966_v16  ;;  %v7776_v0 = vmul.f32 %v7252_v33, %v7252_v33  ;;  %v8926_v55 = vcombine.low %v4237_v38, %v4241_v17  ;;  %v7292_v17 = vpop.f32.mrf.mxu0 }
 0x419   : > { %v7255_v1 = vpop.f32.mrf.mxu1  ;;  %7563 = vmatprep.subr.bf16.mxu1 %v8959_v4  ;;  %v4229_v4 = vld [vmem:[#allocation6 + $0xc18] sm:$0xff] }
 0x41a   : > { %7651 = vst [vmem:[%s9563_s28 + $0x8] sm:$0xff] %v9052_v47  ;;  %v7672_v42 = vadd.f32 %v7254_v27, %v7250_v41  ;;  %v7783_v10 = vmul.f32 %v7254_v27, %v7254_v27  ;;  %v7256_v52 = vadd.f32 %v7255_v1, %v7213_v9  ;;  %v4233_v41 = vld [vmem:[#allocation6 + $0xc38] sm:$0xff]  ;;  %v7294_v12 = vpop.f32.mrf.mxu0 }
 0x41b   : > { %v4353_v1 = vld [vmem:[#allocation6 + $0xff8] sm:$0xff] }
 0x41c   : > { %v7673_v15 = vrot.slane %v7672_v42, 4  ;;  %v7803_v6 = vadd.f32 %v7783_v10, %v7775_v13  ;;  %v9056_v25 = vpack.c.bf16 %v7256_v52, %v7254_v27  ;;  %v7679_v63 = vadd.f32 %v7256_v52, %v7252_v33  ;;  %7564 = vmatpush1.bf16.msra.mxu1 %v8958_v50  ;;  %v4349_v50 = vld [vmem:[#allocation6 + $0xfd8] sm:$0xff] }
 0x41d   : > { %v7784_v51 = vmul.f32 %v7256_v52, %v7256_v52  ;;  %7565 = vmatprep.subr.bf16.mxu1 %v8951_v23  ;;  %v8919_v27 = vcombine.high %v4229_v4, %v4233_v41  ;;  %v8918_v10 = vcombine.low %v4229_v4, %v4233_v41  ;;  %v9039_v53 = vcombine.high %v4349_v50, %v4353_v1 }
 0x41e   : > { %v7674_v54 = vadd.f32 %v7673_v15, %v7672_v42  ;;  %v7804_v5 = vrot.slane %v7803_v6, 4  ;;  %7655 = vst [vmem:[%s9563_s28 + $0x28] sm:$0xff] %v9056_v25  ;;  %v7680_v8 = vrot.slane %v7679_v63, 4  ;;  %v9595_v42 = vrot.slane %v7722_v37, %v9589_v35  ;;  %v4345_v15 = vld [vmem:[#allocation6 + $0xfb8] sm:$0xff] }
 0x41f   : > { %v7810_v40 = vadd.f32 %v7784_v51, %v7776_v0  ;;  %v9038_v37 = vcombine.low %v4349_v50, %v4353_v1  ;;  %v4337_v0 = vld [vmem:[#allocation6 + $0xf78] sm:$0xff] }
 0x420   : > { %v7675_v3 = vrot.slane %v7674_v54, 2  ;;  %v7805_v45 = vadd.f32 %v7804_v5, %v7803_v6  ;;  %v7681_v14 = vadd.f32 %v7680_v8, %v7679_v63  ;;  %7566 = vmatpush1.bf16.msra.mxu1 %v8950_v28  ;;  %v4341_v28 = vld [vmem:[#allocation6 + $0xf98] sm:$0xff] }
 0x421   : > { %v7811_v57 = vrot.slane %v7810_v40, 4  ;;  %7567 = vmatprep.subr.bf16.mxu1 %v8943_v7  ;;  %v9031_v25 = vcombine.high %v4341_v28, %v4345_v15  ;;  %v4333_v63 = vld [vmem:[#allocation6 + $0xf58] sm:$0xff]  ;;  %v9030_v51 = vcombine.low %v4341_v28, %v4345_v15 }
 0x422   : > { %v7676_v62 = vadd.f32 %v7675_v3, %v7674_v54  ;;  %v7806_v20 = vrot.slane %v7805_v45, 2  ;;  %v7682_v21 = vrot.slane %v7681_v14, 2  ;;  %v9023_v7 = vcombine.high %v4333_v63, %v4337_v0  ;;  %v4325_v54 = vld [vmem:[#allocation6 + $0xf18] sm:$0xff] }
 0x423   : > { %v7812_v22 = vadd.f32 %v7811_v57, %v7810_v40  ;;  %v9022_v49 = vcombine.low %v4333_v63, %v4337_v0  ;;  %v9015_v56 = vcombine.high %v4325_v54, %v4329_v48  ;;  %v4317_v5 = vld [vmem:[#allocation6 + $0xed8] sm:$0xff]  ;;  %v9014_v61 = vcombine.low %v4325_v54, %v4329_v48 }
 0x424   : > { %v7677_v26 = vrot.slane %v7676_v62, 1  ;;  %v7807_v2 = vadd.f32 %v7806_v20, %v7805_v45  ;;  %v7683_v16 = vadd.f32 %v7682_v21, %v7681_v14  ;;  %7568 = vmatpush1.bf16.msra.mxu1 %v8942_v11  ;;  %v4321_v8 = vld [vmem:[#allocation6 + $0xef8] sm:$0xff]  ;;  %v8999_v3 = vcombine.high %v4309_v24, %v4313_v60 }
 0x425   : > { %v7813_v29 = vrot.slane %v7812_v22, 2  ;;  %7569 = vmatprep.subr.bf16.mxu1 %v8935_v18  ;;  %v9007_v19 = vcombine.high %v4317_v5, %v4321_v8  ;;  %v9006_v40 = vcombine.low %v4317_v5, %v4321_v8  ;;  %v4301_v45 = vld [vmem:[#allocation6 + $0xe58] sm:$0xff]  ;;  %v8998_v11 = vcombine.low %v4309_v24, %v4313_v60 }
 0x426   : > { %v7684_v30 = vrot.slane %v7683_v16, 1  ;;  %v7808_v33 = vrot.slane %v7807_v2, 1  ;;  %v7678_v36 = vadd.f32 %v7677_v26, %v7676_v62  ;;  %v4305_v14 = vld [vmem:[#allocation6 + $0xe78] sm:$0xff] }
 0x427   : > { %v7814_v43 = vadd.f32 %v7813_v29, %v7812_v22  ;;  %v8991_v57 = vcombine.high %v4301_v45, %v4305_v14  ;;  %v4293_v18 = vld [vmem:[#allocation6 + $0xe18] sm:$0xff]  ;;  %v8990_v20 = vcombine.low %v4301_v45, %v4305_v14  ;;  %v7296_v22 = vpop.f32.mrf.mxu0 }
 0x428   : > { %v7685_v39 = vadd.f32 %v7684_v30, %v7683_v16  ;;  %7570 = vmatpush1.bf16.msra.mxu1 %v8934_v46  ;;  %v7809_v23 = vadd.f32 %v7808_v33, %v7807_v2  ;;  %v4297_v62 = vld [vmem:[#allocation6 + $0xe38] sm:$0xff] }
 0x429   : > { %v7815_v47 = vrot.slane %v7814_v43, 1  ;;  %7571 = vmatprep.subr.bf16.mxu1 %v8927_v58  ;;  %v8983_v21 = vcombine.high %v4293_v18, %v4297_v62  ;;  %v8982_v38 = vcombine.low %v4293_v18, %v4297_v62  ;;  %v7298_v2 = vpop.f32.mrf.mxu0 }
 0x42a   : > { %v7723_v9 = vcombine.low %v7678_v36, %v7685_v39 }
 0x42b   : > { %v7816_v13 = vadd.f32 %v7815_v47, %v7814_v43 }
 0x42c   : > { %v9598_v34 = vrot.slane %v7723_v9, %v9589_v35  ;;  %7572 = vmatpush1.bf16.msra.mxu1 %v8926_v55 }
 0x42d   : > { %v7854_v52 = vcombine.low %v7809_v23, %v7816_v13  ;;  %7573 = vmatprep.subr.bf16.mxu1 %v8919_v27 }
 0x42e   : > { %v7754_v44 = vcombine.low %v9595_v42, %v9598_v34 }
 0x42f   : > { %v9609_v32 = vrot.slane %v7854_v52, %v9589_v35 }
 0x430   : > { %7574 = vmatpush1.bf16.msra.mxu1 %v8918_v10 }
 0x431   : > { %v7885_v6 = vcombine.low %v9606_v31, %v9609_v32  ;;  %7575 = vmatprep.subr.bf16.mxu1 %v9039_v53 }
 0x434   : > { %7576 = vmatpush2.bf16.msra.mxu1 %v9038_v37 }
 0x435   : > { %7577 = vmatprep.subr.bf16.mxu1 %v9031_v25 }
 0x438   : > { %7578 = vmatpush2.bf16.msra.mxu1 %v9030_v51 }
 0x439   : > { %7579 = vmatprep.subr.bf16.mxu1 %v9023_v7 }
 0x43c   : > { %7580 = vmatpush2.bf16.msra.mxu1 %v9022_v49 }
 0x43d   : > { %7581 = vmatprep.subr.bf16.mxu1 %v9015_v56 }
 0x440   : > { %7582 = vmatpush2.bf16.msra.mxu1 %v9014_v61 }
 0x441   : > { %7583 = vmatprep.subr.bf16.mxu1 %v9007_v19  ;;  %v7378_v46 = vpop.f32.mrf.mxu0 }
 0x443   : > { %v7380_v58 = vpop.f32.mrf.mxu0 }
 0x444   : > { %7584 = vmatpush2.bf16.msra.mxu1 %v9006_v40 }
 0x445   : > { %7585 = vmatprep.subr.bf16.mxu1 %v8999_v3  ;;  %v7382_v43 = vpop.f32.mrf.mxu0 }
 0x447   : > { %v7384_v1 = vpop.f32.mrf.mxu0 }
 0x448   : > { %7586 = vmatpush2.bf16.msra.mxu1 %v8998_v11 }
 0x449   : > { %7587 = vmatprep.subr.bf16.mxu1 %v8991_v57 }
 0x44c   : > { %7588 = vmatpush2.bf16.msra.mxu1 %v8990_v20 }
 0x44d   : > { %7589 = vmatprep.subr.bf16.mxu1 %v8983_v21 }
 0x450   : > { %7590 = vmatpush2.bf16.msra.mxu1 %v8982_v38 }
 0x453   : > { %7592 = vmatmul.mubr.bf16.vlgmr.msra.gmra.mxu1 %v9533_v59  ;;  %v7335_v26 = vpop.f32.mrf.mxu1 }
 0x454   : > { %v7336_v30 = vadd.f32 %v7335_v26, %v7292_v17 }
 0x455   : > { %v7337_v16 = vpop.f32.mrf.mxu1 }
 0x456   : > { %v7338_v4 = vadd.f32 %v7337_v16, %v7294_v12  ;;  %v7379_v55 = vadd.f32 %v7378_v46, %v7336_v30 }
 0x457   : > { %v7339_v29 = vpop.f32.mrf.mxu1 }
 0x458   : > { %v7340_v33 = vadd.f32 %v7339_v29, %v7296_v22  ;;  %v7381_v47 = vadd.f32 %v7380_v58, %v7338_v4 }
 0x459   : > { %v7341_v41 = vpop.f32.mrf.mxu1 }
 0x45a   : > { %v7342_v39 = vadd.f32 %v7341_v41, %v7298_v2  ;;  %v7383_v50 = vadd.f32 %v7382_v43, %v7340_v33 }
 0x45c   : > { %v7385_v52 = vadd.f32 %v7384_v1, %v7342_v39 }
 0x481   : > { %v7464_v29 = vpop.f32.mrf.mxu0 }
 0x483   : > { %v7466_v58 = vpop.f32.mrf.mxu0 }
 0x485   : > { %v7468_v30 = vpop.f32.mrf.mxu0 }
 0x487   : > { %v7470_v41 = vpop.f32.mrf.mxu0 }
 0x493   : > { %v7421_v36 = vpop.f32.mrf.mxu1 }
 0x494   : > { %v7422_v27 = vadd.f32 %v7421_v36, %v7379_v55 }
 0x495   : > { %v7423_v59 = vpop.f32.mrf.mxu1 }
 0x496   : > { %v7424_v9 = vadd.f32 %v7423_v59, %v7381_v47  ;;  %v7777_v28 = vmul.f32 %v7422_v27, %v7422_v27 }
 0x497   : > { %v7425_v23 = vpop.f32.mrf.mxu1 }
 0x498   : > { %v9053_v13 = vpack.c.bf16 %v7424_v9, %v7422_v27  ;;  %v7426_v10 = vadd.f32 %v7425_v23, %v7383_v50  ;;  %v7778_v54 = vmul.f32 %v7424_v9, %v7424_v9 }
 0x499   : > { %v7427_v53 = vpop.f32.mrf.mxu1 }
 0x49a   : > { %7652 = vst [vmem:[%s9563_s28 + $0x10] sm:$0xff] %v9053_v13  ;;  %v7686_v15 = vadd.f32 %v7426_v10, %v7422_v27  ;;  %v7785_v37 = vmul.f32 %v7426_v10, %v7426_v10  ;;  %v7428_v25 = vadd.f32 %v7427_v53, %v7385_v52 }
 0x49c   : > { %v7687_v63 = vrot.slane %v7686_v15, 4  ;;  %v7817_v0 = vadd.f32 %v7785_v37, %v7777_v28  ;;  %v9057_v51 = vpack.c.bf16 %v7428_v25, %v7426_v10  ;;  %v7693_v7 = vadd.f32 %v7428_v25, %v7424_v9 }
 0x49d   : > { %v7786_v48 = vmul.f32 %v7428_v25, %v7428_v25 }
 0x49e   : > { %v7688_v49 = vadd.f32 %v7687_v63, %v7686_v15  ;;  %v7818_v56 = vrot.slane %v7817_v0, 4  ;;  %7656 = vst [vmem:[%s9563_s28 + $0x30] sm:$0xff] %v9057_v51  ;;  %v7694_v5 = vrot.slane %v7693_v7, 4 }
 0x49f   : > { %v7824_v8 = vadd.f32 %v7786_v48, %v7778_v54 }
 0x4a0   : > { %v7689_v61 = vrot.slane %v7688_v49, 2  ;;  %v7819_v19 = vadd.f32 %v7818_v56, %v7817_v0  ;;  %v7695_v24 = vadd.f32 %v7694_v5, %v7693_v7 }
 0x4a1   : > { %v7825_v60 = vrot.slane %v7824_v8, 4 }
 0x4a2   : > { %v7690_v40 = vadd.f32 %v7689_v61, %v7688_v49  ;;  %v7820_v3 = vrot.slane %v7819_v19, 2  ;;  %v7696_v45 = vrot.slane %v7695_v24, 2 }
 0x4a3   : > { %v7826_v14 = vadd.f32 %v7825_v60, %v7824_v8 }
 0x4a4   : > { %v7691_v11 = vrot.slane %v7690_v40, 1  ;;  %v7821_v57 = vadd.f32 %v7820_v3, %v7819_v19  ;;  %v7697_v18 = vadd.f32 %v7696_v45, %v7695_v24 }
 0x4a5   : > { %v7827_v62 = vrot.slane %v7826_v14, 2 }
 0x4a6   : > { %v7698_v20 = vrot.slane %v7697_v18, 1  ;;  %v7822_v21 = vrot.slane %v7821_v57, 1  ;;  %v9616_v17 = vadd.f32 %v7691_v11, %v7690_v40 }
 0x4a7   : > { %v7828_v38 = vadd.f32 %v7827_v62, %v7826_v14 }
 0x4a8   : > { %v9618_v12 = vadd.f32 %v7698_v20, %v7697_v18  ;;  %v9622_v2 = vadd.f32 %v7822_v21, %v7821_v57 }
 0x4a9   : > { %v7829_v22 = vrot.slane %v7828_v38, 1 }
 0x4aa   : > { %v7724_v26 = vcombine.low %v9616_v17, %v9618_v12 }
 0x4ab   : > { %v9624_v16 = vadd.f32 %v7829_v22, %v7828_v38 }
 0x4ad   : > { %v7855_v46 = vcombine.low %v9622_v2, %v9624_v16  ;;  %v7893_v2 = vrot.slane %v7885_v6, %v9589_v35 }
 0x4c1   : > { %v7550_v43 = vpop.f32.mrf.mxu0 }
 0x4c3   : > { %v7552_v39 = vpop.f32.mrf.mxu0 }
 0x4c5   : > { %v7554_v9 = vpop.f32.mrf.mxu0 }
 0x4c7   : > { %v7556_v15 = vpop.f32.mrf.mxu0 }
 0x4d3   : > { %v7507_v4 = vpop.f32.mrf.mxu1 }
 0x4d4   : > { %v7508_v55 = vadd.f32 %v7507_v4, %v7464_v29 }
 0x4d5   : > { %v7509_v33 = vpop.f32.mrf.mxu1 }
 0x4d6   : > { %v7510_v47 = vadd.f32 %v7509_v33, %v7466_v58  ;;  %v7551_v23 = vadd.f32 %v7550_v43, %v7508_v55 }
 0x4d7   : > { %v7511_v36 = vpop.f32.mrf.mxu1 }
 0x4d8   : > { %v7512_v27 = vadd.f32 %v7511_v36, %v7468_v30  ;;  %v7553_v13 = vadd.f32 %v7552_v39, %v7510_v47 }
 0x4d9   : > { %v7513_v59 = vpop.f32.mrf.mxu1 }
 0x4da   : > { %v7514_v1 = vadd.f32 %v7513_v59, %v7470_v41  ;;  %v7555_v28 = vadd.f32 %v7554_v9, %v7512_v27  ;;  %v7746_v27 = vrot.slane %v7724_v26, %v9589_v35 }
 0x4dc   : > { %v7557_v0 = vadd.f32 %v7556_v15, %v7514_v1 }
 0x513   : > { %v7593_v50 = vpop.f32.mrf.mxu1 }
 0x514   : > { %v7594_v52 = vadd.f32 %v7593_v50, %v7551_v23  ;;  %v7877_v23 = vrot.slane %v7855_v46, %v9589_v35 }
 0x515   : > { %v7595_v10 = vpop.f32.mrf.mxu1 }
 0x516   : > { %v7596_v53 = vadd.f32 %v7595_v10, %v7553_v13  ;;  %v7779_v7 = vmul.f32 %v7594_v52, %v7594_v52  ;;  %v7762_v10 = vrot.slane %v7754_v44, %v9589_v35 }
 0x517   : > { %v7597_v37 = vpop.f32.mrf.mxu1 }
 0x518   : > { %v9054_v25 = vpack.c.bf16 %v7596_v53, %v7594_v52  ;;  %v7598_v63 = vadd.f32 %v7597_v37, %v7555_v28  ;;  %v7780_v19 = vmul.f32 %v7596_v53, %v7596_v53 }
 0x519   : > { %v7599_v51 = vpop.f32.mrf.mxu1 }
 0x51a   : > { %7653 = vst [vmem:[%s9563_s28 + $0x18] sm:$0xff] %v9054_v25  ;;  %v7700_v54 = vadd.f32 %v7598_v63, %v7594_v52  ;;  %v7787_v48 = vmul.f32 %v7598_v63, %v7598_v63  ;;  %v7600_v49 = vadd.f32 %v7599_v51, %v7557_v0 }
 0x51c   : > { %v7701_v56 = vrot.slane %v7700_v54, 4  ;;  %v7831_v5 = vadd.f32 %v7787_v48, %v7779_v7  ;;  %v9058_v8 = vpack.c.bf16 %v7600_v49, %v7598_v63  ;;  %v7707_v61 = vadd.f32 %v7600_v49, %v7596_v53 }
 0x51d   : > { %v7788_v24 = vmul.f32 %v7600_v49, %v7600_v49 }
 0x51e   : > { %v7702_v60 = vadd.f32 %v7701_v56, %v7700_v54  ;;  %v7832_v40 = vrot.slane %v7831_v5, 4  ;;  %7657 = vst [vmem:[%s9563_s28 + $0x38] sm:$0xff] %v9058_v8  ;;  %v7708_v3 = vrot.slane %v7707_v61, 4 }
 0x51f   : > { %v7838_v45 = vadd.f32 %v7788_v24, %v7780_v19 }
 0x520   : > { %v7703_v14 = vrot.slane %v7702_v60, 2  ;;  %v7833_v11 = vadd.f32 %v7832_v40, %v7831_v5  ;;  %v7709_v57 = vadd.f32 %v7708_v3, %v7707_v61 }
 0x521   : > { %v7839_v18 = vrot.slane %v7838_v45, 4 }
 0x522   : > { %v7704_v62 = vadd.f32 %v7703_v14, %v7702_v60  ;;  %v7834_v20 = vrot.slane %v7833_v11, 2  ;;  %v7710_v21 = vrot.slane %v7709_v57, 2 }
 0x523   : > { %v7840_v38 = vadd.f32 %v7839_v18, %v7838_v45 }
 0x524   : > { %v7705_v22 = vrot.slane %v7704_v62, 1  ;;  %v7835_v29 = vadd.f32 %v7834_v20, %v7833_v11  ;;  %v7711_v58 = vadd.f32 %v7710_v21, %v7709_v57 }
 0x525   : > { %v7841_v30 = vrot.slane %v7840_v38, 2 }
 0x526   : > { %v7712_v4 = vrot.slane %v7711_v58, 1  ;;  %v7836_v41 = vrot.slane %v7835_v29, 1  ;;  %v7706_v43 = vadd.f32 %v7705_v22, %v7704_v62 }
 0x527   : > { %v7842_v33 = vadd.f32 %v7841_v30, %v7840_v38 }
 0x528   : > { %v7713_v36 = vadd.f32 %v7712_v4, %v7711_v58  ;;  %v7837_v47 = vadd.f32 %v7836_v41, %v7835_v29 }
 0x529   : > { %v7843_v39 = vrot.slane %v7842_v33, 1 }
 0x52a   : > { %v7725_v55 = vcombine.low %v7706_v43, %v7713_v36 }
 0x52b   : > { %v7844_v59 = vadd.f32 %v7843_v39, %v7842_v33 }
 0x52c   : > { %v7753_v9 = vrot.slane %v7725_v55, %v9589_v35 }
 0x52d   : > { %v7856_v50 = vcombine.low %v7837_v47, %v7844_v59 }
 0x52e   : > { %v7755_v1 = vcombine.low %v7746_v27, %v7753_v9 }
 0x52f   : > { %v7884_v13 = vrot.slane %v7856_v50, %v9589_v35 }
 0x530   : > { %v7769_v17 = vrot.slane %v7755_v1, %v9589_v35 }
 0x531   : > { %v7886_v12 = vcombine.low %v7877_v23, %v7884_v13 }
 0x532   : > { %v7770_v26 = vcombine.low %v7762_v10, %v7769_v17 }
 0x533   : > { %v7900_v16 = vrot.slane %v7886_v12, %v9589_v35 }
 0x534   : > { %7772 = vst [vmem:[%s318_s8] sm:$0xff] %v7770_v26 }
 0x535   : > { %v7901_v42 = vcombine.low %v7893_v2, %v7900_v16 }
 0x537   : > { %7903 = vst [vmem:[%s322_s10] sm:$0xff] %v7901_v42 }
 0x538 PF: > { %s19_s21 = sadd.s32 1, %s9214_s21  }
 0x539   : > { %p16_p9 = scmp.ge.s32.totalorder %s19_s21, 4  }
 0x53b   :  { %18 = sbr.rel (!%p16_p9) target bundleno = 2 (0x2), region = 103 }
 0x540   :  { %7956 = vsyncpa [#allocation3], 1 }
 0x541   :  { %7958 = vsyncpa [#allocation3 + $0x1], 1 }
 0x542   :  { %7959 = vsyncpa [#allocation5], 1 }

</bundles_post_ra>
